<compile_context>
chip_gen: v7x
topology: tpu7x:2x2x1
jax: 0.10.0
libtpu: 0.0.40
codegen_flags: <defaults>
</compile_context>

<pallas_src>
import math

import jax
import jax.numpy as jnp
from jax.experimental import pallas as pl
from jax.experimental.pallas import tpu as pltpu

SQRT_HALF = math.sqrt(0.5)
LANE = 128  # hidden / vocab are zero-padded to this lane width


# ----------------------------------------------------------------------------
# Fused decoder kernel
# ----------------------------------------------------------------------------
def _fused_decoder_kernel(ids_ref, emb_tab_ref, wih_ref, whh_ref, bias_ref,
                          enc_ref, w_cat_ref, w_mix_ref, w_fin_ref, b_fin_ref,
                          out_ref, y_scr):
    # ids_ref      : (T*B, 1) int32   shifted token ids, time-major (row = t*B+b)
    # emb_tab_ref  : (E, Hp)           zero-padded embedding table
    # wih/whh_ref  : (L, Hp, 4Hp)      gate-block padded, transposed LSTM weights
    # bias_ref     : (L, 1, 4Hp)       pre-summed b_ih+b_hh, gate-block padded
    # enc_ref      : (B, S, Hp)        zero-padded encoder hidden states
    # w_cat_ref    : (Hp, 2Hp)         [attn input_proj | attn out_proj(x half)]
    # w_mix_ref    : (Hp, Hp)          attn out_proj (mix half)
    # w_fin_ref    : (Hp, Vp)          final projection (lane-dense padded vocab)
    # b_fin_ref    : (1, Vp)           final bias (-1e30 in padded cols)
    # out_ref      : (B, T, Vp)        padded log-probs
    # y_scr        : (T*B, Hp)         VMEM scratch, per-layer LSTM output
    TB = ids_ref.shape[0]
    E = emb_tab_ref.shape[0]
    L, Hp, _ = wih_ref.shape
    B, S, _ = enc_ref.shape
    T = TB // B
    f32 = jnp.float32

    # --- embedding lookup in-kernel: one-hot @ table (MXU, table stays VMEM) --
    ids = ids_ref[...]                                              # (TB, 1)
    e_iota = jax.lax.broadcasted_iota(jnp.int32, (TB, E), 1)
    onehot = (e_iota == ids).astype(f32)                            # (TB, E)
    emb = jnp.dot(onehot, emb_tab_ref[...],
                  preferred_element_type=f32)                       # (TB, Hp)

    # --- fused multi-layer LSTM (hoisted input matmul, unrolled time loop) ---
    x = emb
    for l in range(L):
        # one big (T*B, Hp) x (Hp, 4Hp) contraction off the recurrence path
        gx = jnp.dot(x, wih_ref[l], preferred_element_type=f32) + bias_ref[l]
        whh = whh_ref[l]                                            # (Hp, 4Hp)
        h = jnp.zeros((B, Hp), f32)
        c = jnp.zeros((B, Hp), f32)
        for t in range(T):                                          # unrolled
            g = gx[t * B:(t + 1) * B, :] + jnp.dot(
                h, whh, preferred_element_type=f32)                 # (B, 4Hp)
            # Hp = 128 -> every gate slice is a full-vreg lane slice
            i_g = jax.nn.sigmoid(g[:, 0 * Hp:1 * Hp])
            f_g = jax.nn.sigmoid(g[:, 1 * Hp:2 * Hp])
            g_g = jnp.tanh(g[:, 2 * Hp:3 * Hp])
            o_g = jax.nn.sigmoid(g[:, 3 * Hp:4 * Hp])
            c = f_g * c + i_g * g_g
            h = o_g * jnp.tanh(c)
            y_scr[t * B:(t + 1) * B, :] = h
        x = y_scr[...]                                              # (TB, Hp)
    lstm_out = x

    # --- residual 1 ---
    x1 = (emb + lstm_out) * SQRT_HALF                               # (TB, Hp)

    # --- attention + residual 2 + output projection + log-softmax, per batch --
    r_iota = jax.lax.broadcasted_iota(jnp.int32, (T, TB), 0)
    c_iota = jax.lax.broadcasted_iota(jnp.int32, (T, TB), 1)
    w_cat = w_cat_ref[...]
    w_mix = w_mix_ref[...]
    w_fin = w_fin_ref[...]
    b_fin = b_fin_ref[...]
    for b in range(B):
        # selection matrix picking batch b's rows out of the time-major layout
        sel = (c_iota == r_iota * B + b).astype(f32)                # (T, TB)
        x1_b = jnp.dot(sel, x1, preferred_element_type=f32)         # (T, Hp)

        # fused [input_proj | out_proj(x half)]: x1 hits the MXU once
        xw = jnp.dot(x1_b, w_cat, preferred_element_type=f32)       # (T, 2Hp)
        proj = xw[:, :Hp]
        xhalf = xw[:, Hp:]

        enc_b = enc_ref[b]                                          # (S, Hp)
        sc = jax.lax.dot_general(proj, enc_b, (((1,), (1,)), ((), ())),
                                 preferred_element_type=f32)        # (T, S)
        sc = sc - jnp.max(sc, axis=-1, keepdims=True)
        p = jnp.exp(sc)
        inv = pl.reciprocal(jnp.sum(p, axis=-1, keepdims=True), approx=False)
        attn = p * inv                                              # softmax
        mix = jnp.dot(attn, enc_b, preferred_element_type=f32)      # (T, Hp)

        att = jnp.tanh(jnp.dot(mix, w_mix, preferred_element_type=f32) + xhalf)
        x2 = (x1_b + att) * SQRT_HALF                               # (T, Hp)

        logits = jnp.dot(x2, w_fin, preferred_element_type=f32) + b_fin
        logits = logits - jnp.max(logits, axis=-1, keepdims=True)
        lse = jnp.log(jnp.sum(jnp.exp(logits), axis=-1, keepdims=True))
        out_ref[b] = logits - lse                                   # (T, Vp)


def fused_decoder(ids_col, enc_p, params):
    TB = ids_col.shape[0]
    B, _, _ = enc_p.shape
    T = TB // B
    Hp = params['emb_tab'].shape[1]
    Vp = params['w_fin'].shape[1]
    vmem = pl.BlockSpec(memory_space=pltpu.MemorySpace.VMEM)
    return pl.pallas_call(
        _fused_decoder_kernel,
        out_shape=jax.ShapeDtypeStruct((B, T, Vp), jnp.float32),
        in_specs=[vmem] * 10,
        out_specs=vmem,
        scratch_shapes=[pltpu.VMEM((TB, Hp), jnp.float32)],
    )(ids_col, params['emb_tab'], params['wih'], params['whh'], params['bias'],
      enc_p, params['w_cat'], params['w_mix'], params['w_fin'], params['b_fin'])


# ----------------------------------------------------------------------------
# Parameter construction (deterministic synthetic weights + padded kernel view)
# ----------------------------------------------------------------------------
def init_params(key, hidden_dim, embedding_vocab_size, decoder_vocab_size, layers):
    H, E, V, L = hidden_dim, embedding_vocab_size, decoder_vocab_size, layers
    Hp = ((H + LANE - 1) // LANE) * LANE
    Vp = ((V + LANE - 1) // LANE) * LANE
    keys = jax.random.split(key, 1 + 4 * L + 4)
    ki = iter(keys)

    raw = {}
    raw['embedding'] = 0.1 * jax.random.normal(next(ki), (E, H), jnp.float32)
    raw['lstm'] = []
    for _ in range(L):
        w_ih = 0.1 * jax.random.normal(next(ki), (4 * H, H), jnp.float32)
        w_hh = 0.1 * jax.random.normal(next(ki), (4 * H, H), jnp.float32)
        b_ih = 0.1 * jax.random.normal(next(ki), (4 * H,), jnp.float32)
        b_hh = 0.1 * jax.random.normal(next(ki), (4 * H,), jnp.float32)
        raw['lstm'].append((w_ih, w_hh, b_ih, b_hh))
    raw['attn_in_w'] = 0.1 * jax.random.normal(next(ki), (H, H), jnp.float32)
    raw['attn_out_w'] = 0.1 * jax.random.normal(next(ki), (H, 2 * H), jnp.float32)
    raw['out_w'] = 0.1 * jax.random.normal(next(ki), (V, H), jnp.float32)
    raw['out_b'] = 0.1 * jax.random.normal(next(ki), (V,), jnp.float32)

    # ---- padded, transposed view consumed by the kernel ----
    pad = {}
    pad['emb_tab'] = jnp.zeros((E, Hp), jnp.float32).at[:, :H].set(raw['embedding'])

    wih_l, whh_l, b_l = [], [], []
    for (w_ih, w_hh, b_ih, b_hh) in raw['lstm']:
        wih_t, whh_t, bsum = w_ih.T, w_hh.T, b_ih + b_hh            # (H,4H), (4H,)
        wih_p = jnp.zeros((Hp, 4 * Hp), jnp.float32)
        whh_p = jnp.zeros((Hp, 4 * Hp), jnp.float32)
        b_p = jnp.zeros((1, 4 * Hp), jnp.float32)
        for g in range(4):                                          # gate blocks i,f,g,o
            wih_p = wih_p.at[:H, g * Hp:g * Hp + H].set(wih_t[:, g * H:(g + 1) * H])
            whh_p = whh_p.at[:H, g * Hp:g * Hp + H].set(whh_t[:, g * H:(g + 1) * H])
            b_p = b_p.at[0, g * Hp:g * Hp + H].set(bsum[g * H:(g + 1) * H])
        wih_l.append(wih_p); whh_l.append(whh_p); b_l.append(b_p)
    pad['wih'] = jnp.stack(wih_l)                                   # (L, Hp, 4Hp)
    pad['whh'] = jnp.stack(whh_l)
    pad['bias'] = jnp.stack(b_l)                                    # (L, 1, 4Hp)

    w_in_t = raw['attn_in_w'].T                                     # (H, H)
    w_out_t = raw['attn_out_w'].T                                   # (2H, H)
    w_in_p = jnp.zeros((Hp, Hp), jnp.float32).at[:H, :H].set(w_in_t)
    w_x_p = jnp.zeros((Hp, Hp), jnp.float32).at[:H, :H].set(w_out_t[H:, :])
    w_mix_p = jnp.zeros((Hp, Hp), jnp.float32).at[:H, :H].set(w_out_t[:H, :])
    pad['w_cat'] = jnp.concatenate([w_in_p, w_x_p], axis=1)         # (Hp, 2Hp)
    pad['w_mix'] = w_mix_p

    pad['w_fin'] = jnp.zeros((Hp, Vp), jnp.float32).at[:H, :V].set(raw['out_w'].T)
    # padded vocab cols: zero weights + -1e30 bias -> exp()==0, max/LSE unaffected
    pad['b_fin'] = jnp.full((1, Vp), -1e30, jnp.float32).at[0, :V].set(raw['out_b'])
    return raw, pad


# ----------------------------------------------------------------------------
# Decoder forward (train mode).  dropout = 0.0 -> identity.
# Returns lane-dense padded (B, T, 128) log-probs; consumers slice [..., :V].
# ----------------------------------------------------------------------------
@jax.jit
def decoder_forward_train(params, targets, encoder_hidden):
    B, T = targets.shape
    Hp = params['emb_tab'].shape[1]
    H = encoder_hidden.shape[-1]
    # teacher forcing: start token 0, shift targets right; time-major flat ids
    start = jnp.zeros((B, 1), jnp.int32)
    ids = jnp.concatenate([start, targets[:, :-1].astype(jnp.int32)], axis=1)
    ids_col = ids.T.reshape(T * B, 1)                               # row = t*B + b
    # zero-pad encoder states to the kernel's lane-dense hidden width
    enc_p = jnp.pad(encoder_hidden, ((0, 0), (0, 0), (0, Hp - H)))
    return fused_decoder(ids_col, enc_p, params)


# ----------------------------------------------------------------------------
# Pure-JAX reference (unpadded weights) for correctness check
# ----------------------------------------------------------------------------
def reference_forward(raw, targets, encoder_hidden):
    emb_tab = raw['embedding']
    H = emb_tab.shape[1]
    B, T = targets.shape
    start = jnp.zeros((B, 1), jnp.int32)
    ids = jnp.concatenate([start, targets[:, :-1].astype(jnp.int32)], axis=1)
    emb = emb_tab[ids]                                              # (B, T, H)

    x = emb
    for (w_ih, w_hh, b_ih, b_hh) in raw['lstm']:
        wih_t, whh_t, bias = w_ih.T, w_hh.T, b_ih + b_hh
        h = jnp.zeros((B, H), jnp.float32)
        c = jnp.zeros((B, H), jnp.float32)
        outs = []
        for t in range(T):
            g = x[:, t, :] @ wih_t + h @ whh_t + bias
            i_g = jax.nn.sigmoid(g[:, 0 * H:1 * H])
            f_g = jax.nn.sigmoid(g[:, 1 * H:2 * H])
            g_g = jnp.tanh(g[:, 2 * H:3 * H])
            o_g = jax.nn.sigmoid(g[:, 3 * H:4 * H])
            c = f_g * c + i_g * g_g
            h = o_g * jnp.tanh(c)
            outs.append(h)
        x = jnp.stack(outs, axis=1)
    lstm_out = x

    x1 = (emb + lstm_out) * SQRT_HALF
    proj = jnp.einsum('bth,hd->btd', x1, raw['attn_in_w'].T)
    scores = jnp.einsum('btd,bsd->bts', proj, encoder_hidden)
    attn = jax.nn.softmax(scores, axis=-1)
    mix = jnp.einsum('bts,bsd->btd', attn, encoder_hidden)
    w_out_t = raw['attn_out_w'].T
    att = jnp.tanh(jnp.einsum('bth,ho->bto', mix, w_out_t[:H, :]) +
                   jnp.einsum('bth,ho->bto', x1, w_out_t[H:, :]))
    x2 = (x1 + att) * SQRT_HALF
    logits = jnp.einsum('bth,hv->btv', x2, raw['out_w'].T) + raw['out_b']
    return jax.nn.log_softmax(logits, axis=-1)


# ----------------------------------------------------------------------------
if __name__ == "__main__":
    hidden_dim = 32
    embedding_vocab_size = 16
    decoder_vocab_size = 12
    length = 8            # target sequence length
    layers = 2
    batch = 2
    source_len = 8

    key = jax.random.PRNGKey(0)
    k_par, k_tgt, k_enc, k_x = jax.random.split(key, 4)

    raw, padded = init_params(k_par, hidden_dim, embedding_vocab_size,
                              decoder_vocab_size, layers)

    # module inputs (train mode): x is only used for its batch size
    x = jax.random.normal(k_x, (batch, hidden_dim), jnp.float32)
    targets = jax.random.randint(k_tgt, (batch, length), 0, decoder_vocab_size,
                                 jnp.int32)
    encoder_hidden = jax.random.normal(k_enc, (batch, source_len, hidden_dim),
                                       jnp.float32)

    out_pad = decoder_forward_train(padded, targets, encoder_hidden)
    out_pad = jax.block_until_ready(out_pad)

    # consumer-side slice of the lane-dense (B, T, 128) output
    out = out_pad[:, :, :decoder_vocab_size]
    ref = reference_forward(raw, targets, encoder_hidden)

    assert out.shape == (batch, length, decoder_vocab_size)
    err = float(jnp.max(jnp.abs(out - ref)))
    assert err < 1e-3, f"mismatch vs pure-JAX reference: max abs err = {err}"
    print("KERNEL_OK")
</pallas_src>

<mosaic_0001>
module attributes {stable_mosaic.version = 11 : i64} {
  func.func @_fused_decoder_kernel(%arg0: memref<16x1xi32, #tpu.memory_space<vmem>>, %arg1: memref<16x128xf32, #tpu.memory_space<vmem>>, %arg2: memref<2x128x512xf32, #tpu.memory_space<vmem>>, %arg3: memref<2x128x512xf32, #tpu.memory_space<vmem>>, %arg4: memref<2x1x512xf32, #tpu.memory_space<vmem>>, %arg5: memref<2x8x128xf32, #tpu.memory_space<vmem>>, %arg6: memref<128x256xf32, #tpu.memory_space<vmem>>, %arg7: memref<128x128xf32, #tpu.memory_space<vmem>>, %arg8: memref<128x128xf32, #tpu.memory_space<vmem>>, %arg9: memref<1x128xf32, #tpu.memory_space<vmem>>, %arg10: memref<2x8x128xf32, #tpu.memory_space<vmem>>, %arg11: memref<16x128xf32, #tpu.memory_space<vmem>>) attributes {dimension_semantics = [], scalar_prefetch = 0 : i64, scratch_operands = 1 : i64, tpu.core_type = #tpu.core_type<tc>} {
    %c0 = arith.constant 0 : index
    %c0_0 = arith.constant 0 : index
    %0 = vector.load %arg0[%c0, %c0_0] : memref<16x1xi32, #tpu.memory_space<vmem>>, vector<16x1xi32>
    %1 = tpu.iota {dimensions = array<i32: 1>} : vector<16x16xi32>
    %2 = vector.broadcast %0 : vector<16x1xi32> to vector<16x16xi32>
    %3 = arith.cmpi eq, %1, %2 : vector<16x16xi32>
    %4 = arith.extui %3 : vector<16x16xi1> to vector<16x16xi32>
    %5 = arith.sitofp %4 : vector<16x16xi32> to vector<16x16xf32>
    %c0_1 = arith.constant 0 : index
    %c0_2 = arith.constant 0 : index
    %6 = vector.load %arg1[%c0_1, %c0_2] : memref<16x128xf32, #tpu.memory_space<vmem>>, vector<16x128xf32>
    %cst = arith.constant dense<0.000000e+00> : vector<16x128xf32>
    %7 = tpu.matmul %5, %6, %cst {dimension_numbers = #tpu.dot_dimension_numbers<[1], [0], [0], [1], [0, 0, 1, 1], [], []>} : vector<16x16xf32>, vector<16x128xf32>, vector<16x128xf32> -> vector<16x128xf32>
    %c0_3 = arith.constant 0 : index
    %c0_4 = arith.constant 0 : index
    %c0_5 = arith.constant 0 : index
    %8 = vector.load %arg2[%c0_3, %c0_4, %c0_5] : memref<2x128x512xf32, #tpu.memory_space<vmem>>, vector<1x128x512xf32>
    %9 = vector.shape_cast %8 : vector<1x128x512xf32> to vector<128x512xf32>
    %cst_6 = arith.constant dense<0.000000e+00> : vector<16x512xf32>
    %10 = tpu.matmul %7, %9, %cst_6 {dimension_numbers = #tpu.dot_dimension_numbers<[1], [0], [0], [1], [0, 0, 1, 1], [], []>} : vector<16x128xf32>, vector<128x512xf32>, vector<16x512xf32> -> vector<16x512xf32>
    %c0_7 = arith.constant 0 : index
    %c0_8 = arith.constant 0 : index
    %c0_9 = arith.constant 0 : index
    %11 = vector.load %arg4[%c0_7, %c0_8, %c0_9] : memref<2x1x512xf32, #tpu.memory_space<vmem>>, vector<1x1x512xf32>
    %12 = vector.shape_cast %11 : vector<1x1x512xf32> to vector<1x512xf32>
    %13 = vector.broadcast %12 : vector<1x512xf32> to vector<16x512xf32>
    %14 = arith.addf %10, %13 : vector<16x512xf32>
    %c0_10 = arith.constant 0 : index
    %c0_11 = arith.constant 0 : index
    %c0_12 = arith.constant 0 : index
    %15 = vector.load %arg3[%c0_10, %c0_11, %c0_12] : memref<2x128x512xf32, #tpu.memory_space<vmem>>, vector<1x128x512xf32>
    %16 = vector.shape_cast %15 : vector<1x128x512xf32> to vector<128x512xf32>
    %cst_13 = arith.constant 0.000000e+00 : f32
    %17 = vector.broadcast %cst_13 : f32 to vector<2x128xf32>
    %cst_14 = arith.constant 0.000000e+00 : f32
    %18 = vector.broadcast %cst_14 : f32 to vector<2x128xf32>
    %19 = vector.extract_strided_slice %14 {offsets = [0, 0], sizes = [2, 512], strides = [1, 1]} : vector<16x512xf32> to vector<2x512xf32>
    %cst_15 = arith.constant dense<0.000000e+00> : vector<2x512xf32>
    %20 = tpu.matmul %17, %16, %cst_15 {dimension_numbers = #tpu.dot_dimension_numbers<[1], [0], [0], [1], [0, 0, 1, 1], [], []>} : vector<2x128xf32>, vector<128x512xf32>, vector<2x512xf32> -> vector<2x512xf32>
    %21 = arith.addf %19, %20 : vector<2x512xf32>
    %22 = vector.extract_strided_slice %21 {offsets = [0, 0], sizes = [2, 128], strides = [1, 1]} : vector<2x512xf32> to vector<2x128xf32>
    %23 = arith.negf %22 : vector<2x128xf32>
    %24 = math.exp %23 : vector<2x128xf32>
    %cst_16 = arith.constant 1.000000e+00 : f32
    %25 = vector.broadcast %cst_16 : f32 to vector<2x128xf32>
    %26 = arith.addf %25, %24 : vector<2x128xf32>
    %27 = arith.divf %25, %26 : vector<2x128xf32>
    %28 = vector.extract_strided_slice %21 {offsets = [0, 128], sizes = [2, 128], strides = [1, 1]} : vector<2x512xf32> to vector<2x128xf32>
    %29 = arith.negf %28 : vector<2x128xf32>
    %30 = math.exp %29 : vector<2x128xf32>
    %cst_17 = arith.constant 1.000000e+00 : f32
    %31 = vector.broadcast %cst_17 : f32 to vector<2x128xf32>
    %32 = arith.addf %31, %30 : vector<2x128xf32>
    %33 = arith.divf %31, %32 : vector<2x128xf32>
    %34 = vector.extract_strided_slice %21 {offsets = [0, 256], sizes = [2, 128], strides = [1, 1]} : vector<2x512xf32> to vector<2x128xf32>
    %35 = math.tanh %34 : vector<2x128xf32>
    %36 = vector.extract_strided_slice %21 {offsets = [0, 384], sizes = [2, 128], strides = [1, 1]} : vector<2x512xf32> to vector<2x128xf32>
    %37 = arith.negf %36 : vector<2x128xf32>
    %38 = math.exp %37 : vector<2x128xf32>
    %cst_18 = arith.constant 1.000000e+00 : f32
    %39 = vector.broadcast %cst_18 : f32 to vector<2x128xf32>
    %40 = arith.addf %39, %38 : vector<2x128xf32>
    %41 = arith.divf %39, %40 : vector<2x128xf32>
    %42 = arith.mulf %33, %18 : vector<2x128xf32>
    %43 = arith.mulf %27, %35 : vector<2x128xf32>
    %44 = arith.addf %42, %43 : vector<2x128xf32>
    %45 = math.tanh %44 : vector<2x128xf32>
    %46 = arith.mulf %41, %45 : vector<2x128xf32>
    %c0_19 = arith.constant 0 : index
    %c0_20 = arith.constant 0 : index
    %47 = vector.load %arg11[%c0_19, %c0_20] : memref<16x128xf32, #tpu.memory_space<vmem>>, vector<2x128xf32>
    tpu.vector_store %arg11[%c0_19, %c0_20], %46 {strides = array<i32>} : memref<16x128xf32, #tpu.memory_space<vmem>>, vector<2x128xf32>,
    %48 = vector.extract_strided_slice %14 {offsets = [2, 0], sizes = [2, 512], strides = [1, 1]} : vector<16x512xf32> to vector<2x512xf32>
    %cst_21 = arith.constant dense<0.000000e+00> : vector<2x512xf32>
    %49 = tpu.matmul %46, %16, %cst_21 {dimension_numbers = #tpu.dot_dimension_numbers<[1], [0], [0], [1], [0, 0, 1, 1], [], []>} : vector<2x128xf32>, vector<128x512xf32>, vector<2x512xf32> -> vector<2x512xf32>
    %50 = arith.addf %48, %49 : vector<2x512xf32>
    %51 = vector.extract_strided_slice %50 {offsets = [0, 0], sizes = [2, 128], strides = [1, 1]} : vector<2x512xf32> to vector<2x128xf32>
    %52 = arith.negf %51 : vector<2x128xf32>
    %53 = math.exp %52 : vector<2x128xf32>
    %cst_22 = arith.constant 1.000000e+00 : f32
    %54 = vector.broadcast %cst_22 : f32 to vector<2x128xf32>
    %55 = arith.addf %54, %53 : vector<2x128xf32>
    %56 = arith.divf %54, %55 : vector<2x128xf32>
    %57 = vector.extract_strided_slice %50 {offsets = [0, 128], sizes = [2, 128], strides = [1, 1]} : vector<2x512xf32> to vector<2x128xf32>
    %58 = arith.negf %57 : vector<2x128xf32>
    %59 = math.exp %58 : vector<2x128xf32>
    %cst_23 = arith.constant 1.000000e+00 : f32
    %60 = vector.broadcast %cst_23 : f32 to vector<2x128xf32>
    %61 = arith.addf %60, %59 : vector<2x128xf32>
    %62 = arith.divf %60, %61 : vector<2x128xf32>
    %63 = vector.extract_strided_slice %50 {offsets = [0, 256], sizes = [2, 128], strides = [1, 1]} : vector<2x512xf32> to vector<2x128xf32>
    %64 = math.tanh %63 : vector<2x128xf32>
    %65 = vector.extract_strided_slice %50 {offsets = [0, 384], sizes = [2, 128], strides = [1, 1]} : vector<2x512xf32> to vector<2x128xf32>
    %66 = arith.negf %65 : vector<2x128xf32>
    %67 = math.exp %66 : vector<2x128xf32>
    %cst_24 = arith.constant 1.000000e+00 : f32
    %68 = vector.broadcast %cst_24 : f32 to vector<2x128xf32>
    %69 = arith.addf %68, %67 : vector<2x128xf32>
    %70 = arith.divf %68, %69 : vector<2x128xf32>
    %71 = arith.mulf %62, %44 : vector<2x128xf32>
    %72 = arith.mulf %56, %64 : vector<2x128xf32>
    %73 = arith.addf %71, %72 : vector<2x128xf32>
    %74 = math.tanh %73 : vector<2x128xf32>
    %75 = arith.mulf %70, %74 : vector<2x128xf32>
    %c2 = arith.constant 2 : index
    %c0_25 = arith.constant 0 : index
    %76 = vector.load %arg11[%c2, %c0_25] : memref<16x128xf32, #tpu.memory_space<vmem>>, vector<2x128xf32>
    tpu.vector_store %arg11[%c2, %c0_25], %75 {strides = array<i32>} : memref<16x128xf32, #tpu.memory_space<vmem>>, vector<2x128xf32>,
    %77 = vector.extract_strided_slice %14 {offsets = [4, 0], sizes = [2, 512], strides = [1, 1]} : vector<16x512xf32> to vector<2x512xf32>
    %cst_26 = arith.constant dense<0.000000e+00> : vector<2x512xf32>
    %78 = tpu.matmul %75, %16, %cst_26 {dimension_numbers = #tpu.dot_dimension_numbers<[1], [0], [0], [1], [0, 0, 1, 1], [], []>} : vector<2x128xf32>, vector<128x512xf32>, vector<2x512xf32> -> vector<2x512xf32>
    %79 = arith.addf %77, %78 : vector<2x512xf32>
    %80 = vector.extract_strided_slice %79 {offsets = [0, 0], sizes = [2, 128], strides = [1, 1]} : vector<2x512xf32> to vector<2x128xf32>
    %81 = arith.negf %80 : vector<2x128xf32>
    %82 = math.exp %81 : vector<2x128xf32>
    %cst_27 = arith.constant 1.000000e+00 : f32
    %83 = vector.broadcast %cst_27 : f32 to vector<2x128xf32>
    %84 = arith.addf %83, %82 : vector<2x128xf32>
    %85 = arith.divf %83, %84 : vector<2x128xf32>
    %86 = vector.extract_strided_slice %79 {offsets = [0, 128], sizes = [2, 128], strides = [1, 1]} : vector<2x512xf32> to vector<2x128xf32>
    %87 = arith.negf %86 : vector<2x128xf32>
    %88 = math.exp %87 : vector<2x128xf32>
    %cst_28 = arith.constant 1.000000e+00 : f32
    %89 = vector.broadcast %cst_28 : f32 to vector<2x128xf32>
    %90 = arith.addf %89, %88 : vector<2x128xf32>
    %91 = arith.divf %89, %90 : vector<2x128xf32>
    %92 = vector.extract_strided_slice %79 {offsets = [0, 256], sizes = [2, 128], strides = [1, 1]} : vector<2x512xf32> to vector<2x128xf32>
    %93 = math.tanh %92 : vector<2x128xf32>
    %94 = vector.extract_strided_slice %79 {offsets = [0, 384], sizes = [2, 128], strides = [1, 1]} : vector<2x512xf32> to vector<2x128xf32>
    %95 = arith.negf %94 : vector<2x128xf32>
    %96 = math.exp %95 : vector<2x128xf32>
    %cst_29 = arith.constant 1.000000e+00 : f32
    %97 = vector.broadcast %cst_29 : f32 to vector<2x128xf32>
    %98 = arith.addf %97, %96 : vector<2x128xf32>
    %99 = arith.divf %97, %98 : vector<2x128xf32>
    %100 = arith.mulf %91, %73 : vector<2x128xf32>
    %101 = arith.mulf %85, %93 : vector<2x128xf32>
    %102 = arith.addf %100, %101 : vector<2x128xf32>
    %103 = math.tanh %102 : vector<2x128xf32>
    %104 = arith.mulf %99, %103 : vector<2x128xf32>
    %c4 = arith.constant 4 : index
    %c0_30 = arith.constant 0 : index
    %105 = vector.load %arg11[%c4, %c0_30] : memref<16x128xf32, #tpu.memory_space<vmem>>, vector<2x128xf32>
    tpu.vector_store %arg11[%c4, %c0_30], %104 {strides = array<i32>} : memref<16x128xf32, #tpu.memory_space<vmem>>, vector<2x128xf32>,
    %106 = vector.extract_strided_slice %14 {offsets = [6, 0], sizes = [2, 512], strides = [1, 1]} : vector<16x512xf32> to vector<2x512xf32>
    %cst_31 = arith.constant dense<0.000000e+00> : vector<2x512xf32>
    %107 = tpu.matmul %104, %16, %cst_31 {dimension_numbers = #tpu.dot_dimension_numbers<[1], [0], [0], [1], [0, 0, 1, 1], [], []>} : vector<2x128xf32>, vector<128x512xf32>, vector<2x512xf32> -> vector<2x512xf32>
    %108 = arith.addf %106, %107 : vector<2x512xf32>
    %109 = vector.extract_strided_slice %108 {offsets = [0, 0], sizes = [2, 128], strides = [1, 1]} : vector<2x512xf32> to vector<2x128xf32>
    %110 = arith.negf %109 : vector<2x128xf32>
    %111 = math.exp %110 : vector<2x128xf32>
    %cst_32 = arith.constant 1.000000e+00 : f32
    %112 = vector.broadcast %cst_32 : f32 to vector<2x128xf32>
    %113 = arith.addf %112, %111 : vector<2x128xf32>
    %114 = arith.divf %112, %113 : vector<2x128xf32>
    %115 = vector.extract_strided_slice %108 {offsets = [0, 128], sizes = [2, 128], strides = [1, 1]} : vector<2x512xf32> to vector<2x128xf32>
    %116 = arith.negf %115 : vector<2x128xf32>
    %117 = math.exp %116 : vector<2x128xf32>
    %cst_33 = arith.constant 1.000000e+00 : f32
    %118 = vector.broadcast %cst_33 : f32 to vector<2x128xf32>
    %119 = arith.addf %118, %117 : vector<2x128xf32>
    %120 = arith.divf %118, %119 : vector<2x128xf32>
    %121 = vector.extract_strided_slice %108 {offsets = [0, 256], sizes = [2, 128], strides = [1, 1]} : vector<2x512xf32> to vector<2x128xf32>
    %122 = math.tanh %121 : vector<2x128xf32>
    %123 = vector.extract_strided_slice %108 {offsets = [0, 384], sizes = [2, 128], strides = [1, 1]} : vector<2x512xf32> to vector<2x128xf32>
    %124 = arith.negf %123 : vector<2x128xf32>
    %125 = math.exp %124 : vector<2x128xf32>
    %cst_34 = arith.constant 1.000000e+00 : f32
    %126 = vector.broadcast %cst_34 : f32 to vector<2x128xf32>
    %127 = arith.addf %126, %125 : vector<2x128xf32>
    %128 = arith.divf %126, %127 : vector<2x128xf32>
    %129 = arith.mulf %120, %102 : vector<2x128xf32>
    %130 = arith.mulf %114, %122 : vector<2x128xf32>
    %131 = arith.addf %129, %130 : vector<2x128xf32>
    %132 = math.tanh %131 : vector<2x128xf32>
    %133 = arith.mulf %128, %132 : vector<2x128xf32>
    %c6 = arith.constant 6 : index
    %c0_35 = arith.constant 0 : index
    %134 = vector.load %arg11[%c6, %c0_35] : memref<16x128xf32, #tpu.memory_space<vmem>>, vector<2x128xf32>
    tpu.vector_store %arg11[%c6, %c0_35], %133 {strides = array<i32>} : memref<16x128xf32, #tpu.memory_space<vmem>>, vector<2x128xf32>,
    %135 = vector.extract_strided_slice %14 {offsets = [8, 0], sizes = [2, 512], strides = [1, 1]} : vector<16x512xf32> to vector<2x512xf32>
    %cst_36 = arith.constant dense<0.000000e+00> : vector<2x512xf32>
    %136 = tpu.matmul %133, %16, %cst_36 {dimension_numbers = #tpu.dot_dimension_numbers<[1], [0], [0], [1], [0, 0, 1, 1], [], []>} : vector<2x128xf32>, vector<128x512xf32>, vector<2x512xf32> -> vector<2x512xf32>
    %137 = arith.addf %135, %136 : vector<2x512xf32>
    %138 = vector.extract_strided_slice %137 {offsets = [0, 0], sizes = [2, 128], strides = [1, 1]} : vector<2x512xf32> to vector<2x128xf32>
    %139 = arith.negf %138 : vector<2x128xf32>
    %140 = math.exp %139 : vector<2x128xf32>
    %cst_37 = arith.constant 1.000000e+00 : f32
    %141 = vector.broadcast %cst_37 : f32 to vector<2x128xf32>
    %142 = arith.addf %141, %140 : vector<2x128xf32>
    %143 = arith.divf %141, %142 : vector<2x128xf32>
    %144 = vector.extract_strided_slice %137 {offsets = [0, 128], sizes = [2, 128], strides = [1, 1]} : vector<2x512xf32> to vector<2x128xf32>
    %145 = arith.negf %144 : vector<2x128xf32>
    %146 = math.exp %145 : vector<2x128xf32>
    %cst_38 = arith.constant 1.000000e+00 : f32
    %147 = vector.broadcast %cst_38 : f32 to vector<2x128xf32>
    %148 = arith.addf %147, %146 : vector<2x128xf32>
    %149 = arith.divf %147, %148 : vector<2x128xf32>
    %150 = vector.extract_strided_slice %137 {offsets = [0, 256], sizes = [2, 128], strides = [1, 1]} : vector<2x512xf32> to vector<2x128xf32>
    %151 = math.tanh %150 : vector<2x128xf32>
    %152 = vector.extract_strided_slice %137 {offsets = [0, 384], sizes = [2, 128], strides = [1, 1]} : vector<2x512xf32> to vector<2x128xf32>
    %153 = arith.negf %152 : vector<2x128xf32>
    %154 = math.exp %153 : vector<2x128xf32>
    %cst_39 = arith.constant 1.000000e+00 : f32
    %155 = vector.broadcast %cst_39 : f32 to vector<2x128xf32>
    %156 = arith.addf %155, %154 : vector<2x128xf32>
    %157 = arith.divf %155, %156 : vector<2x128xf32>
    %158 = arith.mulf %149, %131 : vector<2x128xf32>
    %159 = arith.mulf %143, %151 : vector<2x128xf32>
    %160 = arith.addf %158, %159 : vector<2x128xf32>
    %161 = math.tanh %160 : vector<2x128xf32>
    %162 = arith.mulf %157, %161 : vector<2x128xf32>
    %c8 = arith.constant 8 : index
    %c0_40 = arith.constant 0 : index
    %163 = vector.load %arg11[%c8, %c0_40] : memref<16x128xf32, #tpu.memory_space<vmem>>, vector<2x128xf32>
    tpu.vector_store %arg11[%c8, %c0_40], %162 {strides = array<i32>} : memref<16x128xf32, #tpu.memory_space<vmem>>, vector<2x128xf32>,
    %164 = vector.extract_strided_slice %14 {offsets = [10, 0], sizes = [2, 512], strides = [1, 1]} : vector<16x512xf32> to vector<2x512xf32>
    %cst_41 = arith.constant dense<0.000000e+00> : vector<2x512xf32>
    %165 = tpu.matmul %162, %16, %cst_41 {dimension_numbers = #tpu.dot_dimension_numbers<[1], [0], [0], [1], [0, 0, 1, 1], [], []>} : vector<2x128xf32>, vector<128x512xf32>, vector<2x512xf32> -> vector<2x512xf32>
    %166 = arith.addf %164, %165 : vector<2x512xf32>
    %167 = vector.extract_strided_slice %166 {offsets = [0, 0], sizes = [2, 128], strides = [1, 1]} : vector<2x512xf32> to vector<2x128xf32>
    %168 = arith.negf %167 : vector<2x128xf32>
    %169 = math.exp %168 : vector<2x128xf32>
    %cst_42 = arith.constant 1.000000e+00 : f32
    %170 = vector.broadcast %cst_42 : f32 to vector<2x128xf32>
    %171 = arith.addf %170, %169 : vector<2x128xf32>
    %172 = arith.divf %170, %171 : vector<2x128xf32>
    %173 = vector.extract_strided_slice %166 {offsets = [0, 128], sizes = [2, 128], strides = [1, 1]} : vector<2x512xf32> to vector<2x128xf32>
    %174 = arith.negf %173 : vector<2x128xf32>
    %175 = math.exp %174 : vector<2x128xf32>
    %cst_43 = arith.constant 1.000000e+00 : f32
    %176 = vector.broadcast %cst_43 : f32 to vector<2x128xf32>
    %177 = arith.addf %176, %175 : vector<2x128xf32>
    %178 = arith.divf %176, %177 : vector<2x128xf32>
    %179 = vector.extract_strided_slice %166 {offsets = [0, 256], sizes = [2, 128], strides = [1, 1]} : vector<2x512xf32> to vector<2x128xf32>
    %180 = math.tanh %179 : vector<2x128xf32>
    %181 = vector.extract_strided_slice %166 {offsets = [0, 384], sizes = [2, 128], strides = [1, 1]} : vector<2x512xf32> to vector<2x128xf32>
    %182 = arith.negf %181 : vector<2x128xf32>
    %183 = math.exp %182 : vector<2x128xf32>
    %cst_44 = arith.constant 1.000000e+00 : f32
    %184 = vector.broadcast %cst_44 : f32 to vector<2x128xf32>
    %185 = arith.addf %184, %183 : vector<2x128xf32>
    %186 = arith.divf %184, %185 : vector<2x128xf32>
    %187 = arith.mulf %178, %160 : vector<2x128xf32>
    %188 = arith.mulf %172, %180 : vector<2x128xf32>
    %189 = arith.addf %187, %188 : vector<2x128xf32>
    %190 = math.tanh %189 : vector<2x128xf32>
    %191 = arith.mulf %186, %190 : vector<2x128xf32>
    %c10 = arith.constant 10 : index
    %c0_45 = arith.constant 0 : index
    %192 = vector.load %arg11[%c10, %c0_45] : memref<16x128xf32, #tpu.memory_space<vmem>>, vector<2x128xf32>
    tpu.vector_store %arg11[%c10, %c0_45], %191 {strides = array<i32>} : memref<16x128xf32, #tpu.memory_space<vmem>>, vector<2x128xf32>,
    %193 = vector.extract_strided_slice %14 {offsets = [12, 0], sizes = [2, 512], strides = [1, 1]} : vector<16x512xf32> to vector<2x512xf32>
    %cst_46 = arith.constant dense<0.000000e+00> : vector<2x512xf32>
    %194 = tpu.matmul %191, %16, %cst_46 {dimension_numbers = #tpu.dot_dimension_numbers<[1], [0], [0], [1], [0, 0, 1, 1], [], []>} : vector<2x128xf32>, vector<128x512xf32>, vector<2x512xf32> -> vector<2x512xf32>
    %195 = arith.addf %193, %194 : vector<2x512xf32>
    %196 = vector.extract_strided_slice %195 {offsets = [0, 0], sizes = [2, 128], strides = [1, 1]} : vector<2x512xf32> to vector<2x128xf32>
    %197 = arith.negf %196 : vector<2x128xf32>
    %198 = math.exp %197 : vector<2x128xf32>
    %cst_47 = arith.constant 1.000000e+00 : f32
    %199 = vector.broadcast %cst_47 : f32 to vector<2x128xf32>
    %200 = arith.addf %199, %198 : vector<2x128xf32>
    %201 = arith.divf %199, %200 : vector<2x128xf32>
    %202 = vector.extract_strided_slice %195 {offsets = [0, 128], sizes = [2, 128], strides = [1, 1]} : vector<2x512xf32> to vector<2x128xf32>
    %203 = arith.negf %202 : vector<2x128xf32>
    %204 = math.exp %203 : vector<2x128xf32>
    %cst_48 = arith.constant 1.000000e+00 : f32
    %205 = vector.broadcast %cst_48 : f32 to vector<2x128xf32>
    %206 = arith.addf %205, %204 : vector<2x128xf32>
    %207 = arith.divf %205, %206 : vector<2x128xf32>
    %208 = vector.extract_strided_slice %195 {offsets = [0, 256], sizes = [2, 128], strides = [1, 1]} : vector<2x512xf32> to vector<2x128xf32>
    %209 = math.tanh %208 : vector<2x128xf32>
    %210 = vector.extract_strided_slice %195 {offsets = [0, 384], sizes = [2, 128], strides = [1, 1]} : vector<2x512xf32> to vector<2x128xf32>
    %211 = arith.negf %210 : vector<2x128xf32>
    %212 = math.exp %211 : vector<2x128xf32>
    %cst_49 = arith.constant 1.000000e+00 : f32
    %213 = vector.broadcast %cst_49 : f32 to vector<2x128xf32>
    %214 = arith.addf %213, %212 : vector<2x128xf32>
    %215 = arith.divf %213, %214 : vector<2x128xf32>
    %216 = arith.mulf %207, %189 : vector<2x128xf32>
    %217 = arith.mulf %201, %209 : vector<2x128xf32>
    %218 = arith.addf %216, %217 : vector<2x128xf32>
    %219 = math.tanh %218 : vector<2x128xf32>
    %220 = arith.mulf %215, %219 : vector<2x128xf32>
    %c12 = arith.constant 12 : index
    %c0_50 = arith.constant 0 : index
    %221 = vector.load %arg11[%c12, %c0_50] : memref<16x128xf32, #tpu.memory_space<vmem>>, vector<2x128xf32>
    tpu.vector_store %arg11[%c12, %c0_50], %220 {strides = array<i32>} : memref<16x128xf32, #tpu.memory_space<vmem>>, vector<2x128xf32>,
    %222 = vector.extract_strided_slice %14 {offsets = [14, 0], sizes = [2, 512], strides = [1, 1]} : vector<16x512xf32> to vector<2x512xf32>
    %cst_51 = arith.constant dense<0.000000e+00> : vector<2x512xf32>
    %223 = tpu.matmul %220, %16, %cst_51 {dimension_numbers = #tpu.dot_dimension_numbers<[1], [0], [0], [1], [0, 0, 1, 1], [], []>} : vector<2x128xf32>, vector<128x512xf32>, vector<2x512xf32> -> vector<2x512xf32>
    %224 = arith.addf %222, %223 : vector<2x512xf32>
    %225 = vector.extract_strided_slice %224 {offsets = [0, 0], sizes = [2, 128], strides = [1, 1]} : vector<2x512xf32> to vector<2x128xf32>
    %226 = arith.negf %225 : vector<2x128xf32>
    %227 = math.exp %226 : vector<2x128xf32>
    %cst_52 = arith.constant 1.000000e+00 : f32
    %228 = vector.broadcast %cst_52 : f32 to vector<2x128xf32>
    %229 = arith.addf %228, %227 : vector<2x128xf32>
    %230 = arith.divf %228, %229 : vector<2x128xf32>
    %231 = vector.extract_strided_slice %224 {offsets = [0, 128], sizes = [2, 128], strides = [1, 1]} : vector<2x512xf32> to vector<2x128xf32>
    %232 = arith.negf %231 : vector<2x128xf32>
    %233 = math.exp %232 : vector<2x128xf32>
    %cst_53 = arith.constant 1.000000e+00 : f32
    %234 = vector.broadcast %cst_53 : f32 to vector<2x128xf32>
    %235 = arith.addf %234, %233 : vector<2x128xf32>
    %236 = arith.divf %234, %235 : vector<2x128xf32>
    %237 = vector.extract_strided_slice %224 {offsets = [0, 256], sizes = [2, 128], strides = [1, 1]} : vector<2x512xf32> to vector<2x128xf32>
    %238 = math.tanh %237 : vector<2x128xf32>
    %239 = vector.extract_strided_slice %224 {offsets = [0, 384], sizes = [2, 128], strides = [1, 1]} : vector<2x512xf32> to vector<2x128xf32>
    %240 = arith.negf %239 : vector<2x128xf32>
    %241 = math.exp %240 : vector<2x128xf32>
    %cst_54 = arith.constant 1.000000e+00 : f32
    %242 = vector.broadcast %cst_54 : f32 to vector<2x128xf32>
    %243 = arith.addf %242, %241 : vector<2x128xf32>
    %244 = arith.divf %242, %243 : vector<2x128xf32>
    %245 = arith.mulf %236, %218 : vector<2x128xf32>
    %246 = arith.mulf %230, %238 : vector<2x128xf32>
    %247 = arith.addf %245, %246 : vector<2x128xf32>
    %248 = math.tanh %247 : vector<2x128xf32>
    %249 = arith.mulf %244, %248 : vector<2x128xf32>
    %c14 = arith.constant 14 : index
    %c0_55 = arith.constant 0 : index
    %250 = vector.load %arg11[%c14, %c0_55] : memref<16x128xf32, #tpu.memory_space<vmem>>, vector<2x128xf32>
    tpu.vector_store %arg11[%c14, %c0_55], %249 {strides = array<i32>} : memref<16x128xf32, #tpu.memory_space<vmem>>, vector<2x128xf32>,
    %c0_56 = arith.constant 0 : index
    %c0_57 = arith.constant 0 : index
    %251 = vector.load %arg11[%c0_56, %c0_57] : memref<16x128xf32, #tpu.memory_space<vmem>>, vector<16x128xf32>
    %c1 = arith.constant 1 : index
    %c0_58 = arith.constant 0 : index
    %c0_59 = arith.constant 0 : index
    %252 = vector.load %arg2[%c1, %c0_58, %c0_59] : memref<2x128x512xf32, #tpu.memory_space<vmem>>, vector<1x128x512xf32>
    %253 = vector.shape_cast %252 : vector<1x128x512xf32> to vector<128x512xf32>
    %cst_60 = arith.constant dense<0.000000e+00> : vector<16x512xf32>
    %254 = tpu.matmul %251, %253, %cst_60 {dimension_numbers = #tpu.dot_dimension_numbers<[1], [0], [0], [1], [0, 0, 1, 1], [], []>} : vector<16x128xf32>, vector<128x512xf32>, vector<16x512xf32> -> vector<16x512xf32>
    %c1_61 = arith.constant 1 : index
    %c0_62 = arith.constant 0 : index
    %c0_63 = arith.constant 0 : index
    %255 = vector.load %arg4[%c1_61, %c0_62, %c0_63] : memref<2x1x512xf32, #tpu.memory_space<vmem>>, vector<1x1x512xf32>
    %256 = vector.shape_cast %255 : vector<1x1x512xf32> to vector<1x512xf32>
    %257 = vector.broadcast %256 : vector<1x512xf32> to vector<16x512xf32>
    %258 = arith.addf %254, %257 : vector<16x512xf32>
    %c1_64 = arith.constant 1 : index
    %c0_65 = arith.constant 0 : index
    %c0_66 = arith.constant 0 : index
    %259 = vector.load %arg3[%c1_64, %c0_65, %c0_66] : memref<2x128x512xf32, #tpu.memory_space<vmem>>, vector<1x128x512xf32>
    %260 = vector.shape_cast %259 : vector<1x128x512xf32> to vector<128x512xf32>
    %cst_67 = arith.constant 0.000000e+00 : f32
    %261 = vector.broadcast %cst_67 : f32 to vector<2x128xf32>
    %cst_68 = arith.constant 0.000000e+00 : f32
    %262 = vector.broadcast %cst_68 : f32 to vector<2x128xf32>
    %263 = vector.extract_strided_slice %258 {offsets = [0, 0], sizes = [2, 512], strides = [1, 1]} : vector<16x512xf32> to vector<2x512xf32>
    %cst_69 = arith.constant dense<0.000000e+00> : vector<2x512xf32>
    %264 = tpu.matmul %261, %260, %cst_69 {dimension_numbers = #tpu.dot_dimension_numbers<[1], [0], [0], [1], [0, 0, 1, 1], [], []>} : vector<2x128xf32>, vector<128x512xf32>, vector<2x512xf32> -> vector<2x512xf32>
    %265 = arith.addf %263, %264 : vector<2x512xf32>
    %266 = vector.extract_strided_slice %265 {offsets = [0, 0], sizes = [2, 128], strides = [1, 1]} : vector<2x512xf32> to vector<2x128xf32>
    %267 = arith.negf %266 : vector<2x128xf32>
    %268 = math.exp %267 : vector<2x128xf32>
    %cst_70 = arith.constant 1.000000e+00 : f32
    %269 = vector.broadcast %cst_70 : f32 to vector<2x128xf32>
    %270 = arith.addf %269, %268 : vector<2x128xf32>
    %271 = arith.divf %269, %270 : vector<2x128xf32>
    %272 = vector.extract_strided_slice %265 {offsets = [0, 128], sizes = [2, 128], strides = [1, 1]} : vector<2x512xf32> to vector<2x128xf32>
    %273 = arith.negf %272 : vector<2x128xf32>
    %274 = math.exp %273 : vector<2x128xf32>
    %cst_71 = arith.constant 1.000000e+00 : f32
    %275 = vector.broadcast %cst_71 : f32 to vector<2x128xf32>
    %276 = arith.addf %275, %274 : vector<2x128xf32>
    %277 = arith.divf %275, %276 : vector<2x128xf32>
    %278 = vector.extract_strided_slice %265 {offsets = [0, 256], sizes = [2, 128], strides = [1, 1]} : vector<2x512xf32> to vector<2x128xf32>
    %279 = math.tanh %278 : vector<2x128xf32>
    %280 = vector.extract_strided_slice %265 {offsets = [0, 384], sizes = [2, 128], strides = [1, 1]} : vector<2x512xf32> to vector<2x128xf32>
    %281 = arith.negf %280 : vector<2x128xf32>
    %282 = math.exp %281 : vector<2x128xf32>
    %cst_72 = arith.constant 1.000000e+00 : f32
    %283 = vector.broadcast %cst_72 : f32 to vector<2x128xf32>
    %284 = arith.addf %283, %282 : vector<2x128xf32>
    %285 = arith.divf %283, %284 : vector<2x128xf32>
    %286 = arith.mulf %277, %262 : vector<2x128xf32>
    %287 = arith.mulf %271, %279 : vector<2x128xf32>
    %288 = arith.addf %286, %287 : vector<2x128xf32>
    %289 = math.tanh %288 : vector<2x128xf32>
    %290 = arith.mulf %285, %289 : vector<2x128xf32>
    %c0_73 = arith.constant 0 : index
    %c0_74 = arith.constant 0 : index
    %291 = vector.load %arg11[%c0_73, %c0_74] : memref<16x128xf32, #tpu.memory_space<vmem>>, vector<2x128xf32>
    tpu.vector_store %arg11[%c0_73, %c0_74], %290 {strides = array<i32>} : memref<16x128xf32, #tpu.memory_space<vmem>>, vector<2x128xf32>,
    %292 = vector.extract_strided_slice %258 {offsets = [2, 0], sizes = [2, 512], strides = [1, 1]} : vector<16x512xf32> to vector<2x512xf32>
    %cst_75 = arith.constant dense<0.000000e+00> : vector<2x512xf32>
    %293 = tpu.matmul %290, %260, %cst_75 {dimension_numbers = #tpu.dot_dimension_numbers<[1], [0], [0], [1], [0, 0, 1, 1], [], []>} : vector<2x128xf32>, vector<128x512xf32>, vector<2x512xf32> -> vector<2x512xf32>
    %294 = arith.addf %292, %293 : vector<2x512xf32>
    %295 = vector.extract_strided_slice %294 {offsets = [0, 0], sizes = [2, 128], strides = [1, 1]} : vector<2x512xf32> to vector<2x128xf32>
    %296 = arith.negf %295 : vector<2x128xf32>
    %297 = math.exp %296 : vector<2x128xf32>
    %cst_76 = arith.constant 1.000000e+00 : f32
    %298 = vector.broadcast %cst_76 : f32 to vector<2x128xf32>
    %299 = arith.addf %298, %297 : vector<2x128xf32>
    %300 = arith.divf %298, %299 : vector<2x128xf32>
    %301 = vector.extract_strided_slice %294 {offsets = [0, 128], sizes = [2, 128], strides = [1, 1]} : vector<2x512xf32> to vector<2x128xf32>
    %302 = arith.negf %301 : vector<2x128xf32>
    %303 = math.exp %302 : vector<2x128xf32>
    %cst_77 = arith.constant 1.000000e+00 : f32
    %304 = vector.broadcast %cst_77 : f32 to vector<2x128xf32>
    %305 = arith.addf %304, %303 : vector<2x128xf32>
    %306 = arith.divf %304, %305 : vector<2x128xf32>
    %307 = vector.extract_strided_slice %294 {offsets = [0, 256], sizes = [2, 128], strides = [1, 1]} : vector<2x512xf32> to vector<2x128xf32>
    %308 = math.tanh %307 : vector<2x128xf32>
    %309 = vector.extract_strided_slice %294 {offsets = [0, 384], sizes = [2, 128], strides = [1, 1]} : vector<2x512xf32> to vector<2x128xf32>
    %310 = arith.negf %309 : vector<2x128xf32>
    %311 = math.exp %310 : vector<2x128xf32>
    %cst_78 = arith.constant 1.000000e+00 : f32
    %312 = vector.broadcast %cst_78 : f32 to vector<2x128xf32>
    %313 = arith.addf %312, %311 : vector<2x128xf32>
    %314 = arith.divf %312, %313 : vector<2x128xf32>
    %315 = arith.mulf %306, %288 : vector<2x128xf32>
    %316 = arith.mulf %300, %308 : vector<2x128xf32>
    %317 = arith.addf %315, %316 : vector<2x128xf32>
    %318 = math.tanh %317 : vector<2x128xf32>
    %319 = arith.mulf %314, %318 : vector<2x128xf32>
    %c2_79 = arith.constant 2 : index
    %c0_80 = arith.constant 0 : index
    %320 = vector.load %arg11[%c2_79, %c0_80] : memref<16x128xf32, #tpu.memory_space<vmem>>, vector<2x128xf32>
    tpu.vector_store %arg11[%c2_79, %c0_80], %319 {strides = array<i32>} : memref<16x128xf32, #tpu.memory_space<vmem>>, vector<2x128xf32>,
    %321 = vector.extract_strided_slice %258 {offsets = [4, 0], sizes = [2, 512], strides = [1, 1]} : vector<16x512xf32> to vector<2x512xf32>
    %cst_81 = arith.constant dense<0.000000e+00> : vector<2x512xf32>
    %322 = tpu.matmul %319, %260, %cst_81 {dimension_numbers = #tpu.dot_dimension_numbers<[1], [0], [0], [1], [0, 0, 1, 1], [], []>} : vector<2x128xf32>, vector<128x512xf32>, vector<2x512xf32> -> vector<2x512xf32>
    %323 = arith.addf %321, %322 : vector<2x512xf32>
    %324 = vector.extract_strided_slice %323 {offsets = [0, 0], sizes = [2, 128], strides = [1, 1]} : vector<2x512xf32> to vector<2x128xf32>
    %325 = arith.negf %324 : vector<2x128xf32>
    %326 = math.exp %325 : vector<2x128xf32>
    %cst_82 = arith.constant 1.000000e+00 : f32
    %327 = vector.broadcast %cst_82 : f32 to vector<2x128xf32>
    %328 = arith.addf %327, %326 : vector<2x128xf32>
    %329 = arith.divf %327, %328 : vector<2x128xf32>
    %330 = vector.extract_strided_slice %323 {offsets = [0, 128], sizes = [2, 128], strides = [1, 1]} : vector<2x512xf32> to vector<2x128xf32>
    %331 = arith.negf %330 : vector<2x128xf32>
    %332 = math.exp %331 : vector<2x128xf32>
    %cst_83 = arith.constant 1.000000e+00 : f32
    %333 = vector.broadcast %cst_83 : f32 to vector<2x128xf32>
    %334 = arith.addf %333, %332 : vector<2x128xf32>
    %335 = arith.divf %333, %334 : vector<2x128xf32>
    %336 = vector.extract_strided_slice %323 {offsets = [0, 256], sizes = [2, 128], strides = [1, 1]} : vector<2x512xf32> to vector<2x128xf32>
    %337 = math.tanh %336 : vector<2x128xf32>
    %338 = vector.extract_strided_slice %323 {offsets = [0, 384], sizes = [2, 128], strides = [1, 1]} : vector<2x512xf32> to vector<2x128xf32>
    %339 = arith.negf %338 : vector<2x128xf32>
    %340 = math.exp %339 : vector<2x128xf32>
    %cst_84 = arith.constant 1.000000e+00 : f32
    %341 = vector.broadcast %cst_84 : f32 to vector<2x128xf32>
    %342 = arith.addf %341, %340 : vector<2x128xf32>
    %343 = arith.divf %341, %342 : vector<2x128xf32>
    %344 = arith.mulf %335, %317 : vector<2x128xf32>
    %345 = arith.mulf %329, %337 : vector<2x128xf32>
    %346 = arith.addf %344, %345 : vector<2x128xf32>
    %347 = math.tanh %346 : vector<2x128xf32>
    %348 = arith.mulf %343, %347 : vector<2x128xf32>
    %c4_85 = arith.constant 4 : index
    %c0_86 = arith.constant 0 : index
    %349 = vector.load %arg11[%c4_85, %c0_86] : memref<16x128xf32, #tpu.memory_space<vmem>>, vector<2x128xf32>
    tpu.vector_store %arg11[%c4_85, %c0_86], %348 {strides = array<i32>} : memref<16x128xf32, #tpu.memory_space<vmem>>, vector<2x128xf32>,
    %350 = vector.extract_strided_slice %258 {offsets = [6, 0], sizes = [2, 512], strides = [1, 1]} : vector<16x512xf32> to vector<2x512xf32>
    %cst_87 = arith.constant dense<0.000000e+00> : vector<2x512xf32>
    %351 = tpu.matmul %348, %260, %cst_87 {dimension_numbers = #tpu.dot_dimension_numbers<[1], [0], [0], [1], [0, 0, 1, 1], [], []>} : vector<2x128xf32>, vector<128x512xf32>, vector<2x512xf32> -> vector<2x512xf32>
    %352 = arith.addf %350, %351 : vector<2x512xf32>
    %353 = vector.extract_strided_slice %352 {offsets = [0, 0], sizes = [2, 128], strides = [1, 1]} : vector<2x512xf32> to vector<2x128xf32>
    %354 = arith.negf %353 : vector<2x128xf32>
    %355 = math.exp %354 : vector<2x128xf32>
    %cst_88 = arith.constant 1.000000e+00 : f32
    %356 = vector.broadcast %cst_88 : f32 to vector<2x128xf32>
    %357 = arith.addf %356, %355 : vector<2x128xf32>
    %358 = arith.divf %356, %357 : vector<2x128xf32>
    %359 = vector.extract_strided_slice %352 {offsets = [0, 128], sizes = [2, 128], strides = [1, 1]} : vector<2x512xf32> to vector<2x128xf32>
    %360 = arith.negf %359 : vector<2x128xf32>
    %361 = math.exp %360 : vector<2x128xf32>
    %cst_89 = arith.constant 1.000000e+00 : f32
    %362 = vector.broadcast %cst_89 : f32 to vector<2x128xf32>
    %363 = arith.addf %362, %361 : vector<2x128xf32>
    %364 = arith.divf %362, %363 : vector<2x128xf32>
    %365 = vector.extract_strided_slice %352 {offsets = [0, 256], sizes = [2, 128], strides = [1, 1]} : vector<2x512xf32> to vector<2x128xf32>
    %366 = math.tanh %365 : vector<2x128xf32>
    %367 = vector.extract_strided_slice %352 {offsets = [0, 384], sizes = [2, 128], strides = [1, 1]} : vector<2x512xf32> to vector<2x128xf32>
    %368 = arith.negf %367 : vector<2x128xf32>
    %369 = math.exp %368 : vector<2x128xf32>
    %cst_90 = arith.constant 1.000000e+00 : f32
    %370 = vector.broadcast %cst_90 : f32 to vector<2x128xf32>
    %371 = arith.addf %370, %369 : vector<2x128xf32>
    %372 = arith.divf %370, %371 : vector<2x128xf32>
    %373 = arith.mulf %364, %346 : vector<2x128xf32>
    %374 = arith.mulf %358, %366 : vector<2x128xf32>
    %375 = arith.addf %373, %374 : vector<2x128xf32>
    %376 = math.tanh %375 : vector<2x128xf32>
    %377 = arith.mulf %372, %376 : vector<2x128xf32>
    %c6_91 = arith.constant 6 : index
    %c0_92 = arith.constant 0 : index
    %378 = vector.load %arg11[%c6_91, %c0_92] : memref<16x128xf32, #tpu.memory_space<vmem>>, vector<2x128xf32>
    tpu.vector_store %arg11[%c6_91, %c0_92], %377 {strides = array<i32>} : memref<16x128xf32, #tpu.memory_space<vmem>>, vector<2x128xf32>,
    %379 = vector.extract_strided_slice %258 {offsets = [8, 0], sizes = [2, 512], strides = [1, 1]} : vector<16x512xf32> to vector<2x512xf32>
    %cst_93 = arith.constant dense<0.000000e+00> : vector<2x512xf32>
    %380 = tpu.matmul %377, %260, %cst_93 {dimension_numbers = #tpu.dot_dimension_numbers<[1], [0], [0], [1], [0, 0, 1, 1], [], []>} : vector<2x128xf32>, vector<128x512xf32>, vector<2x512xf32> -> vector<2x512xf32>
    %381 = arith.addf %379, %380 : vector<2x512xf32>
    %382 = vector.extract_strided_slice %381 {offsets = [0, 0], sizes = [2, 128], strides = [1, 1]} : vector<2x512xf32> to vector<2x128xf32>
    %383 = arith.negf %382 : vector<2x128xf32>
    %384 = math.exp %383 : vector<2x128xf32>
    %cst_94 = arith.constant 1.000000e+00 : f32
    %385 = vector.broadcast %cst_94 : f32 to vector<2x128xf32>
    %386 = arith.addf %385, %384 : vector<2x128xf32>
    %387 = arith.divf %385, %386 : vector<2x128xf32>
    %388 = vector.extract_strided_slice %381 {offsets = [0, 128], sizes = [2, 128], strides = [1, 1]} : vector<2x512xf32> to vector<2x128xf32>
    %389 = arith.negf %388 : vector<2x128xf32>
    %390 = math.exp %389 : vector<2x128xf32>
    %cst_95 = arith.constant 1.000000e+00 : f32
    %391 = vector.broadcast %cst_95 : f32 to vector<2x128xf32>
    %392 = arith.addf %391, %390 : vector<2x128xf32>
    %393 = arith.divf %391, %392 : vector<2x128xf32>
    %394 = vector.extract_strided_slice %381 {offsets = [0, 256], sizes = [2, 128], strides = [1, 1]} : vector<2x512xf32> to vector<2x128xf32>
    %395 = math.tanh %394 : vector<2x128xf32>
    %396 = vector.extract_strided_slice %381 {offsets = [0, 384], sizes = [2, 128], strides = [1, 1]} : vector<2x512xf32> to vector<2x128xf32>
    %397 = arith.negf %396 : vector<2x128xf32>
    %398 = math.exp %397 : vector<2x128xf32>
    %cst_96 = arith.constant 1.000000e+00 : f32
    %399 = vector.broadcast %cst_96 : f32 to vector<2x128xf32>
    %400 = arith.addf %399, %398 : vector<2x128xf32>
    %401 = arith.divf %399, %400 : vector<2x128xf32>
    %402 = arith.mulf %393, %375 : vector<2x128xf32>
    %403 = arith.mulf %387, %395 : vector<2x128xf32>
    %404 = arith.addf %402, %403 : vector<2x128xf32>
    %405 = math.tanh %404 : vector<2x128xf32>
    %406 = arith.mulf %401, %405 : vector<2x128xf32>
    %c8_97 = arith.constant 8 : index
    %c0_98 = arith.constant 0 : index
    %407 = vector.load %arg11[%c8_97, %c0_98] : memref<16x128xf32, #tpu.memory_space<vmem>>, vector<2x128xf32>
    tpu.vector_store %arg11[%c8_97, %c0_98], %406 {strides = array<i32>} : memref<16x128xf32, #tpu.memory_space<vmem>>, vector<2x128xf32>,
    %408 = vector.extract_strided_slice %258 {offsets = [10, 0], sizes = [2, 512], strides = [1, 1]} : vector<16x512xf32> to vector<2x512xf32>
    %cst_99 = arith.constant dense<0.000000e+00> : vector<2x512xf32>
    %409 = tpu.matmul %406, %260, %cst_99 {dimension_numbers = #tpu.dot_dimension_numbers<[1], [0], [0], [1], [0, 0, 1, 1], [], []>} : vector<2x128xf32>, vector<128x512xf32>, vector<2x512xf32> -> vector<2x512xf32>
    %410 = arith.addf %408, %409 : vector<2x512xf32>
    %411 = vector.extract_strided_slice %410 {offsets = [0, 0], sizes = [2, 128], strides = [1, 1]} : vector<2x512xf32> to vector<2x128xf32>
    %412 = arith.negf %411 : vector<2x128xf32>
    %413 = math.exp %412 : vector<2x128xf32>
    %cst_100 = arith.constant 1.000000e+00 : f32
    %414 = vector.broadcast %cst_100 : f32 to vector<2x128xf32>
    %415 = arith.addf %414, %413 : vector<2x128xf32>
    %416 = arith.divf %414, %415 : vector<2x128xf32>
    %417 = vector.extract_strided_slice %410 {offsets = [0, 128], sizes = [2, 128], strides = [1, 1]} : vector<2x512xf32> to vector<2x128xf32>
    %418 = arith.negf %417 : vector<2x128xf32>
    %419 = math.exp %418 : vector<2x128xf32>
    %cst_101 = arith.constant 1.000000e+00 : f32
    %420 = vector.broadcast %cst_101 : f32 to vector<2x128xf32>
    %421 = arith.addf %420, %419 : vector<2x128xf32>
    %422 = arith.divf %420, %421 : vector<2x128xf32>
    %423 = vector.extract_strided_slice %410 {offsets = [0, 256], sizes = [2, 128], strides = [1, 1]} : vector<2x512xf32> to vector<2x128xf32>
    %424 = math.tanh %423 : vector<2x128xf32>
    %425 = vector.extract_strided_slice %410 {offsets = [0, 384], sizes = [2, 128], strides = [1, 1]} : vector<2x512xf32> to vector<2x128xf32>
    %426 = arith.negf %425 : vector<2x128xf32>
    %427 = math.exp %426 : vector<2x128xf32>
    %cst_102 = arith.constant 1.000000e+00 : f32
    %428 = vector.broadcast %cst_102 : f32 to vector<2x128xf32>
    %429 = arith.addf %428, %427 : vector<2x128xf32>
    %430 = arith.divf %428, %429 : vector<2x128xf32>
    %431 = arith.mulf %422, %404 : vector<2x128xf32>
    %432 = arith.mulf %416, %424 : vector<2x128xf32>
    %433 = arith.addf %431, %432 : vector<2x128xf32>
    %434 = math.tanh %433 : vector<2x128xf32>
    %435 = arith.mulf %430, %434 : vector<2x128xf32>
    %c10_103 = arith.constant 10 : index
    %c0_104 = arith.constant 0 : index
    %436 = vector.load %arg11[%c10_103, %c0_104] : memref<16x128xf32, #tpu.memory_space<vmem>>, vector<2x128xf32>
    tpu.vector_store %arg11[%c10_103, %c0_104], %435 {strides = array<i32>} : memref<16x128xf32, #tpu.memory_space<vmem>>, vector<2x128xf32>,
    %437 = vector.extract_strided_slice %258 {offsets = [12, 0], sizes = [2, 512], strides = [1, 1]} : vector<16x512xf32> to vector<2x512xf32>
    %cst_105 = arith.constant dense<0.000000e+00> : vector<2x512xf32>
    %438 = tpu.matmul %435, %260, %cst_105 {dimension_numbers = #tpu.dot_dimension_numbers<[1], [0], [0], [1], [0, 0, 1, 1], [], []>} : vector<2x128xf32>, vector<128x512xf32>, vector<2x512xf32> -> vector<2x512xf32>
    %439 = arith.addf %437, %438 : vector<2x512xf32>
    %440 = vector.extract_strided_slice %439 {offsets = [0, 0], sizes = [2, 128], strides = [1, 1]} : vector<2x512xf32> to vector<2x128xf32>
    %441 = arith.negf %440 : vector<2x128xf32>
    %442 = math.exp %441 : vector<2x128xf32>
    %cst_106 = arith.constant 1.000000e+00 : f32
    %443 = vector.broadcast %cst_106 : f32 to vector<2x128xf32>
    %444 = arith.addf %443, %442 : vector<2x128xf32>
    %445 = arith.divf %443, %444 : vector<2x128xf32>
    %446 = vector.extract_strided_slice %439 {offsets = [0, 128], sizes = [2, 128], strides = [1, 1]} : vector<2x512xf32> to vector<2x128xf32>
    %447 = arith.negf %446 : vector<2x128xf32>
    %448 = math.exp %447 : vector<2x128xf32>
    %cst_107 = arith.constant 1.000000e+00 : f32
    %449 = vector.broadcast %cst_107 : f32 to vector<2x128xf32>
    %450 = arith.addf %449, %448 : vector<2x128xf32>
    %451 = arith.divf %449, %450 : vector<2x128xf32>
    %452 = vector.extract_strided_slice %439 {offsets = [0, 256], sizes = [2, 128], strides = [1, 1]} : vector<2x512xf32> to vector<2x128xf32>
    %453 = math.tanh %452 : vector<2x128xf32>
    %454 = vector.extract_strided_slice %439 {offsets = [0, 384], sizes = [2, 128], strides = [1, 1]} : vector<2x512xf32> to vector<2x128xf32>
    %455 = arith.negf %454 : vector<2x128xf32>
    %456 = math.exp %455 : vector<2x128xf32>
    %cst_108 = arith.constant 1.000000e+00 : f32
    %457 = vector.broadcast %cst_108 : f32 to vector<2x128xf32>
    %458 = arith.addf %457, %456 : vector<2x128xf32>
    %459 = arith.divf %457, %458 : vector<2x128xf32>
    %460 = arith.mulf %451, %433 : vector<2x128xf32>
    %461 = arith.mulf %445, %453 : vector<2x128xf32>
    %462 = arith.addf %460, %461 : vector<2x128xf32>
    %463 = math.tanh %462 : vector<2x128xf32>
    %464 = arith.mulf %459, %463 : vector<2x128xf32>
    %c12_109 = arith.constant 12 : index
    %c0_110 = arith.constant 0 : index
    %465 = vector.load %arg11[%c12_109, %c0_110] : memref<16x128xf32, #tpu.memory_space<vmem>>, vector<2x128xf32>
    tpu.vector_store %arg11[%c12_109, %c0_110], %464 {strides = array<i32>} : memref<16x128xf32, #tpu.memory_space<vmem>>, vector<2x128xf32>,
    %466 = vector.extract_strided_slice %258 {offsets = [14, 0], sizes = [2, 512], strides = [1, 1]} : vector<16x512xf32> to vector<2x512xf32>
    %cst_111 = arith.constant dense<0.000000e+00> : vector<2x512xf32>
    %467 = tpu.matmul %464, %260, %cst_111 {dimension_numbers = #tpu.dot_dimension_numbers<[1], [0], [0], [1], [0, 0, 1, 1], [], []>} : vector<2x128xf32>, vector<128x512xf32>, vector<2x512xf32> -> vector<2x512xf32>
    %468 = arith.addf %466, %467 : vector<2x512xf32>
    %469 = vector.extract_strided_slice %468 {offsets = [0, 0], sizes = [2, 128], strides = [1, 1]} : vector<2x512xf32> to vector<2x128xf32>
    %470 = arith.negf %469 : vector<2x128xf32>
    %471 = math.exp %470 : vector<2x128xf32>
    %cst_112 = arith.constant 1.000000e+00 : f32
    %472 = vector.broadcast %cst_112 : f32 to vector<2x128xf32>
    %473 = arith.addf %472, %471 : vector<2x128xf32>
    %474 = arith.divf %472, %473 : vector<2x128xf32>
    %475 = vector.extract_strided_slice %468 {offsets = [0, 128], sizes = [2, 128], strides = [1, 1]} : vector<2x512xf32> to vector<2x128xf32>
    %476 = arith.negf %475 : vector<2x128xf32>
    %477 = math.exp %476 : vector<2x128xf32>
    %cst_113 = arith.constant 1.000000e+00 : f32
    %478 = vector.broadcast %cst_113 : f32 to vector<2x128xf32>
    %479 = arith.addf %478, %477 : vector<2x128xf32>
    %480 = arith.divf %478, %479 : vector<2x128xf32>
    %481 = vector.extract_strided_slice %468 {offsets = [0, 256], sizes = [2, 128], strides = [1, 1]} : vector<2x512xf32> to vector<2x128xf32>
    %482 = math.tanh %481 : vector<2x128xf32>
    %483 = vector.extract_strided_slice %468 {offsets = [0, 384], sizes = [2, 128], strides = [1, 1]} : vector<2x512xf32> to vector<2x128xf32>
    %484 = arith.negf %483 : vector<2x128xf32>
    %485 = math.exp %484 : vector<2x128xf32>
    %cst_114 = arith.constant 1.000000e+00 : f32
    %486 = vector.broadcast %cst_114 : f32 to vector<2x128xf32>
    %487 = arith.addf %486, %485 : vector<2x128xf32>
    %488 = arith.divf %486, %487 : vector<2x128xf32>
    %489 = arith.mulf %480, %462 : vector<2x128xf32>
    %490 = arith.mulf %474, %482 : vector<2x128xf32>
    %491 = arith.addf %489, %490 : vector<2x128xf32>
    %492 = math.tanh %491 : vector<2x128xf32>
    %493 = arith.mulf %488, %492 : vector<2x128xf32>
    %c14_115 = arith.constant 14 : index
    %c0_116 = arith.constant 0 : index
    %494 = vector.load %arg11[%c14_115, %c0_116] : memref<16x128xf32, #tpu.memory_space<vmem>>, vector<2x128xf32>
    tpu.vector_store %arg11[%c14_115, %c0_116], %493 {strides = array<i32>} : memref<16x128xf32, #tpu.memory_space<vmem>>, vector<2x128xf32>,
    %c0_117 = arith.constant 0 : index
    %c0_118 = arith.constant 0 : index
    %495 = vector.load %arg11[%c0_117, %c0_118] : memref<16x128xf32, #tpu.memory_space<vmem>>, vector<16x128xf32>
    %496 = arith.addf %7, %495 : vector<16x128xf32>
    %cst_119 = arith.constant 0.707106769 : f32
    %497 = vector.broadcast %cst_119 : f32 to vector<16x128xf32>
    %498 = arith.mulf %496, %497 : vector<16x128xf32>
    %499 = tpu.iota {dimensions = array<i32: 0>} : vector<8x16xi32>
    %500 = tpu.iota {dimensions = array<i32: 1>} : vector<8x16xi32>
    %c0_120 = arith.constant 0 : index
    %c0_121 = arith.constant 0 : index
    %501 = vector.load %arg6[%c0_120, %c0_121] : memref<128x256xf32, #tpu.memory_space<vmem>>, vector<128x256xf32>
    %c0_122 = arith.constant 0 : index
    %c0_123 = arith.constant 0 : index
    %502 = vector.load %arg7[%c0_122, %c0_123] : memref<128x128xf32, #tpu.memory_space<vmem>>, vector<128x128xf32>
    %c0_124 = arith.constant 0 : index
    %c0_125 = arith.constant 0 : index
    %503 = vector.load %arg8[%c0_124, %c0_125] : memref<128x128xf32, #tpu.memory_space<vmem>>, vector<128x128xf32>
    %c0_126 = arith.constant 0 : index
    %c0_127 = arith.constant 0 : index
    %504 = vector.load %arg9[%c0_126, %c0_127] : memref<1x128xf32, #tpu.memory_space<vmem>>, vector<1x128xf32>
    %c2_i32 = arith.constant 2 : i32
    %505 = vector.broadcast %c2_i32 : i32 to vector<8x16xi32>
    %506 = arith.muli %499, %505 : vector<8x16xi32>
    %c0_i32 = arith.constant 0 : i32
    %507 = vector.broadcast %c0_i32 : i32 to vector<8x16xi32>
    %508 = arith.addi %506, %507 : vector<8x16xi32>
    %509 = arith.cmpi eq, %500, %508 : vector<8x16xi32>
    %510 = arith.extui %509 : vector<8x16xi1> to vector<8x16xi32>
    %511 = arith.sitofp %510 : vector<8x16xi32> to vector<8x16xf32>
    %cst_128 = arith.constant dense<0.000000e+00> : vector<8x128xf32>
    %512 = tpu.matmul %511, %498, %cst_128 {dimension_numbers = #tpu.dot_dimension_numbers<[1], [0], [0], [1], [0, 0, 1, 1], [], []>} : vector<8x16xf32>, vector<16x128xf32>, vector<8x128xf32> -> vector<8x128xf32>
    %cst_129 = arith.constant dense<0.000000e+00> : vector<8x256xf32>
    %513 = tpu.matmul %512, %501, %cst_129 {dimension_numbers = #tpu.dot_dimension_numbers<[1], [0], [0], [1], [0, 0, 1, 1], [], []>} : vector<8x128xf32>, vector<128x256xf32>, vector<8x256xf32> -> vector<8x256xf32>
    %514 = vector.extract_strided_slice %513 {offsets = [0, 0], sizes = [8, 128], strides = [1, 1]} : vector<8x256xf32> to vector<8x128xf32>
    %515 = vector.extract_strided_slice %513 {offsets = [0, 128], sizes = [8, 128], strides = [1, 1]} : vector<8x256xf32> to vector<8x128xf32>
    %c0_130 = arith.constant 0 : index
    %c0_131 = arith.constant 0 : index
    %c0_132 = arith.constant 0 : index
    %516 = vector.load %arg5[%c0_130, %c0_131, %c0_132] : memref<2x8x128xf32, #tpu.memory_space<vmem>>, vector<1x8x128xf32>
    %517 = vector.shape_cast %516 : vector<1x8x128xf32> to vector<8x128xf32>
    %cst_133 = arith.constant dense<0.000000e+00> : vector<8x8xf32>
    %518 = tpu.matmul %514, %517, %cst_133 {dimension_numbers = #tpu.dot_dimension_numbers<[1], [1], [0], [0], [0, 0, 1, 0], [], []>} : vector<8x128xf32>, vector<8x128xf32>, vector<8x8xf32> -> vector<8x8xf32>
    %cst_134 = arith.constant dense<0xFF800000> : vector<8xf32>
    %519 = vector.multi_reduction <maximumf>, %518, %cst_134 [1] : vector<8x8xf32> to vector<8xf32>
    %520 = vector.shape_cast %519 : vector<8xf32> to vector<8x1xf32>
    %521 = vector.broadcast %520 : vector<8x1xf32> to vector<8x8xf32>
    %522 = arith.subf %518, %521 : vector<8x8xf32>
    %523 = math.exp %522 : vector<8x8xf32>
    %cst_135 = arith.constant dense<0.000000e+00> : vector<8xf32>
    %524 = vector.multi_reduction <add>, %523, %cst_135 [1] : vector<8x8xf32> to vector<8xf32>
    %525 = vector.shape_cast %524 : vector<8xf32> to vector<8x1xf32>
    %526 = tpu.reciprocal %525 : vector<8x1xf32> -> vector<8x1xf32>
    %527 = vector.broadcast %526 : vector<8x1xf32> to vector<8x8xf32>
    %528 = arith.mulf %523, %527 : vector<8x8xf32>
    %cst_136 = arith.constant dense<0.000000e+00> : vector<8x128xf32>
    %529 = tpu.matmul %528, %517, %cst_136 {dimension_numbers = #tpu.dot_dimension_numbers<[1], [0], [0], [1], [0, 0, 1, 1], [], []>} : vector<8x8xf32>, vector<8x128xf32>, vector<8x128xf32> -> vector<8x128xf32>
    %cst_137 = arith.constant dense<0.000000e+00> : vector<8x128xf32>
    %530 = tpu.matmul %529, %502, %cst_137 {dimension_numbers = #tpu.dot_dimension_numbers<[1], [0], [0], [1], [0, 0, 1, 1], [], []>} : vector<8x128xf32>, vector<128x128xf32>, vector<8x128xf32> -> vector<8x128xf32>
    %531 = arith.addf %530, %515 : vector<8x128xf32>
    %532 = math.tanh %531 : vector<8x128xf32>
    %533 = arith.addf %512, %532 : vector<8x128xf32>
    %cst_138 = arith.constant 0.707106769 : f32
    %534 = vector.broadcast %cst_138 : f32 to vector<8x128xf32>
    %535 = arith.mulf %533, %534 : vector<8x128xf32>
    %cst_139 = arith.constant dense<0.000000e+00> : vector<8x128xf32>
    %536 = tpu.matmul %535, %503, %cst_139 {dimension_numbers = #tpu.dot_dimension_numbers<[1], [0], [0], [1], [0, 0, 1, 1], [], []>} : vector<8x128xf32>, vector<128x128xf32>, vector<8x128xf32> -> vector<8x128xf32>
    %537 = vector.broadcast %504 : vector<1x128xf32> to vector<8x128xf32>
    %538 = arith.addf %536, %537 : vector<8x128xf32>
    %cst_140 = arith.constant dense<0xFF800000> : vector<8xf32>
    %539 = vector.multi_reduction <maximumf>, %538, %cst_140 [1] : vector<8x128xf32> to vector<8xf32>
    %540 = vector.shape_cast %539 : vector<8xf32> to vector<8x1xf32>
    %541 = vector.broadcast %540 : vector<8x1xf32> to vector<8x128xf32>
    %542 = arith.subf %538, %541 : vector<8x128xf32>
    %543 = math.exp %542 : vector<8x128xf32>
    %cst_141 = arith.constant dense<0.000000e+00> : vector<8xf32>
    %544 = vector.multi_reduction <add>, %543, %cst_141 [1] : vector<8x128xf32> to vector<8xf32>
    %545 = vector.shape_cast %544 : vector<8xf32> to vector<8x1xf32>
    %546 = math.log %545 : vector<8x1xf32>
    %547 = vector.broadcast %546 : vector<8x1xf32> to vector<8x128xf32>
    %548 = arith.subf %542, %547 : vector<8x128xf32>
    %c0_142 = arith.constant 0 : index
    %c0_143 = arith.constant 0 : index
    %c0_144 = arith.constant 0 : index
    %549 = vector.load %arg10[%c0_142, %c0_143, %c0_144] : memref<2x8x128xf32, #tpu.memory_space<vmem>>, vector<1x8x128xf32>
    %550 = vector.shape_cast %549 : vector<1x8x128xf32> to vector<8x128xf32>
    %551 = vector.shape_cast %548 : vector<8x128xf32> to vector<1x8x128xf32>
    tpu.vector_store %arg10[%c0_142, %c0_143, %c0_144], %551 {strides = array<i32>} : memref<2x8x128xf32, #tpu.memory_space<vmem>>, vector<1x8x128xf32>,
    %c2_i32_145 = arith.constant 2 : i32
    %552 = vector.broadcast %c2_i32_145 : i32 to vector<8x16xi32>
    %553 = arith.muli %499, %552 : vector<8x16xi32>
    %c1_i32 = arith.constant 1 : i32
    %554 = vector.broadcast %c1_i32 : i32 to vector<8x16xi32>
    %555 = arith.addi %553, %554 : vector<8x16xi32>
    %556 = arith.cmpi eq, %500, %555 : vector<8x16xi32>
    %557 = arith.extui %556 : vector<8x16xi1> to vector<8x16xi32>
    %558 = arith.sitofp %557 : vector<8x16xi32> to vector<8x16xf32>
    %cst_146 = arith.constant dense<0.000000e+00> : vector<8x128xf32>
    %559 = tpu.matmul %558, %498, %cst_146 {dimension_numbers = #tpu.dot_dimension_numbers<[1], [0], [0], [1], [0, 0, 1, 1], [], []>} : vector<8x16xf32>, vector<16x128xf32>, vector<8x128xf32> -> vector<8x128xf32>
    %cst_147 = arith.constant dense<0.000000e+00> : vector<8x256xf32>
    %560 = tpu.matmul %559, %501, %cst_147 {dimension_numbers = #tpu.dot_dimension_numbers<[1], [0], [0], [1], [0, 0, 1, 1], [], []>} : vector<8x128xf32>, vector<128x256xf32>, vector<8x256xf32> -> vector<8x256xf32>
    %561 = vector.extract_strided_slice %560 {offsets = [0, 0], sizes = [8, 128], strides = [1, 1]} : vector<8x256xf32> to vector<8x128xf32>
    %562 = vector.extract_strided_slice %560 {offsets = [0, 128], sizes = [8, 128], strides = [1, 1]} : vector<8x256xf32> to vector<8x128xf32>
    %c1_148 = arith.constant 1 : index
    %c0_149 = arith.constant 0 : index
    %c0_150 = arith.constant 0 : index
    %563 = vector.load %arg5[%c1_148, %c0_149, %c0_150] : memref<2x8x128xf32, #tpu.memory_space<vmem>>, vector<1x8x128xf32>
    %564 = vector.shape_cast %563 : vector<1x8x128xf32> to vector<8x128xf32>
    %cst_151 = arith.constant dense<0.000000e+00> : vector<8x8xf32>
    %565 = tpu.matmul %561, %564, %cst_151 {dimension_numbers = #tpu.dot_dimension_numbers<[1], [1], [0], [0], [0, 0, 1, 0], [], []>} : vector<8x128xf32>, vector<8x128xf32>, vector<8x8xf32> -> vector<8x8xf32>
    %cst_152 = arith.constant dense<0xFF800000> : vector<8xf32>
    %566 = vector.multi_reduction <maximumf>, %565, %cst_152 [1] : vector<8x8xf32> to vector<8xf32>
    %567 = vector.shape_cast %566 : vector<8xf32> to vector<8x1xf32>
    %568 = vector.broadcast %567 : vector<8x1xf32> to vector<8x8xf32>
    %569 = arith.subf %565, %568 : vector<8x8xf32>
    %570 = math.exp %569 : vector<8x8xf32>
    %cst_153 = arith.constant dense<0.000000e+00> : vector<8xf32>
    %571 = vector.multi_reduction <add>, %570, %cst_153 [1] : vector<8x8xf32> to vector<8xf32>
    %572 = vector.shape_cast %571 : vector<8xf32> to vector<8x1xf32>
    %573 = tpu.reciprocal %572 : vector<8x1xf32> -> vector<8x1xf32>
    %574 = vector.broadcast %573 : vector<8x1xf32> to vector<8x8xf32>
    %575 = arith.mulf %570, %574 : vector<8x8xf32>
    %cst_154 = arith.constant dense<0.000000e+00> : vector<8x128xf32>
    %576 = tpu.matmul %575, %564, %cst_154 {dimension_numbers = #tpu.dot_dimension_numbers<[1], [0], [0], [1], [0, 0, 1, 1], [], []>} : vector<8x8xf32>, vector<8x128xf32>, vector<8x128xf32> -> vector<8x128xf32>
    %cst_155 = arith.constant dense<0.000000e+00> : vector<8x128xf32>
    %577 = tpu.matmul %576, %502, %cst_155 {dimension_numbers = #tpu.dot_dimension_numbers<[1], [0], [0], [1], [0, 0, 1, 1], [], []>} : vector<8x128xf32>, vector<128x128xf32>, vector<8x128xf32> -> vector<8x128xf32>
    %578 = arith.addf %577, %562 : vector<8x128xf32>
    %579 = math.tanh %578 : vector<8x128xf32>
    %580 = arith.addf %559, %579 : vector<8x128xf32>
    %cst_156 = arith.constant 0.707106769 : f32
    %581 = vector.broadcast %cst_156 : f32 to vector<8x128xf32>
    %582 = arith.mulf %580, %581 : vector<8x128xf32>
    %cst_157 = arith.constant dense<0.000000e+00> : vector<8x128xf32>
    %583 = tpu.matmul %582, %503, %cst_157 {dimension_numbers = #tpu.dot_dimension_numbers<[1], [0], [0], [1], [0, 0, 1, 1], [], []>} : vector<8x128xf32>, vector<128x128xf32>, vector<8x128xf32> -> vector<8x128xf32>
    %584 = vector.broadcast %504 : vector<1x128xf32> to vector<8x128xf32>
    %585 = arith.addf %583, %584 : vector<8x128xf32>
    %cst_158 = arith.constant dense<0xFF800000> : vector<8xf32>
    %586 = vector.multi_reduction <maximumf>, %585, %cst_158 [1] : vector<8x128xf32> to vector<8xf32>
    %587 = vector.shape_cast %586 : vector<8xf32> to vector<8x1xf32>
    %588 = vector.broadcast %587 : vector<8x1xf32> to vector<8x128xf32>
    %589 = arith.subf %585, %588 : vector<8x128xf32>
    %590 = math.exp %589 : vector<8x128xf32>
    %cst_159 = arith.constant dense<0.000000e+00> : vector<8xf32>
    %591 = vector.multi_reduction <add>, %590, %cst_159 [1] : vector<8x128xf32> to vector<8xf32>
    %592 = vector.shape_cast %591 : vector<8xf32> to vector<8x1xf32>
    %593 = math.log %592 : vector<8x1xf32>
    %594 = vector.broadcast %593 : vector<8x1xf32> to vector<8x128xf32>
    %595 = arith.subf %589, %594 : vector<8x128xf32>
    %c1_160 = arith.constant 1 : index
    %c0_161 = arith.constant 0 : index
    %c0_162 = arith.constant 0 : index
    %596 = vector.load %arg10[%c1_160, %c0_161, %c0_162] : memref<2x8x128xf32, #tpu.memory_space<vmem>>, vector<1x8x128xf32>
    %597 = vector.shape_cast %596 : vector<1x8x128xf32> to vector<8x128xf32>
    %598 = vector.shape_cast %595 : vector<8x128xf32> to vector<1x8x128xf32>
    tpu.vector_store %arg10[%c1_160, %c0_161, %c0_162], %598 {strides = array<i32>} : memref<2x8x128xf32, #tpu.memory_space<vmem>>, vector<1x8x128xf32>,
    return
  }
}

</mosaic_0001>

<bundles_post_ra>
// kernel: decoder_forward_train.1
= control target key start
LH: loop header
LB: loop body
LE: loop exit
PB: predicated region body
PF: predicated region fallthrough
CT: control target
= control target key end

     0   :  { %15 = vsyncpa [#allocation4], 0  ;;  %s8182_s0 = inlined_call_operand.vmem [shape: s32[16,1], index: 0, kind: input, shape index: {}]   ;;  %s8183_s1 = inlined_call_operand.vmem [shape: f32[16,128], index: 1, kind: input, shape index: {}]   ;;  %s8184_s2 = inlined_call_operand.hbm [shape: f32[2,128,512], index: 2, kind: input, shape index: {}]   ;;  %s8185_s3 = inlined_call_operand.hbm [shape: f32[2,128,512], index: 3, kind: input, shape index: {}]   ;;  %s8186_s4 = inlined_call_operand.vmem [shape: f32[2,1,512], index: 4, kind: input, shape index: {}]   ;;  %s8187_s5 = inlined_call_operand.vmem [shape: f32[2,8,128], index: 5, kind: input, shape index: {}]   ;;  %s8188_s6 = inlined_call_operand.hbm [shape: f32[128,256], index: 6, kind: input, shape index: {}]   ;;  %s8189_s7 = inlined_call_operand.hbm [shape: f32[128,128], index: 7, kind: input, shape index: {}]   ;;  %s8190_s8 = inlined_call_operand.hbm [shape: f32[128,128], index: 8, kind: input, shape index: {}]   ;;  %s8191_s9 = inlined_call_operand.vmem [shape: f32[1,128], index: 9, kind: input, shape index: {}]   ;;  %s8192_s10 = inlined_call_operand.hbm [shape: f32[2,8,128], index: 10, kind: output, shape index: {}]  }
   0x1   :  { %16 = vsyncpa [#allocation7], 0 }
   0x2   :  { %17 = vsyncpa [#allocation10], 0 }
   0x3   :  { %18 = vsyncpa [#allocation5], 0  ;;  %s6867_s13 = smov [#allocation6]   ;;  %s6868_s15 = smov [#allocation9]  }
   0x4   :  { %s40_s14 = sshll.u32 %s6867_s13, 4  ;;  %s68_s16 = sshll.u32 %s6868_s15, 4  ;;  %s41_s14 = int_to_ptr.vmem [resolvable:$true] %s40_s14  ;;  %s6938_s16 = int_to_ptr.vmem [resolvable:$true] %s68_s16 }
   0x5   :  { %s6727_s19 = scalar_lea.hbm %s8185_s3, 16384 }
   0x6   :  { %p6728_p0 = scmp.ne.s32.totalorder %s8185_s3, %s6727_s19  ;;  %p6731_p1 = scmp.lt.u32.totalorder %s6727_s19, %s8185_s3 }
   0x8   :  { %p6733_p2 = pnand %p6731_p1, %p6728_p0 }
   0xa   :  { %6736 = shalt.err (!%p6733_p2)
}
   0xb   :  { %s6737_s24 = scalar_lea.vmem %s41_s14, 16384  ;;  %p6742_p4 = scmp.lt.s32.totalorder %s41_s14, %s41_s14 }
   0xc   :  { %p6738_p3 = scmp.ne.s32.totalorder %s41_s14, %s6737_s24  ;;  %p6743_p5 = scmp.lt.s32.totalorder %s6737_s24, %s6737_s24 }
   0xe   :  { %p6744_p6 = por %p6743_p5, %p6742_p4 }
  0x10   :  { %p6745_p7 = pnand %p6744_p6, %p6738_p3 }
  0x12   :  { %6748 = shalt.err (!%p6745_p7)
}
  0x13   :  { %s6869_s25 = smov 512   ;;  %s6870_s26 = smov 32  }
  0x14   :  { %46 = dma.hbm_to_vmem [thread:$0]  %s8185_s3, 16384, %s41_s14, [#allocation7], %s6869_s25, %s6869_s25, %s6870_s26  }
  0x15   :  { %s6749_s11 = scalar_lea.hbm %s8189_s7, 2048 }
  0x16   :  { %p6750_p8 = scmp.ne.s32.totalorder %s8189_s7, %s6749_s11  ;;  %p6753_p9 = scmp.lt.u32.totalorder %s6749_s11, %s8189_s7 }
  0x18   :  { %p6755_p10 = pnand %p6753_p9, %p6750_p8 }
  0x1a   :  { %6758 = shalt.err (!%p6755_p10)
}
  0x1b   :  { %s6759_s18 = scalar_lea.vmem %s6938_s16, 2048  ;;  %p6764_p12 = scmp.lt.s32.totalorder %s6938_s16, %s6938_s16 }
  0x1c   :  { %p6760_p11 = scmp.ne.s32.totalorder %s6938_s16, %s6759_s18  ;;  %p6765_p13 = scmp.lt.s32.totalorder %s6759_s18, %s6759_s18 }
  0x1e   :  { %p6766_p0 = por %p6765_p13, %p6764_p12 }
  0x20   :  { %p6767_p1 = pnand %p6766_p0, %p6760_p11 }
  0x22   :  { %6770 = shalt.err (!%p6767_p1)
}
  0x23   :  { %s6871_s3 = smov 128   ;;  %s6872_s14 = smov 8  }
  0x24   :  { %74 = dma.hbm_to_vmem [thread:$0]  %s8189_s7, 2048, %s6938_s16, [#allocation10], %s6871_s3, %s6871_s3, %s6872_s14  }
  0x25   :  { %s6873_s21 = smov [#allocation3]   ;;  %s6874_s23 = smov [#allocation8]  }
  0x26   :  { %s28_s22 = sshll.u32 %s6873_s21, 4  ;;  %s56_s24 = sshll.u32 %s6874_s23, 4  ;;  %s29_s22 = int_to_ptr.vmem [resolvable:$true] %s28_s22  ;;  %s6975_s24 = int_to_ptr.vmem [resolvable:$true] %s56_s24 }
  0x27   :  { %s6771_s29 = scalar_lea.hbm %s8184_s2, 16384 }
  0x28   :  { %p6772_p2 = scmp.ne.s32.totalorder %s8184_s2, %s6771_s29  ;;  %p6775_p3 = scmp.lt.u32.totalorder %s6771_s29, %s8184_s2 }
  0x2a   :  { %p6777_p4 = pnand %p6775_p3, %p6772_p2 }
  0x2c   :  { %6780 = shalt.err (!%p6777_p4)
}
  0x2d   :  { %s6781_s7 = scalar_lea.vmem %s29_s22, 16384  ;;  %p6786_p6 = scmp.lt.s32.totalorder %s29_s22, %s29_s22 }
  0x2e   :  { %p6782_p5 = scmp.ne.s32.totalorder %s29_s22, %s6781_s7  ;;  %p6787_p7 = scmp.lt.s32.totalorder %s6781_s7, %s6781_s7 }
  0x30   :  { %p6788_p8 = por %p6787_p7, %p6786_p6 }
  0x32   :  { %p6789_p9 = pnand %p6788_p8, %p6782_p5 }
  0x34   :  { %6792 = shalt.err (!%p6789_p9)
}
  0x35   :  { %34 = dma.hbm_to_vmem [thread:$0]  %s8184_s2, 16384, %s29_s22, [#allocation4], %s6869_s25, %s6869_s25, %s6870_s26  }
  0x36   :  { %s6793_s19 = scalar_lea.hbm %s8188_s6, 4096 }
  0x37   :  { %p6794_p10 = scmp.ne.s32.totalorder %s8188_s6, %s6793_s19  ;;  %p6797_p11 = scmp.lt.u32.totalorder %s6793_s19, %s8188_s6 }
  0x39   :  { %p6799_p12 = pnand %p6797_p11, %p6794_p10 }
  0x3b   :  { %6802 = shalt.err (!%p6799_p12)
}
  0x3c   :  { %s6803_s28 = scalar_lea.vmem %s6975_s24, 4096  ;;  %p6808_p0 = scmp.lt.s32.totalorder %s6975_s24, %s6975_s24 }
  0x3d   :  { %p6804_p13 = scmp.ne.s32.totalorder %s6975_s24, %s6803_s28  ;;  %p6809_p1 = scmp.lt.s32.totalorder %s6803_s28, %s6803_s28 }
  0x3f   :  { %p6810_p2 = por %p6809_p1, %p6808_p0 }
  0x41   :  { %p6811_p3 = pnand %p6810_p2, %p6804_p13 }
  0x43   :  { %6814 = shalt.err (!%p6811_p3)
}
  0x44   :  { %s6875_s2 = smov 256   ;;  %s6876_s25 = smov 16  }
  0x45   :  { %62 = dma.hbm_to_vmem [thread:$0]  %s8188_s6, 4096, %s6975_s24, [#allocation7], %s6875_s2, %s6875_s2, %s6876_s25  }
  0x46   :  { %s6877_s29 = smov [#allocation11]   ;;  %s6815_s13 = scalar_lea.hbm %s8190_s8, 2048 }
  0x47   :  { %s80_s30 = sshll.u32 %s6877_s29, 4  ;;  %p6816_p4 = scmp.ne.s32.totalorder %s8190_s8, %s6815_s13  ;;  %s81_s30 = int_to_ptr.vmem [resolvable:$true] %s80_s30 }
  0x48   :  { %p6819_p5 = scmp.lt.u32.totalorder %s6815_s13, %s8190_s8 }
  0x4a   :  { %p6821_p6 = pnand %p6819_p5, %p6816_p4 }
  0x4c   :  { %6824 = shalt.err (!%p6821_p6)
}
  0x4d   :  { %s6825_s18 = scalar_lea.vmem %s81_s30, 2048  ;;  %p6830_p8 = scmp.lt.s32.totalorder %s81_s30, %s81_s30 }
  0x4e   :  { %p6826_p7 = scmp.ne.s32.totalorder %s81_s30, %s6825_s18  ;;  %p6831_p9 = scmp.lt.s32.totalorder %s6825_s18, %s6825_s18 }
  0x50   :  { %p6832_p10 = por %p6831_p9, %p6830_p8 }
  0x52   :  { %p6833_p11 = pnand %p6832_p10, %p6826_p7 }
  0x54   :  { %6836 = shalt.err (!%p6833_p11)
}
  0x55   :  { %86 = dma.hbm_to_vmem [thread:$0]  %s8190_s8, 2048, %s81_s30, [#allocation10], %s6871_s3, %s6871_s3, %s6872_s14  }
  0x56   :  { %6859 = dma.done.wait [#allocation4], 16384  }
  0x57   :  { %6860 = vsyncadd [#allocation4], 4294950912 }
  0x58   :  { %6861 = dma.done.wait [#allocation7], 20480  }
  0x59   :  { %6862 = vsyncadd [#allocation7], 4294946816 }
  0x5a   :  { %6863 = dma.done.wait [#allocation10], 4096  }
  0x5b   :  { %6864 = vsyncadd [#allocation10], 4294963200  ;;  %v6878_v0 = vmov 0   ;;  %v104_v1 = vld [vmem:[%s8182_s0] sm:$0xff]  ;;  %v121_v3 = vld [vmem:[%s8183_s1 + $0x8] sm:$0xff]  ;;  %v8196_v6 = vmov 0.0   ;;  %v106_v58 = vlaneseq }
  0x5c   :  { %6450 = vset.pattern.permute.xlu0 %v6878_v0  ;;  %v120_v2 = vld [vmem:[%s8183_s1] sm:$0xff]  ;;  %v105_v4 = vld [vmem:[%s8182_s0 + $0x8] sm:$0xff]  ;;  %354 = vmatprep.mubr.f32.mxu1 %v8196_v6  ;;  %v205_v7 = vld [vmem:[#allocation3 + $0x8] sm:$0xff]  ;;  %vm122_vm0 = vcmask 130048   ;;  %vm6881_vm3 = vmmov 0   ;;  %vm4061_vm5 = vcmask 64512  }
  0x5d   :  { %109 = vperm.xlu0 %6450, %v104_v1   ;;  %v5112_v5 = vpack.c.bf16 %v121_v3, %v120_v2  ;;  %v209_v8 = vld [vmem:[#allocation3 + $0x28] sm:$0xff]  ;;  %v207_v9 = vld [vmem:[#allocation3 + $0x18] sm:$0xff]  ;;  %v204_v12 = vld [vmem:[#allocation3] sm:$0xff]  ;;  %v7038_v59 = vand.u32 127, %v106_v58 }
  0x5e   :  { %v5116_v10 = vpack.c.bf16 %v209_v8, %v205_v7  ;;  %v211_v11 = vld [vmem:[#allocation3 + $0x38] sm:$0xff]  ;;  %v208_v13 = vld [vmem:[#allocation3 + $0x20] sm:$0xff]  ;;  %v213_v16 = vld [vmem:[#allocation3 + $0x48] sm:$0xff] }
  0x5f   :  { %5113 = vmatprep.subr.bf16.mxu0 %v5112_v5  ;;  %v5148_v14 = vpack.c.bf16 %v211_v11, %v207_v9  ;;  %v5118_v15 = vpack.c.bf16 %v208_v13, %v204_v12  ;;  %v217_v17 = vld [vmem:[#allocation3 + $0x68] sm:$0xff]  ;;  %v212_v19 = vld [vmem:[#allocation3 + $0x40] sm:$0xff]  ;;  %8203 = vst [vmem:[#allocation17_spill] sm:$0xff] %v7038_v59  ;;  %v206_v61 = vld [vmem:[#allocation3 + $0x10] sm:$0xff] }
  0x60   :  { %5115 = vmatpush3.bf16.msra.mxu0 %v5112_v5  ;;  %5117 = vmatprep.subr.bf16.mxu1 %v5116_v10  ;;  %v5120_v18 = vpack.c.bf16 %v217_v17, %v213_v16  ;;  %v216_v20 = vld [vmem:[#allocation3 + $0x60] sm:$0xff]  ;;  %v221_v22 = vld [vmem:[#allocation3 + $0x88] sm:$0xff]  ;;  %v210_v62 = vld [vmem:[#allocation3 + $0x30] sm:$0xff] }
  0x61   :  { %112 = vperm.xlu0 %6450, %v105_v4   ;;  %5149 = vmatprep.subr.bf16.mxu0 %v5148_v14  ;;  %v5122_v21 = vpack.c.bf16 %v216_v20, %v212_v19  ;;  %v225_v23 = vld [vmem:[#allocation3 + $0xa8] sm:$0xff]  ;;  %v220_v25 = vld [vmem:[#allocation3 + $0x80] sm:$0xff]  ;;  %v215_v0 = vld [vmem:[#allocation3 + $0x58] sm:$0xff]  ;;  %v5150_v3 = vpack.c.bf16 %v210_v62, %v206_v61 }
  0x62   :  { %5119 = vmatpush1.bf16.msra.mxu1 %v5118_v15  ;;  %v5124_v24 = vpack.c.bf16 %v225_v23, %v221_v22  ;;  %v224_v26 = vld [vmem:[#allocation3 + $0xa0] sm:$0xff]  ;;  %v229_v28 = vld [vmem:[#allocation3 + $0xc8] sm:$0xff]  ;;  %v219_v1 = vld [vmem:[#allocation3 + $0x78] sm:$0xff] }
  0x63   :  { %5121 = vmatprep.subr.bf16.mxu1 %v5120_v18  ;;  %v5126_v27 = vpack.c.bf16 %v224_v26, %v220_v25  ;;  %v233_v29 = vld [vmem:[#allocation3 + $0xe8] sm:$0xff]  ;;  %v228_v31 = vld [vmem:[#allocation3 + $0xc0] sm:$0xff]  ;;  %v5152_v4 = vpack.c.bf16 %v219_v1, %v215_v0  ;;  %v214_v5 = vld [vmem:[#allocation3 + $0x50] sm:$0xff] }
  0x64   :  { %v5128_v30 = vpack.c.bf16 %v233_v29, %v229_v28  ;;  %v232_v32 = vld [vmem:[#allocation3 + $0xe0] sm:$0xff]  ;;  %v237_v34 = vld [vmem:[#allocation3 + $0x108] sm:$0xff]  ;;  %v218_v7 = vld [vmem:[#allocation3 + $0x70] sm:$0xff] }
  0x65   :  { %v5130_v33 = vpack.c.bf16 %v232_v32, %v228_v31  ;;  %v241_v35 = vld [vmem:[#allocation3 + $0x128] sm:$0xff]  ;;  %v236_v37 = vld [vmem:[#allocation3 + $0x100] sm:$0xff]  ;;  %v223_v9 = vld [vmem:[#allocation3 + $0x98] sm:$0xff]  ;;  %v5154_v11 = vpack.c.bf16 %v218_v7, %v214_v5 }
  0x66   :  { %5123 = vmatpush1.bf16.msra.mxu1 %v5122_v21  ;;  %v5132_v36 = vpack.c.bf16 %v241_v35, %v237_v34  ;;  %v240_v38 = vld [vmem:[#allocation3 + $0x120] sm:$0xff]  ;;  %v245_v40 = vld [vmem:[#allocation3 + $0x148] sm:$0xff]  ;;  %v227_v10 = vld [vmem:[#allocation3 + $0xb8] sm:$0xff] }
  0x67   :  { %5125 = vmatprep.subr.bf16.mxu1 %v5124_v24  ;;  %v5134_v39 = vpack.c.bf16 %v240_v38, %v236_v37  ;;  %v249_v41 = vld [vmem:[#allocation3 + $0x168] sm:$0xff]  ;;  %v244_v43 = vld [vmem:[#allocation3 + $0x140] sm:$0xff]  ;;  %v5156_v12 = vpack.c.bf16 %v227_v10, %v223_v9  ;;  %v222_v13 = vld [vmem:[#allocation3 + $0x90] sm:$0xff] }
  0x68   :  { %v5136_v42 = vpack.c.bf16 %v249_v41, %v245_v40  ;;  %v248_v44 = vld [vmem:[#allocation3 + $0x160] sm:$0xff]  ;;  %v253_v46 = vld [vmem:[#allocation3 + $0x188] sm:$0xff]  ;;  %v226_v14 = vld [vmem:[#allocation3 + $0xb0] sm:$0xff] }
  0x69   :  { %v5138_v45 = vpack.c.bf16 %v248_v44, %v244_v43  ;;  %v257_v47 = vld [vmem:[#allocation3 + $0x1a8] sm:$0xff]  ;;  %v252_v49 = vld [vmem:[#allocation3 + $0x180] sm:$0xff]  ;;  %v231_v15 = vld [vmem:[#allocation3 + $0xd8] sm:$0xff]  ;;  %v5158_v17 = vpack.c.bf16 %v226_v14, %v222_v13 }
  0x6a   :  { %5127 = vmatpush1.bf16.msra.mxu1 %v5126_v27  ;;  %v5140_v48 = vpack.c.bf16 %v257_v47, %v253_v46  ;;  %v256_v50 = vld [vmem:[#allocation3 + $0x1a0] sm:$0xff]  ;;  %v261_v52 = vld [vmem:[#allocation3 + $0x1c8] sm:$0xff]  ;;  %v235_v16 = vld [vmem:[#allocation3 + $0xf8] sm:$0xff] }
  0x6b   :  { %5129 = vmatprep.subr.bf16.mxu1 %v5128_v30  ;;  %v5142_v51 = vpack.c.bf16 %v256_v50, %v252_v49  ;;  %v265_v53 = vld [vmem:[#allocation3 + $0x1e8] sm:$0xff]  ;;  %v260_v55 = vld [vmem:[#allocation3 + $0x1c0] sm:$0xff]  ;;  %v5160_v18 = vpack.c.bf16 %v235_v16, %v231_v15  ;;  %v230_v19 = vld [vmem:[#allocation3 + $0xd0] sm:$0xff] }
  0x6c   :  { %v5144_v54 = vpack.c.bf16 %v265_v53, %v261_v52  ;;  %v264_v56 = vld [vmem:[#allocation3 + $0x1e0] sm:$0xff]  ;;  %v234_v20 = vld [vmem:[#allocation3 + $0xf0] sm:$0xff]  ;;  %v239_v21 = vld [vmem:[#allocation3 + $0x118] sm:$0xff] }
  0x6d   :  { %v5146_v57 = vpack.c.bf16 %v264_v56, %v260_v55  ;;  %v243_v22 = vld [vmem:[#allocation3 + $0x138] sm:$0xff]  ;;  %v5162_v23 = vpack.c.bf16 %v234_v20, %v230_v19  ;;  %v238_v25 = vld [vmem:[#allocation3 + $0x110] sm:$0xff]  ;;  %v445_v46 = vld [vmem:[#allocation6 + $0x8] sm:$0xff] }
  0x6e   :  { %5131 = vmatpush1.bf16.msra.mxu1 %v5130_v33  ;;  %v5164_v24 = vpack.c.bf16 %v243_v22, %v239_v21  ;;  %v242_v26 = vld [vmem:[#allocation3 + $0x130] sm:$0xff]  ;;  %v247_v27 = vld [vmem:[#allocation3 + $0x158] sm:$0xff]  ;;  %v449_v47 = vld [vmem:[#allocation6 + $0x28] sm:$0xff] }
  0x6f   :  { %5133 = vmatprep.subr.bf16.mxu1 %v5132_v36  ;;  %v251_v28 = vld [vmem:[#allocation3 + $0x178] sm:$0xff]  ;;  %v5166_v29 = vpack.c.bf16 %v242_v26, %v238_v25  ;;  %v246_v31 = vld [vmem:[#allocation3 + $0x150] sm:$0xff]  ;;  %v7047_v49 = vpack.c.bf16 %v449_v47, %v445_v46  ;;  %v444_v52 = vld [vmem:[#allocation6] sm:$0xff] }
  0x70   :  { %v5168_v30 = vpack.c.bf16 %v251_v28, %v247_v27  ;;  %v250_v32 = vld [vmem:[#allocation3 + $0x170] sm:$0xff]  ;;  %v255_v33 = vld [vmem:[#allocation3 + $0x198] sm:$0xff]  ;;  %v448_v53 = vld [vmem:[#allocation6 + $0x20] sm:$0xff] }
  0x71   :  { %v259_v34 = vld [vmem:[#allocation3 + $0x1b8] sm:$0xff]  ;;  %v5170_v35 = vpack.c.bf16 %v250_v32, %v246_v31  ;;  %v254_v37 = vld [vmem:[#allocation3 + $0x190] sm:$0xff]  ;;  %v453_v56 = vld [vmem:[#allocation6 + $0x48] sm:$0xff]  ;;  %v7053_v62 = vpack.c.bf16 %v448_v53, %v444_v52 }
  0x72   :  { %5135 = vmatpush1.bf16.msra.mxu1 %v5134_v39  ;;  %v5172_v36 = vpack.c.bf16 %v259_v34, %v255_v33  ;;  %v258_v38 = vld [vmem:[#allocation3 + $0x1b0] sm:$0xff]  ;;  %v263_v39 = vld [vmem:[#allocation3 + $0x1d8] sm:$0xff]  ;;  %v452_v0 = vld [vmem:[#allocation6 + $0x40] sm:$0xff] }
  0x73   :  { %5137 = vmatprep.subr.bf16.mxu1 %v5136_v42  ;;  %v267_v40 = vld [vmem:[#allocation3 + $0x1f8] sm:$0xff]  ;;  %v5174_v41 = vpack.c.bf16 %v258_v38, %v254_v37  ;;  %v262_v43 = vld [vmem:[#allocation3 + $0x1d0] sm:$0xff]  ;;  %v456_v1 = vld [vmem:[#allocation6 + $0x60] sm:$0xff] }
  0x74   :  { %v5176_v42 = vpack.c.bf16 %v267_v40, %v263_v39  ;;  %v266_v44 = vld [vmem:[#allocation3 + $0x1f0] sm:$0xff]  ;;  %v451_v50 = vld [vmem:[#allocation6 + $0x38] sm:$0xff]  ;;  %v461_v5 = vld [vmem:[#allocation6 + $0x88] sm:$0xff]  ;;  %v7069_v13 = vpack.c.bf16 %v456_v1, %v452_v0 }
  0x75   :  { %v450_v55 = vld [vmem:[#allocation6 + $0x30] sm:$0xff]  ;;  %v459_v61 = vld [vmem:[#allocation6 + $0x78] sm:$0xff]  ;;  %v465_v10 = vld [vmem:[#allocation6 + $0xa8] sm:$0xff] }
  0x76   :  { %5139 = vmatpush1.bf16.msra.mxu1 %v5138_v45  ;;  %v5178_v45 = vpack.c.bf16 %v266_v44, %v262_v43  ;;  %v460_v15 = vld [vmem:[#allocation6 + $0x80] sm:$0xff]  ;;  %v462_v19 = vld [vmem:[#allocation6 + $0x90] sm:$0xff]  ;;  %v469_v21 = vld [vmem:[#allocation6 + $0xc8] sm:$0xff] }
  0x77   :  { %5141 = vmatprep.subr.bf16.mxu1 %v5140_v48  ;;  %v447_v48 = vld [vmem:[#allocation6 + $0x18] sm:$0xff]  ;;  %v464_v16 = vld [vmem:[#allocation6 + $0xa0] sm:$0xff]  ;;  %v466_v20 = vld [vmem:[#allocation6 + $0xb0] sm:$0xff] }
  0x78   :  { %v473_v22 = vld [vmem:[#allocation6 + $0xe8] sm:$0xff]  ;;  %v7085_v25 = vpack.c.bf16 %v464_v16, %v460_v15  ;;  %v7087_v26 = vpack.c.bf16 %v466_v20, %v462_v19  ;;  %v468_v27 = vld [vmem:[#allocation6 + $0xc0] sm:$0xff]  ;;  %v470_v31 = vld [vmem:[#allocation6 + $0xd0] sm:$0xff] }
  0x79   :  { %v472_v28 = vld [vmem:[#allocation6 + $0xe0] sm:$0xff]  ;;  %v474_v32 = vld [vmem:[#allocation6 + $0xf0] sm:$0xff]  ;;  %v477_v33 = vld [vmem:[#allocation6 + $0x108] sm:$0xff] }
  0x7a   :  { %5143 = vmatpush1.bf16.msra.mxu1 %v5142_v51  ;;  %v7049_v51 = vpack.c.bf16 %v451_v50, %v447_v48  ;;  %v481_v34 = vld [vmem:[#allocation6 + $0x128] sm:$0xff]  ;;  %v7099_v37 = vpack.c.bf16 %v472_v28, %v468_v27  ;;  %v7101_v38 = vpack.c.bf16 %v474_v32, %v470_v31  ;;  %v476_v39 = vld [vmem:[#allocation6 + $0x100] sm:$0xff]  ;;  %v478_v43 = vld [vmem:[#allocation6 + $0x110] sm:$0xff] }
  0x7b   :  { %5145 = vmatprep.subr.bf16.mxu1 %v5144_v54  ;;  %v446_v54 = vld [vmem:[#allocation6 + $0x10] sm:$0xff]  ;;  %v480_v40 = vld [vmem:[#allocation6 + $0x120] sm:$0xff]  ;;  %v489_v46 = vld [vmem:[#allocation6 + $0x168] sm:$0xff] }
  0x7c   :  { %v482_v44 = vld [vmem:[#allocation6 + $0x130] sm:$0xff]  ;;  %v487_v47 = vld [vmem:[#allocation6 + $0x158] sm:$0xff]  ;;  %v7111_v50 = vpack.c.bf16 %v480_v40, %v476_v39  ;;  %v484_v53 = vld [vmem:[#allocation6 + $0x140] sm:$0xff]  ;;  %v7194_v40 = vshrl.u32 %v106_v58, 7 }
  0x7d   :  { %v491_v48 = vld [vmem:[#allocation6 + $0x178] sm:$0xff]  ;;  %v7113_v52 = vpack.c.bf16 %v482_v44, %v478_v43  ;;  %v497_v0 = vld [vmem:[#allocation6 + $0x1a8] sm:$0xff]  ;;  %v494_v16 = vld [vmem:[#allocation6 + $0x190] sm:$0xff] }
  0x7e   :  { %5147 = vmatpush1.bf16.msra.mxu1 %v5146_v57  ;;  %v457_v57 = vld [vmem:[#allocation6 + $0x68] sm:$0xff]  ;;  %v495_v1 = vld [vmem:[#allocation6 + $0x198] sm:$0xff]  ;;  %v498_v19 = vld [vmem:[#allocation6 + $0x1b0] sm:$0xff]  ;;  %8205 = vst [vmem:[#allocation19_spill] sm:$0xff] %v7194_v40  ;;  %v272_v43 = vsub.s32 0, %v7194_v40  ;;  %v8193_v44 = vsub.s32 2, %v7194_v40 }
  0x7f   :  { %5181 = vmatprep.subr.bf16.mxu1 %v7047_v49  ;;  %v501_v20 = vld [vmem:[#allocation6 + $0x1c8] sm:$0xff]  ;;  %v7137_v27 = vpack.c.bf16 %v498_v19, %v494_v16  ;;  %v500_v28 = vld [vmem:[#allocation6 + $0x1c0] sm:$0xff] }
  0xdc   :  { %v110_v60 = vpop.permute.xlu0 %109 }
  0xdd   :  { %vm114_vm1 = vcmp.eq.s32.totalorder %v7038_v59, %v110_v60  ;;  %v455_v60 = vld [vmem:[#allocation6 + $0x58] sm:$0xff] }
  0xde   :  { %v4784_v63 = vsel %vm114_vm1, 1.0, %v8196_v6  ;;  %v7063_v9 = vpack.c.bf16 %v459_v61, %v455_v60  ;;  %v490_v60 = vld [vmem:[#allocation6 + $0x170] sm:$0xff]  ;;  %v493_v61 = vld [vmem:[#allocation6 + $0x188] sm:$0xff] }
  0xdf   :  { %4935 = vmatprep.mubr.msk.f32.mxu0 %vm122_vm0, %v4784_v63  ;;  %v7055_v63 = vpack.c.bf16 %v450_v55, %v446_v54  ;;  %v488_v54 = vld [vmem:[#allocation6 + $0x160] sm:$0xff] }
  0xe0   :  { %v113_v2 = vpop.permute.xlu0 %112 }
  0xe1   :  { %vm115_vm2 = vcmp.eq.s32.totalorder %v7038_v59, %v113_v2 }
  0xe2   :  { %v4785_v8 = vsel %vm115_vm2, 1.0, %v8196_v6 }
  0xe3   :  { %4936 = vmatmul.mubr.msk.f32.vlgmr.msra.gmra.mrb[0].mxu0 %vm122_vm0, %v4785_v8  ;;  %v7061_v8 = vpack.c.bf16 %v457_v57, %v453_v56  ;;  %v7119_v56 = vpack.c.bf16 %v491_v48, %v487_v47  ;;  %v486_v57 = vld [vmem:[#allocation6 + $0x150] sm:$0xff]  ;;  %v8195_v48 = vsub.s32 1, %v7194_v40 }
  0xe4   :  { %5151 = vmatpush1.bf16.msra.mxu0 %v5150_v3  ;;  %431 = vmatprep.mubr.f32.mxu0 %v8196_v6  ;;  %v454_v3 = vld [vmem:[#allocation6 + $0x50] sm:$0xff] }
  0xe5   :  { %5153 = vmatprep.subr.bf16.mxu0 %v5152_v4  ;;  %v458_v4 = vld [vmem:[#allocation6 + $0x70] sm:$0xff] }
  0xe6   :  { %v7071_v14 = vpack.c.bf16 %v458_v4, %v454_v3  ;;  %v499_v3 = vld [vmem:[#allocation6 + $0x1b8] sm:$0xff]  ;;  %v7123_v4 = vpack.c.bf16 %v488_v54, %v484_v53  ;;  %v8194_v53 = vsub.s32 3, %v7194_v40 }
  0xe7   :  { %v7131_v15 = vpack.c.bf16 %v499_v3, %v495_v1 }
  0xe8   :  { %5155 = vmatpush1.bf16.msra.mxu0 %v5154_v11  ;;  %v463_v11 = vld [vmem:[#allocation6 + $0x98] sm:$0xff] }
  0xe9   :  { %5157 = vmatprep.subr.bf16.mxu0 %v5156_v12  ;;  %v467_v12 = vld [vmem:[#allocation6 + $0xb8] sm:$0xff] }
  0xec   :  { %5159 = vmatpush1.bf16.msra.mxu0 %v5158_v17  ;;  %v7075_v17 = vpack.c.bf16 %v465_v10, %v461_v5  ;;  %v7125_v5 = vpack.c.bf16 %v490_v60, %v486_v57  ;;  %v492_v10 = vld [vmem:[#allocation6 + $0x180] sm:$0xff] }
  0xed   :  { %5161 = vmatprep.subr.bf16.mxu0 %v5160_v18  ;;  %v7077_v18 = vpack.c.bf16 %v467_v12, %v463_v11  ;;  %v496_v11 = vld [vmem:[#allocation6 + $0x1a0] sm:$0xff]  ;;  %v7129_v12 = vpack.c.bf16 %v497_v0, %v493_v61 }
  0xf0   :  { %5163 = vmatpush1.bf16.msra.mxu0 %v5162_v23  ;;  %v471_v23 = vld [vmem:[#allocation6 + $0xd8] sm:$0xff] }
  0xf1   :  { %5165 = vmatprep.subr.bf16.mxu0 %v5164_v24  ;;  %v475_v24 = vld [vmem:[#allocation6 + $0xf8] sm:$0xff] }
  0xf4   :  { %5167 = vmatpush1.bf16.msra.mxu0 %v5166_v29  ;;  %v7091_v29 = vpack.c.bf16 %v473_v22, %v469_v21  ;;  %v505_v21 = vld [vmem:[#allocation6 + $0x1e8] sm:$0xff]  ;;  %v503_v22 = vld [vmem:[#allocation6 + $0x1d8] sm:$0xff] }
  0xf5   :  { %5169 = vmatprep.subr.bf16.mxu0 %v5168_v30  ;;  %v7093_v30 = vpack.c.bf16 %v475_v24, %v471_v23  ;;  %v507_v23 = vld [vmem:[#allocation6 + $0x1f8] sm:$0xff]  ;;  %v7135_v24 = vpack.c.bf16 %v496_v11, %v492_v10  ;;  %v7141_v31 = vpack.c.bf16 %v505_v21, %v501_v20 }
  0xf6   :  { %v7143_v32 = vpack.c.bf16 %v507_v23, %v503_v22 }
  0xf8   :  { %5171 = vmatpush1.bf16.msra.mxu0 %v5170_v35  ;;  %v479_v35 = vld [vmem:[#allocation6 + $0x118] sm:$0xff] }
  0xf9   :  { %5173 = vmatprep.subr.bf16.mxu0 %v5172_v36  ;;  %v483_v36 = vld [vmem:[#allocation6 + $0x138] sm:$0xff] }
  0xfc   :  { %5175 = vmatpush1.bf16.msra.mxu0 %v5174_v41  ;;  %v7105_v41 = vpack.c.bf16 %v481_v34, %v477_v33  ;;  %v504_v33 = vld [vmem:[#allocation6 + $0x1e0] sm:$0xff]  ;;  %v502_v34 = vld [vmem:[#allocation6 + $0x1d0] sm:$0xff] }
  0xfd   :  { %5177 = vmatprep.subr.bf16.mxu0 %v5176_v42  ;;  %v7107_v42 = vpack.c.bf16 %v483_v36, %v479_v35  ;;  %v506_v35 = vld [vmem:[#allocation6 + $0x1f0] sm:$0xff]  ;;  %v7147_v36 = vpack.c.bf16 %v504_v33, %v500_v28 }
  0xfe   :  { %v7149_v39 = vpack.c.bf16 %v506_v35, %v502_v34 }
 0x100   :  { %5179 = vmatpush1.bf16.msra.mxu0 %v5178_v45  ;;  %v485_v45 = vld [vmem:[#allocation6 + $0x148] sm:$0xff] }
 0x101   :  { %5213 = vmatprep.subr.bf16.mxu0 %v7049_v51  ;;  %v7117_v55 = vpack.c.bf16 %v489_v46, %v485_v45  ;;  %v268_v45 = vld [vmem:[%s8186_s4] sm:$0xf] }
 0x102   :  { %v273_v58 = vrot.slane %v268_v45, %v272_v43  ;;  %v281_v60 = vrot.slane %v268_v45, %v8193_v44  ;;  %v277_v61 = vrot.slane %v268_v45, %v8195_v48  ;;  %v285_v0 = vrot.slane %v268_v45, %v8194_v53 }
 0x1b6   :  { %v7057_v2 = vpop.f32.mrb[0].mxu0 }
 0x1b7   :  { %8204 = vst [vmem:[#allocation18_spill] sm:$0xff] %v7057_v2  ;;  %v7059_v7 = vpop.f32.mrb[1].mxu0 }
 0x1b8   :  { %355 = vmatmul.mubr.f32.vlgmr.msra.gmra.mrb[0].mxu1 %v7059_v7  ;;  %432 = vmatmul.mubr.f32.vlgmr.msra.gmra.mrb[2].mxu0 %v7059_v7 }
 0x1b9   :  { %5183 = vmatpush1.bf16.msra.mxu1 %v7053_v62  ;;  %5215 = vmatpush1.bf16.msra.mxu0 %v7055_v63 }
 0x1ba   :  { %360 = vmatprep.mubr.f32.mxu1 %v8196_v6  ;;  %437 = vmatprep.mubr.f32.mxu0 %v8196_v6 }
 0x1bb   :  { %5185 = vmatprep.subr.bf16.mxu1 %v7061_v8  ;;  %5217 = vmatprep.subr.bf16.mxu0 %v7063_v9 }
 0x1bc   :  { %361 = vmatmul.mubr.f32.gmra.mrb[2].mxu1 %v7057_v2  ;;  %438 = vmatmul.mubr.f32.gmra.mrb[4].mxu0 %v7057_v2 }
 0x1bd   :  { %5187 = vmatpush1.bf16.msra.mxu1 %v7069_v13  ;;  %5219 = vmatpush1.bf16.msra.mxu0 %v7071_v14 }
 0x1be   :  { %5189 = vmatprep.subr.bf16.mxu1 %v7075_v17  ;;  %5221 = vmatprep.subr.bf16.mxu0 %v7077_v18 }
 0x1bf   :  { %572 = vmatprep.mubr.f32.mxu1 %v8196_v6  ;;  %643 = vmatprep.mubr.f32.mxu0 %v8196_v6 }
 0x1c1   :  { %5191 = vmatpush1.bf16.msra.mxu1 %v7085_v25  ;;  %5223 = vmatpush1.bf16.msra.mxu0 %v7087_v26 }
 0x1c2   :  { %5193 = vmatprep.subr.bf16.mxu1 %v7091_v29  ;;  %5225 = vmatprep.subr.bf16.mxu0 %v7093_v30 }
 0x1c5   :  { %5195 = vmatpush1.bf16.msra.mxu1 %v7099_v37  ;;  %5227 = vmatpush1.bf16.msra.mxu0 %v7101_v38 }
 0x1c6   :  { %5197 = vmatprep.subr.bf16.mxu1 %v7105_v41  ;;  %5229 = vmatprep.subr.bf16.mxu0 %v7107_v42 }
 0x1c9   :  { %5199 = vmatpush1.bf16.msra.mxu1 %v7111_v50  ;;  %5231 = vmatpush1.bf16.msra.mxu0 %v7113_v52 }
 0x1ca   :  { %5201 = vmatprep.subr.bf16.mxu1 %v7117_v55  ;;  %5233 = vmatprep.subr.bf16.mxu0 %v7119_v56 }
 0x1cd   :  { %5203 = vmatpush1.bf16.msra.mxu1 %v7123_v4  ;;  %5235 = vmatpush1.bf16.msra.mxu0 %v7125_v5 }
 0x1ce   :  { %5205 = vmatprep.subr.bf16.mxu1 %v7129_v12  ;;  %5237 = vmatprep.subr.bf16.mxu0 %v7131_v15 }
 0x1d1   :  { %5207 = vmatpush1.bf16.msra.mxu1 %v7135_v24  ;;  %5239 = vmatpush1.bf16.msra.mxu0 %v7137_v27 }
 0x1d2   :  { %5209 = vmatprep.subr.bf16.mxu1 %v7141_v31  ;;  %5241 = vmatprep.subr.bf16.mxu0 %v7143_v32 }
 0x1d5   :  { %5211 = vmatpush1.bf16.msra.mxu1 %v7147_v36  ;;  %5243 = vmatpush1.bf16.msra.mxu0 %v7149_v39 }
 0x1d6   :  { %5245 = vmatprep.subr.bf16.mxu1 %v7047_v49  ;;  %5277 = vmatprep.subr.bf16.mxu0 %v7049_v51 }
 0x1d8   :  { %573 = vmatmul.mubr.f32.vlgmr.msra.gmra.mrb[4].mxu1 %v8196_v6  ;;  %644 = vmatmul.mubr.f32.vlgmr.msra.gmra.mrb[6].mxu0 %v8196_v6 }
 0x1d9   :  { %5247 = vmatpush1.bf16.msra.mxu1 %v7053_v62  ;;  %5279 = vmatpush1.bf16.msra.mxu0 %v7055_v63 }
 0x1da   :  { %5249 = vmatprep.subr.bf16.mxu1 %v7061_v8  ;;  %5281 = vmatprep.subr.bf16.mxu0 %v7063_v9 }
 0x1db   :  { %743 = vmatprep.mubr.f32.mxu1 %v8196_v6  ;;  %814 = vmatprep.mubr.f32.mxu0 %v8196_v6 }
 0x1dd   :  { %5251 = vmatpush1.bf16.msra.mxu1 %v7069_v13  ;;  %5283 = vmatpush1.bf16.msra.mxu0 %v7071_v14 }
 0x1de   :  { %5253 = vmatprep.subr.bf16.mxu1 %v7075_v17  ;;  %5285 = vmatprep.subr.bf16.mxu0 %v7077_v18 }
 0x1e1   :  { %5255 = vmatpush1.bf16.msra.mxu1 %v7085_v25  ;;  %5287 = vmatpush1.bf16.msra.mxu0 %v7087_v26 }
 0x1e2   :  { %5257 = vmatprep.subr.bf16.mxu1 %v7091_v29  ;;  %5289 = vmatprep.subr.bf16.mxu0 %v7093_v30 }
 0x1e5   :  { %5259 = vmatpush1.bf16.msra.mxu1 %v7099_v37  ;;  %5291 = vmatpush1.bf16.msra.mxu0 %v7101_v38 }
 0x1e6   :  { %5261 = vmatprep.subr.bf16.mxu1 %v7105_v41  ;;  %5293 = vmatprep.subr.bf16.mxu0 %v7107_v42 }
 0x1e9   :  { %5263 = vmatpush1.bf16.msra.mxu1 %v7111_v50  ;;  %5295 = vmatpush1.bf16.msra.mxu0 %v7113_v52 }
 0x1ea   :  { %5265 = vmatprep.subr.bf16.mxu1 %v7117_v55  ;;  %5297 = vmatprep.subr.bf16.mxu0 %v7119_v56 }
 0x1ed   :  { %5267 = vmatpush1.bf16.msra.mxu1 %v7123_v4  ;;  %5299 = vmatpush1.bf16.msra.mxu0 %v7125_v5 }
 0x1ee   :  { %5269 = vmatprep.subr.bf16.mxu1 %v7129_v12  ;;  %5301 = vmatprep.subr.bf16.mxu0 %v7131_v15 }
 0x1f1   :  { %5271 = vmatpush1.bf16.msra.mxu1 %v7135_v24  ;;  %5303 = vmatpush1.bf16.msra.mxu0 %v7137_v27 }
 0x1f2   :  { %5273 = vmatprep.subr.bf16.mxu1 %v7141_v31  ;;  %5305 = vmatprep.subr.bf16.mxu0 %v7143_v32 }
 0x1f5   :  { %5275 = vmatpush1.bf16.msra.mxu1 %v7147_v36  ;;  %5307 = vmatpush1.bf16.msra.mxu0 %v7149_v39 }
 0x1f6   :  { %5309 = vmatprep.subr.bf16.mxu1 %v7047_v49  ;;  %5341 = vmatprep.subr.bf16.mxu0 %v7049_v51 }
 0x28b   :  { %v356_v46 = vpop.f32.mrb[0].mxu1  ;;  %v433_v47 = vpop.f32.mrb[2].mxu0 }
 0x28c   :  { %v358_v54 = vpop.f32.mrb[1].mxu1  ;;  %v435_v57 = vpop.f32.mrb[3].mxu0  ;;  %v7219_v22 = vadd.f32 %v356_v46, %v273_v58  ;;  %v7228_v46 = vadd.f32 %v433_v47, %v281_v60 }
 0x28d   :  { %v7221_v23 = vadd.f32 %v358_v54, %v277_v61  ;;  %v7225_v53 = vadd.f32 %v435_v57, %v285_v0 }
 0x28f   :  { %v362_v1 = vpop.f32.mrb[2].mxu1  ;;  %v439_v3 = vpop.f32.mrb[4].mxu0 }
 0x290   :  { %v7211_v10 = vadd.f32 %v362_v1, %v273_v58  ;;  %v7213_v11 = vadd.f32 %v439_v3, %v281_v60  ;;  %v364_v16 = vpop.f32.mrb[3].mxu1  ;;  %v441_v19 = vpop.f32.mrb[5].mxu0 }
 0x291   :  { %v7215_v20 = vadd.f32 %v364_v16, %v277_v61  ;;  %v7217_v21 = vadd.f32 %v441_v19, %v285_v0 }
 0x2ab   :  { %v574_v28 = vpop.f32.mrb[4].mxu1  ;;  %v645_v33 = vpop.f32.mrb[6].mxu0 }
 0x2ac   :  { %v650_v34 = vadd.f32 %v574_v28, %v7219_v22  ;;  %v576_v35 = vpop.f32.mrb[5].mxu1  ;;  %v647_v45 = vpop.f32.mrb[7].mxu0  ;;  %v652_v58 = vadd.f32 %v645_v33, %v7228_v46 }
 0x2ad   :  { %v651_v1 = vadd.f32 %v576_v35, %v7221_v23  ;;  %v653_v16 = vadd.f32 %v647_v45, %v7225_v53 }
 0x2ae   :  { %v4788_v3 = vmul.f32 -1.442695, %v650_v34 }
 0x2af   :  { %v4789_v44 = vmul.f32 -1.442695, %v651_v1  ;;  %v4790_v54 = vmul.f32 -1.442695, %v653_v16 }
 0x2b0   :  { %6451 = vpow2.f32 %v4788_v3 }
 0x2b1   :  { %6453 = vpow2.f32 %v4789_v44 }
 0x2b2   :  { %6455 = vpow2.f32 %v4790_v54 }
 0x2b3   :  { %6457 = vtanh.f32 %v652_v58 }
 0x2ba   :  { %v6452_v61 = vpop.eup %6451 }
 0x2bb   :  { %v6454_v19 = vpop.eup %6453  ;;  %v657_v28 = vadd.f32 1.0, %v6452_v61 }
 0x2bc   :  { %v663_v48 = vadd.f32 1.0, %v6454_v19  ;;  %v6456_v34 = vpop.eup %6455 }
 0x2bd   :  { %6459 = vrcp.f32 %v657_v28  ;;  %v6458_v35 = vpop.eup %6457  ;;  %v670_v1 = vadd.f32 1.0, %v6456_v34 }
 0x2be   :  { %6461 = vrcp.f32 %v663_v48 }
 0x2bf   :  { %6463 = vrcp.f32 %v670_v1 }
 0x2c7   :  { %v6460_v57 = vpop.eup %6459 }
 0x2c8   :  { %v6462_v0 = vpop.eup %6461  ;;  %v674_v44 = vmul.f32 %v6460_v57, %v6458_v35 }
 0x2c9   :  { %v673_v45 = vmul.f32 0.0, %v6462_v0  ;;  %v6464_v60 = vpop.eup %6463 }
 0x2cb   :  { %v7231_v47 = vadd.f32 %v674_v44, %v673_v45 }
 0x2cd   :  { %6465 = vtanh.f32 %v7231_v47 }
 0x2d7   :  { %v6466_v33 = vpop.eup %6465 }
 0x2d8   :  { %v677_v3 = vmul.f32 %v6466_v33, %v6464_v60 }
 0x2da   :  { %678 = vst [vmem:[#allocation2] sm:$0x3] %v677_v3  ;;  %744 = vmatmul.mubr.f32.vlgmr.msra.gmra.mrb[6].mxu1 %v677_v3  ;;  %815 = vmatmul.mubr.f32.vlgmr.msra.gmra.mrb[8].mxu0 %v677_v3 }
 0x2db   :  { %5311 = vmatpush1.bf16.msra.mxu1 %v7053_v62  ;;  %5343 = vmatpush1.bf16.msra.mxu0 %v7055_v63 }
 0x2dc   :  { %5313 = vmatprep.subr.bf16.mxu1 %v7061_v8  ;;  %5345 = vmatprep.subr.bf16.mxu0 %v7063_v9 }
 0x2dd   :  { %932 = vmatprep.mubr.f32.mxu1 %v8196_v6  ;;  %1003 = vmatprep.mubr.f32.mxu0 %v8196_v6 }
 0x2df   :  { %5315 = vmatpush1.bf16.msra.mxu1 %v7069_v13  ;;  %5347 = vmatpush1.bf16.msra.mxu0 %v7071_v14 }
 0x2e0   :  { %5317 = vmatprep.subr.bf16.mxu1 %v7075_v17  ;;  %5349 = vmatprep.subr.bf16.mxu0 %v7077_v18 }
 0x2e3   :  { %5319 = vmatpush1.bf16.msra.mxu1 %v7085_v25  ;;  %5351 = vmatpush1.bf16.msra.mxu0 %v7087_v26 }
 0x2e4   :  { %5321 = vmatprep.subr.bf16.mxu1 %v7091_v29  ;;  %5353 = vmatprep.subr.bf16.mxu0 %v7093_v30 }
 0x2e7   :  { %5323 = vmatpush1.bf16.msra.mxu1 %v7099_v37  ;;  %5355 = vmatpush1.bf16.msra.mxu0 %v7101_v38 }
 0x2e8   :  { %5325 = vmatprep.subr.bf16.mxu1 %v7105_v41  ;;  %5357 = vmatprep.subr.bf16.mxu0 %v7107_v42 }
 0x2eb   :  { %5327 = vmatpush1.bf16.msra.mxu1 %v7111_v50  ;;  %5359 = vmatpush1.bf16.msra.mxu0 %v7113_v52 }
 0x2ec   :  { %5329 = vmatprep.subr.bf16.mxu1 %v7117_v55  ;;  %5361 = vmatprep.subr.bf16.mxu0 %v7119_v56 }
 0x2ef   :  { %5331 = vmatpush1.bf16.msra.mxu1 %v7123_v4  ;;  %5363 = vmatpush1.bf16.msra.mxu0 %v7125_v5 }
 0x2f0   :  { %5333 = vmatprep.subr.bf16.mxu1 %v7129_v12  ;;  %5365 = vmatprep.subr.bf16.mxu0 %v7131_v15 }
 0x2f3   :  { %5335 = vmatpush1.bf16.msra.mxu1 %v7135_v24  ;;  %5367 = vmatpush1.bf16.msra.mxu0 %v7137_v27 }
 0x2f4   :  { %5337 = vmatprep.subr.bf16.mxu1 %v7141_v31  ;;  %5369 = vmatprep.subr.bf16.mxu0 %v7143_v32 }
 0x2f7   :  { %5339 = vmatpush1.bf16.msra.mxu1 %v7147_v36  ;;  %5371 = vmatpush1.bf16.msra.mxu0 %v7149_v39 }
 0x2f8   :  { %5373 = vmatprep.subr.bf16.mxu1 %v7047_v49  ;;  %5405 = vmatprep.subr.bf16.mxu0 %v7049_v51 }
 0x3ad   :  { %v745_v48 = vpop.f32.mrb[6].mxu1  ;;  %v816_v16 = vpop.f32.mrb[8].mxu0 }
 0x3ae   :  { %v825_v54 = vrot.slane %v745_v48, 6  ;;  %v747_v58 = vpop.f32.mrb[7].mxu1  ;;  %v818_v61 = vpop.f32.mrb[9].mxu0  ;;  %v827_v1 = vrot.slane %v816_v16, 6 }
 0x3af   :  { %v826_v19 = vrot.slane %v747_v58, 6  ;;  %v828_v0 = vrot.slane %v818_v61, 6  ;;  %v857_v61 = vrot.slane %v7231_v47, 6 }
 0x3b0   :  { %v833_v28 = vadd.f32 %v825_v54, %v7219_v22  ;;  %v835_v60 = vadd.f32 %v827_v1, %v7228_v46 }
 0x3b1   :  { %v834_v34 = vadd.f32 %v826_v19, %v7221_v23  ;;  %v836_v44 = vadd.f32 %v828_v0, %v7225_v53 }
 0x3b2   :  { %v4791_v35 = vmul.f32 -1.442695, %v833_v28 }
 0x3b3   :  { %v4792_v57 = vmul.f32 -1.442695, %v834_v34  ;;  %v4793_v45 = vmul.f32 -1.442695, %v836_v44 }
 0x3b4   :  { %6467 = vpow2.f32 %v4791_v35 }
 0x3b5   :  { %6469 = vpow2.f32 %v4792_v57 }
 0x3b6   :  { %6471 = vpow2.f32 %v4793_v45 }
 0x3b7   :  { %6473 = vtanh.f32 %v835_v60 }
 0x3be   :  { %v6468_v33 = vpop.eup %6467 }
 0x3bf   :  { %v6470_v3 = vpop.eup %6469  ;;  %v840_v48 = vadd.f32 1.0, %v6468_v33 }
 0x3c0   :  { %v846_v58 = vadd.f32 1.0, %v6470_v3  ;;  %v6472_v54 = vpop.eup %6471 }
 0x3c1   :  { %6475 = vrcp.f32 %v840_v48  ;;  %v6474_v19 = vpop.eup %6473  ;;  %v853_v57 = vadd.f32 1.0, %v6472_v54 }
 0x3c2   :  { %6477 = vrcp.f32 %v846_v58 }
 0x3c3   :  { %6479 = vrcp.f32 %v853_v57 }
 0x3cb   :  { %v6476_v28 = vpop.eup %6475 }
 0x3cc   :  { %v6478_v34 = vpop.eup %6477  ;;  %v860_v35 = vmul.f32 %v6476_v28, %v6474_v19 }
 0x3cd   :  { %v859_v16 = vmul.f32 %v6478_v34, %v857_v61  ;;  %v6480_v44 = vpop.eup %6479 }
 0x3cf   :  { %v7273_v0 = vadd.f32 %v860_v35, %v859_v16 }
 0x3d1   :  { %6481 = vtanh.f32 %v7273_v0 }
 0x3db   :  { %v6482_v1 = vpop.eup %6481 }
 0x3dc   :  { %v863_v45 = vmul.f32 %v6482_v1, %v6480_v44 }
 0x3de   :  { %864 = vst [vmem:[#allocation2] sm:$0xc] %v863_v45  ;;  %v866_v60 = vrot.slane %v863_v45, 2 }
 0x3e0   :  { %933 = vmatmul.mubr.f32.vlgmr.msra.gmra.mrb[8].mxu1 %v866_v60  ;;  %1004 = vmatmul.mubr.f32.vlgmr.msra.gmra.mrb[10].mxu0 %v866_v60 }
 0x3e1   :  { %5375 = vmatpush1.bf16.msra.mxu1 %v7053_v62  ;;  %5407 = vmatpush1.bf16.msra.mxu0 %v7055_v63 }
 0x3e2   :  { %5377 = vmatprep.subr.bf16.mxu1 %v7061_v8  ;;  %5409 = vmatprep.subr.bf16.mxu0 %v7063_v9 }
 0x3e3   :  { %1121 = vmatprep.mubr.f32.mxu1 %v8196_v6  ;;  %1192 = vmatprep.mubr.f32.mxu0 %v8196_v6 }
 0x3e5   :  { %5379 = vmatpush1.bf16.msra.mxu1 %v7069_v13  ;;  %5411 = vmatpush1.bf16.msra.mxu0 %v7071_v14 }
 0x3e6   :  { %5381 = vmatprep.subr.bf16.mxu1 %v7075_v17  ;;  %5413 = vmatprep.subr.bf16.mxu0 %v7077_v18 }
 0x3e9   :  { %5383 = vmatpush1.bf16.msra.mxu1 %v7085_v25  ;;  %5415 = vmatpush1.bf16.msra.mxu0 %v7087_v26 }
 0x3ea   :  { %5385 = vmatprep.subr.bf16.mxu1 %v7091_v29  ;;  %5417 = vmatprep.subr.bf16.mxu0 %v7093_v30 }
 0x3ed   :  { %5387 = vmatpush1.bf16.msra.mxu1 %v7099_v37  ;;  %5419 = vmatpush1.bf16.msra.mxu0 %v7101_v38 }
 0x3ee   :  { %5389 = vmatprep.subr.bf16.mxu1 %v7105_v41  ;;  %5421 = vmatprep.subr.bf16.mxu0 %v7107_v42 }
 0x3f1   :  { %5391 = vmatpush1.bf16.msra.mxu1 %v7111_v50  ;;  %5423 = vmatpush1.bf16.msra.mxu0 %v7113_v52 }
 0x3f2   :  { %5393 = vmatprep.subr.bf16.mxu1 %v7117_v55  ;;  %5425 = vmatprep.subr.bf16.mxu0 %v7119_v56 }
 0x3f5   :  { %5395 = vmatpush1.bf16.msra.mxu1 %v7123_v4  ;;  %5427 = vmatpush1.bf16.msra.mxu0 %v7125_v5 }
 0x3f6   :  { %5397 = vmatprep.subr.bf16.mxu1 %v7129_v12  ;;  %5429 = vmatprep.subr.bf16.mxu0 %v7131_v15 }
 0x3f9   :  { %5399 = vmatpush1.bf16.msra.mxu1 %v7135_v24  ;;  %5431 = vmatpush1.bf16.msra.mxu0 %v7137_v27 }
 0x3fa   :  { %5401 = vmatprep.subr.bf16.mxu1 %v7141_v31  ;;  %5433 = vmatprep.subr.bf16.mxu0 %v7143_v32 }
 0x3fd   :  { %5403 = vmatpush1.bf16.msra.mxu1 %v7147_v36  ;;  %5435 = vmatpush1.bf16.msra.mxu0 %v7149_v39 }
 0x3fe   :  { %5437 = vmatprep.subr.bf16.mxu1 %v7047_v49  ;;  %5469 = vmatprep.subr.bf16.mxu0 %v7049_v51 }
 0x4b3   :  { %v934_v47 = vpop.f32.mrb[8].mxu1  ;;  %v1005_v33 = vpop.f32.mrb[10].mxu0 }
 0x4b4   :  { %v1014_v3 = vrot.slane %v934_v47, 4  ;;  %v936_v48 = vpop.f32.mrb[9].mxu1  ;;  %v1007_v58 = vpop.f32.mrb[11].mxu0  ;;  %v1016_v16 = vrot.slane %v1005_v33, 4 }
 0x4b5   :  { %v1015_v54 = vrot.slane %v936_v48, 4  ;;  %v1017_v35 = vrot.slane %v1007_v58, 4  ;;  %v1046_v58 = vrot.slane %v7273_v0, 6 }
 0x4b6   :  { %v1022_v19 = vadd.f32 %v1014_v3, %v7219_v22  ;;  %v1024_v1 = vadd.f32 %v1016_v16, %v7228_v46 }
 0x4b7   :  { %v1023_v28 = vadd.f32 %v1015_v54, %v7221_v23  ;;  %v1025_v57 = vadd.f32 %v1017_v35, %v7225_v53 }
 0x4b8   :  { %v4794_v61 = vmul.f32 -1.442695, %v1022_v19 }
 0x4b9   :  { %v4795_v34 = vmul.f32 -1.442695, %v1023_v28  ;;  %v4796_v44 = vmul.f32 -1.442695, %v1025_v57 }
 0x4ba   :  { %6483 = vpow2.f32 %v4794_v61 }
 0x4bb   :  { %6485 = vpow2.f32 %v4795_v34 }
 0x4bc   :  { %6487 = vpow2.f32 %v4796_v44 }
 0x4bd   :  { %6489 = vtanh.f32 %v1024_v1 }
 0x4c4   :  { %v6484_v45 = vpop.eup %6483 }
 0x4c5   :  { %v6486_v60 = vpop.eup %6485  ;;  %v1029_v47 = vadd.f32 1.0, %v6484_v45 }
 0x4c6   :  { %v1035_v48 = vadd.f32 1.0, %v6486_v60  ;;  %v6488_v3 = vpop.eup %6487 }
 0x4c7   :  { %6491 = vrcp.f32 %v1029_v47  ;;  %v6490_v54 = vpop.eup %6489  ;;  %v1042_v34 = vadd.f32 1.0, %v6488_v3 }
 0x4c8   :  { %6493 = vrcp.f32 %v1035_v48 }
 0x4c9   :  { %6495 = vrcp.f32 %v1042_v34 }
 0x4d1   :  { %v6492_v19 = vpop.eup %6491 }
 0x4d2   :  { %v6494_v28 = vpop.eup %6493  ;;  %v1049_v61 = vmul.f32 %v6492_v19, %v6490_v54 }
 0x4d3   :  { %v1048_v33 = vmul.f32 %v6494_v28, %v1046_v58  ;;  %v6496_v57 = vpop.eup %6495 }
 0x4d5   :  { %v7315_v35 = vadd.f32 %v1049_v61, %v1048_v33 }
 0x4d7   :  { %6497 = vtanh.f32 %v7315_v35 }
 0x4e1   :  { %v6498_v16 = vpop.eup %6497 }
 0x4e2   :  { %v1052_v44 = vmul.f32 %v6498_v16, %v6496_v57 }
 0x4e4   :  { %1053 = vst [vmem:[#allocation2] sm:$0x30] %v1052_v44  ;;  %v1055_v1 = vrot.slane %v1052_v44, 4 }
 0x4e6   :  { %1122 = vmatmul.mubr.f32.vlgmr.msra.gmra.mrb[10].mxu1 %v1055_v1  ;;  %1193 = vmatmul.mubr.f32.vlgmr.msra.gmra.mrb[12].mxu0 %v1055_v1 }
 0x4e7   :  { %5439 = vmatpush1.bf16.msra.mxu1 %v7053_v62  ;;  %5471 = vmatpush1.bf16.msra.mxu0 %v7055_v63 }
 0x4e8   :  { %5441 = vmatprep.subr.bf16.mxu1 %v7061_v8  ;;  %5473 = vmatprep.subr.bf16.mxu0 %v7063_v9 }
 0x4e9   :  { %1310 = vmatprep.mubr.f32.mxu1 %v8196_v6  ;;  %1381 = vmatprep.mubr.f32.mxu0 %v8196_v6 }
 0x4eb   :  { %5443 = vmatpush1.bf16.msra.mxu1 %v7069_v13  ;;  %5475 = vmatpush1.bf16.msra.mxu0 %v7071_v14 }
 0x4ec   :  { %5445 = vmatprep.subr.bf16.mxu1 %v7075_v17  ;;  %5477 = vmatprep.subr.bf16.mxu0 %v7077_v18 }
 0x4ef   :  { %5447 = vmatpush1.bf16.msra.mxu1 %v7085_v25  ;;  %5479 = vmatpush1.bf16.msra.mxu0 %v7087_v26 }
 0x4f0   :  { %5449 = vmatprep.subr.bf16.mxu1 %v7091_v29  ;;  %5481 = vmatprep.subr.bf16.mxu0 %v7093_v30 }
 0x4f3   :  { %5451 = vmatpush1.bf16.msra.mxu1 %v7099_v37  ;;  %5483 = vmatpush1.bf16.msra.mxu0 %v7101_v38 }
 0x4f4   :  { %5453 = vmatprep.subr.bf16.mxu1 %v7105_v41  ;;  %5485 = vmatprep.subr.bf16.mxu0 %v7107_v42 }
 0x4f7   :  { %5455 = vmatpush1.bf16.msra.mxu1 %v7111_v50  ;;  %5487 = vmatpush1.bf16.msra.mxu0 %v7113_v52 }
 0x4f8   :  { %5457 = vmatprep.subr.bf16.mxu1 %v7117_v55  ;;  %5489 = vmatprep.subr.bf16.mxu0 %v7119_v56 }
 0x4fb   :  { %5459 = vmatpush1.bf16.msra.mxu1 %v7123_v4  ;;  %5491 = vmatpush1.bf16.msra.mxu0 %v7125_v5 }
 0x4fc   :  { %5461 = vmatprep.subr.bf16.mxu1 %v7129_v12  ;;  %5493 = vmatprep.subr.bf16.mxu0 %v7131_v15 }
 0x4ff   :  { %5463 = vmatpush1.bf16.msra.mxu1 %v7135_v24  ;;  %5495 = vmatpush1.bf16.msra.mxu0 %v7137_v27 }
 0x500   :  { %5465 = vmatprep.subr.bf16.mxu1 %v7141_v31  ;;  %5497 = vmatprep.subr.bf16.mxu0 %v7143_v32 }
 0x503   :  { %5467 = vmatpush1.bf16.msra.mxu1 %v7147_v36  ;;  %5499 = vmatpush1.bf16.msra.mxu0 %v7149_v39 }
 0x504   :  { %5501 = vmatprep.subr.bf16.mxu1 %v7047_v49  ;;  %5533 = vmatprep.subr.bf16.mxu0 %v7049_v51 }
 0x5b9   :  { %v1123_v0 = vpop.f32.mrb[10].mxu1  ;;  %v1194_v45 = vpop.f32.mrb[12].mxu0 }
 0x5ba   :  { %v1203_v60 = vrot.slane %v1123_v0, 2  ;;  %v1125_v47 = vpop.f32.mrb[11].mxu1  ;;  %v1196_v48 = vpop.f32.mrb[13].mxu0  ;;  %v1205_v33 = vrot.slane %v1194_v45, 2 }
 0x5bb   :  { %v1204_v3 = vrot.slane %v1125_v47, 2  ;;  %v1206_v61 = vrot.slane %v1196_v48, 2  ;;  %v1235_v48 = vrot.slane %v7315_v35, 6 }
 0x5bc   :  { %v1211_v54 = vadd.f32 %v1203_v60, %v7219_v22  ;;  %v1213_v16 = vadd.f32 %v1205_v33, %v7228_v46 }
 0x5bd   :  { %v1212_v19 = vadd.f32 %v1204_v3, %v7221_v23  ;;  %v1214_v34 = vadd.f32 %v1206_v61, %v7225_v53 }
 0x5be   :  { %v4797_v58 = vmul.f32 -1.442695, %v1211_v54 }
 0x5bf   :  { %v4798_v28 = vmul.f32 -1.442695, %v1212_v19  ;;  %v4799_v57 = vmul.f32 -1.442695, %v1214_v34 }
 0x5c0   :  { %6499 = vpow2.f32 %v4797_v58 }
 0x5c1   :  { %6501 = vpow2.f32 %v4798_v28 }
 0x5c2   :  { %6503 = vpow2.f32 %v4799_v57 }
 0x5c3   :  { %6505 = vtanh.f32 %v1213_v16 }
 0x5ca   :  { %v6500_v44 = vpop.eup %6499 }
 0x5cb   :  { %v6502_v1 = vpop.eup %6501  ;;  %v1218_v0 = vadd.f32 1.0, %v6500_v44 }
 0x5cc   :  { %v1224_v47 = vadd.f32 1.0, %v6502_v1  ;;  %v6504_v22 = vpop.eup %6503 }
 0x5cd   :  { %6507 = vrcp.f32 %v1218_v0  ;;  %v6506_v23 = vpop.eup %6505  ;;  %v1231_v53 = vadd.f32 1.0, %v6504_v22 }
 0x5ce   :  { %6509 = vrcp.f32 %v1224_v47 }
 0x5cf   :  { %6511 = vrcp.f32 %v1231_v53 }
 0x5d7   :  { %v6508_v60 = vpop.eup %6507 }
 0x5d8   :  { %v6510_v3 = vpop.eup %6509  ;;  %v1238_v54 = vmul.f32 %v6508_v60, %v6506_v23 }
 0x5d9   :  { %v1237_v45 = vmul.f32 %v6510_v3, %v1235_v48  ;;  %v6512_v46 = vpop.eup %6511 }
 0x5db   :  { %v7357_v19 = vadd.f32 %v1238_v54, %v1237_v45 }
 0x5dd   :  { %6513 = vtanh.f32 %v7357_v19 }
 0x5e7   :  { %v6514_v58 = vpop.eup %6513 }
 0x5e8   :  { %v1241_v28 = vmul.f32 %v6514_v58, %v6512_v46  ;;  %v1412_v58 = vrot.slane %v7357_v19, 6 }
 0x5ea   :  { %1242 = vst [vmem:[#allocation2] sm:$0xc0] %v1241_v28  ;;  %v1244_v61 = vrot.slane %v1241_v28, 6 }
 0x5ec   :  { %1311 = vmatmul.mubr.f32.vlgmr.msra.gmra.mrb[12].mxu1 %v1244_v61  ;;  %1382 = vmatmul.mubr.f32.vlgmr.msra.gmra.mrb[14].mxu0 %v1244_v61 }
 0x5ed   :  { %5503 = vmatpush1.bf16.msra.mxu1 %v7053_v62  ;;  %5535 = vmatpush1.bf16.msra.mxu0 %v7055_v63 }
 0x5ee   :  { %5505 = vmatprep.subr.bf16.mxu1 %v7061_v8  ;;  %5537 = vmatprep.subr.bf16.mxu0 %v7063_v9 }
 0x5ef   :  { %1484 = vmatprep.mubr.f32.mxu1 %v8196_v6  ;;  %1555 = vmatprep.mubr.f32.mxu0 %v8196_v6 }
 0x5f1   :  { %5507 = vmatpush1.bf16.msra.mxu1 %v7069_v13  ;;  %5539 = vmatpush1.bf16.msra.mxu0 %v7071_v14 }
 0x5f2   :  { %5509 = vmatprep.subr.bf16.mxu1 %v7075_v17  ;;  %5541 = vmatprep.subr.bf16.mxu0 %v7077_v18 }
 0x5f5   :  { %5511 = vmatpush1.bf16.msra.mxu1 %v7085_v25  ;;  %5543 = vmatpush1.bf16.msra.mxu0 %v7087_v26 }
 0x5f6   :  { %5513 = vmatprep.subr.bf16.mxu1 %v7091_v29  ;;  %5545 = vmatprep.subr.bf16.mxu0 %v7093_v30 }
 0x5f9   :  { %5515 = vmatpush1.bf16.msra.mxu1 %v7099_v37  ;;  %5547 = vmatpush1.bf16.msra.mxu0 %v7101_v38 }
 0x5fa   :  { %5517 = vmatprep.subr.bf16.mxu1 %v7105_v41  ;;  %5549 = vmatprep.subr.bf16.mxu0 %v7107_v42 }
 0x5fd   :  { %5519 = vmatpush1.bf16.msra.mxu1 %v7111_v50  ;;  %5551 = vmatpush1.bf16.msra.mxu0 %v7113_v52 }
 0x5fe   :  { %5521 = vmatprep.subr.bf16.mxu1 %v7117_v55  ;;  %5553 = vmatprep.subr.bf16.mxu0 %v7119_v56 }
 0x601   :  { %5523 = vmatpush1.bf16.msra.mxu1 %v7123_v4  ;;  %5555 = vmatpush1.bf16.msra.mxu0 %v7125_v5 }
 0x602   :  { %5525 = vmatprep.subr.bf16.mxu1 %v7129_v12  ;;  %5557 = vmatprep.subr.bf16.mxu0 %v7131_v15 }
 0x605   :  { %5527 = vmatpush1.bf16.msra.mxu1 %v7135_v24  ;;  %5559 = vmatpush1.bf16.msra.mxu0 %v7137_v27 }
 0x606   :  { %5529 = vmatprep.subr.bf16.mxu1 %v7141_v31  ;;  %5561 = vmatprep.subr.bf16.mxu0 %v7143_v32 }
 0x609   :  { %5531 = vmatpush1.bf16.msra.mxu1 %v7147_v36  ;;  %5563 = vmatpush1.bf16.msra.mxu0 %v7149_v39 }
 0x60a   :  { %5565 = vmatprep.subr.bf16.mxu1 %v7047_v49  ;;  %5597 = vmatprep.subr.bf16.mxu0 %v7049_v51 }
 0x6bf   :  { %v1312_v35 = vpop.f32.mrb[12].mxu1  ;;  %v1383_v34 = vpop.f32.mrb[14].mxu0 }
 0x6c0   :  { %v1388_v33 = vadd.f32 %v1312_v35, %v7211_v10  ;;  %v1314_v57 = vpop.f32.mrb[13].mxu1  ;;  %v1385_v16 = vpop.f32.mrb[15].mxu0  ;;  %v1390_v23 = vadd.f32 %v1383_v34, %v7213_v11 }
 0x6c1   :  { %v1389_v44 = vadd.f32 %v1314_v57, %v7215_v20  ;;  %v1391_v47 = vadd.f32 %v1385_v16, %v7217_v21 }
 0x6c2   :  { %v4800_v1 = vmul.f32 -1.442695, %v1388_v33 }
 0x6c3   :  { %v4801_v0 = vmul.f32 -1.442695, %v1389_v44  ;;  %v4802_v22 = vmul.f32 -1.442695, %v1391_v47 }
 0x6c4   :  { %6515 = vpow2.f32 %v4800_v1 }
 0x6c5   :  { %6517 = vpow2.f32 %v4801_v0 }
 0x6c6   :  { %6519 = vpow2.f32 %v4802_v22 }
 0x6c7   :  { %6521 = vtanh.f32 %v1390_v23 }
 0x6ce   :  { %v6516_v60 = vpop.eup %6515 }
 0x6cf   :  { %v6518_v48 = vpop.eup %6517  ;;  %v1395_v3 = vadd.f32 1.0, %v6516_v60 }
 0x6d0   :  { %v1401_v54 = vadd.f32 1.0, %v6518_v48  ;;  %v6520_v53 = vpop.eup %6519 }
 0x6d1   :  { %6523 = vrcp.f32 %v1395_v3  ;;  %v6522_v45 = vpop.eup %6521  ;;  %v1408_v35 = vadd.f32 1.0, %v6520_v53 }
 0x6d2   :  { %6525 = vrcp.f32 %v1401_v54 }
 0x6d3   :  { %6527 = vrcp.f32 %v1408_v35 }
 0x6db   :  { %v6524_v46 = vpop.eup %6523 }
 0x6dc   :  { %v6526_v28 = vpop.eup %6525  ;;  %v1415_v61 = vmul.f32 %v6524_v46, %v6522_v45 }
 0x6dd   :  { %v1414_v33 = vmul.f32 %v6526_v28, %v1412_v58  ;;  %v6528_v34 = vpop.eup %6527 }
 0x6df   :  { %v7399_v57 = vadd.f32 %v1415_v61, %v1414_v33 }
 0x6e1   :  { %6529 = vtanh.f32 %v7399_v57 }
 0x6eb   :  { %v6530_v16 = vpop.eup %6529 }
 0x6ec   :  { %v1418_v44 = vmul.f32 %v6530_v16, %v6528_v34 }
 0x6ee   :  { %1419 = vst [vmem:[#allocation2 + $0x8] sm:$0x3] %v1418_v44  ;;  %1485 = vmatmul.mubr.f32.vlgmr.msra.gmra.mrb[14].mxu1 %v1418_v44  ;;  %1556 = vmatmul.mubr.f32.vlgmr.msra.gmra.mrb[16].mxu0 %v1418_v44  ;;  %v1598_v44 = vrot.slane %v7399_v57, 6 }
 0x6ef   :  { %5567 = vmatpush1.bf16.msra.mxu1 %v7053_v62  ;;  %5599 = vmatpush1.bf16.msra.mxu0 %v7055_v63 }
 0x6f0   :  { %5569 = vmatprep.subr.bf16.mxu1 %v7061_v8  ;;  %5601 = vmatprep.subr.bf16.mxu0 %v7063_v9 }
 0x6f1   :  { %1673 = vmatprep.mubr.f32.mxu1 %v8196_v6  ;;  %1744 = vmatprep.mubr.f32.mxu0 %v8196_v6 }
 0x6f3   :  { %5571 = vmatpush1.bf16.msra.mxu1 %v7069_v13  ;;  %5603 = vmatpush1.bf16.msra.mxu0 %v7071_v14 }
 0x6f4   :  { %5573 = vmatprep.subr.bf16.mxu1 %v7075_v17  ;;  %5605 = vmatprep.subr.bf16.mxu0 %v7077_v18 }
 0x6f7   :  { %5575 = vmatpush1.bf16.msra.mxu1 %v7085_v25  ;;  %5607 = vmatpush1.bf16.msra.mxu0 %v7087_v26 }
 0x6f8   :  { %5577 = vmatprep.subr.bf16.mxu1 %v7091_v29  ;;  %5609 = vmatprep.subr.bf16.mxu0 %v7093_v30 }
 0x6fb   :  { %5579 = vmatpush1.bf16.msra.mxu1 %v7099_v37  ;;  %5611 = vmatpush1.bf16.msra.mxu0 %v7101_v38 }
 0x6fc   :  { %5581 = vmatprep.subr.bf16.mxu1 %v7105_v41  ;;  %5613 = vmatprep.subr.bf16.mxu0 %v7107_v42 }
 0x6ff   :  { %5583 = vmatpush1.bf16.msra.mxu1 %v7111_v50  ;;  %5615 = vmatpush1.bf16.msra.mxu0 %v7113_v52 }
 0x700   :  { %5585 = vmatprep.subr.bf16.mxu1 %v7117_v55  ;;  %5617 = vmatprep.subr.bf16.mxu0 %v7119_v56 }
 0x703   :  { %5587 = vmatpush1.bf16.msra.mxu1 %v7123_v4  ;;  %5619 = vmatpush1.bf16.msra.mxu0 %v7125_v5 }
 0x704   :  { %5589 = vmatprep.subr.bf16.mxu1 %v7129_v12  ;;  %5621 = vmatprep.subr.bf16.mxu0 %v7131_v15 }
 0x707   :  { %5591 = vmatpush1.bf16.msra.mxu1 %v7135_v24  ;;  %5623 = vmatpush1.bf16.msra.mxu0 %v7137_v27 }
 0x708   :  { %5593 = vmatprep.subr.bf16.mxu1 %v7141_v31  ;;  %5625 = vmatprep.subr.bf16.mxu0 %v7143_v32 }
 0x70b   :  { %5595 = vmatpush1.bf16.msra.mxu1 %v7147_v36  ;;  %5627 = vmatpush1.bf16.msra.mxu0 %v7149_v39 }
 0x70c   :  { %5629 = vmatprep.subr.bf16.mxu1 %v7047_v49  ;;  %5661 = vmatprep.subr.bf16.mxu0 %v7049_v51 }
 0x7c1   :  { %v1486_v19 = vpop.f32.mrb[14].mxu1  ;;  %v1557_v1 = vpop.f32.mrb[16].mxu0 }
 0x7c2   :  { %v1566_v0 = vrot.slane %v1486_v19, 6  ;;  %v1488_v47 = vpop.f32.mrb[15].mxu1  ;;  %v1559_v22 = vpop.f32.mrb[17].mxu0  ;;  %v1568_v49 = vrot.slane %v1557_v1, 6 }
 0x7c3   :  { %v1567_v23 = vrot.slane %v1488_v47, 6  ;;  %v1569_v53 = vrot.slane %v1559_v22, 6 }
 0x7c4   :  { %v1574_v60 = vadd.f32 %v1566_v0, %v7211_v10  ;;  %v1576_v51 = vadd.f32 %v1568_v49, %v7213_v11  ;;  %v1987_v49 = vld [vmem:[#allocation3 + $0x200] sm:$0xff] }
 0x7c5   :  { %v1575_v48 = vadd.f32 %v1567_v23, %v7215_v20  ;;  %v1577_v45 = vadd.f32 %v1569_v53, %v7217_v21 }
 0x7c6   :  { %v4803_v3 = vmul.f32 -1.442695, %v1574_v60 }
 0x7c7   :  { %v4804_v54 = vmul.f32 -1.442695, %v1575_v48  ;;  %v4805_v46 = vmul.f32 -1.442695, %v1577_v45 }
 0x7c8   :  { %6531 = vpow2.f32 %v4803_v3 }
 0x7c9   :  { %6533 = vpow2.f32 %v4804_v54 }
 0x7ca   :  { %6535 = vpow2.f32 %v4805_v46  ;;  %v1991_v46 = vld [vmem:[#allocation3 + $0x220] sm:$0xff] }
 0x7cb   :  { %6537 = vtanh.f32 %v1576_v51 }
 0x7d2   :  { %v6532_v58 = vpop.eup %6531 }
 0x7d3   :  { %v6534_v28 = vpop.eup %6533  ;;  %v1581_v61 = vadd.f32 1.0, %v6532_v58  ;;  %v1989_v58 = vld [vmem:[#allocation3 + $0x210] sm:$0xff] }
 0x7d4   :  { %v1587_v35 = vadd.f32 1.0, %v6534_v28  ;;  %v6536_v33 = vpop.eup %6535  ;;  %v1993_v28 = vld [vmem:[#allocation3 + $0x230] sm:$0xff] }
 0x7d5   :  { %6539 = vrcp.f32 %v1581_v61  ;;  %v6538_v34 = vpop.eup %6537  ;;  %v1594_v47 = vadd.f32 1.0, %v6536_v33  ;;  %v1996_v61 = vld [vmem:[#allocation3 + $0x248] sm:$0xff] }
 0x7d6   :  { %6541 = vrcp.f32 %v1587_v35  ;;  %v2000_v33 = vld [vmem:[#allocation3 + $0x268] sm:$0xff] }
 0x7d7   :  { %6543 = vrcp.f32 %v1594_v47  ;;  %v1995_v47 = vld [vmem:[#allocation3 + $0x240] sm:$0xff] }
 0x7df   :  { %v6540_v16 = vpop.eup %6539 }
 0x7e0   :  { %v6542_v19 = vpop.eup %6541  ;;  %v1601_v0 = vmul.f32 %v6540_v16, %v6538_v34  ;;  %v1998_v34 = vld [vmem:[#allocation3 + $0x258] sm:$0xff] }
 0x7e1   :  { %v1600_v1 = vmul.f32 %v6542_v19, %v1598_v44  ;;  %v6544_v23 = vpop.eup %6543  ;;  %v2002_v16 = vld [vmem:[#allocation3 + $0x278] sm:$0xff]  ;;  %v5694_v19 = vpack.c.bf16 %v1991_v46, %v1987_v49  ;;  %v2021_v46 = vld [vmem:[#allocation3 + $0x310] sm:$0xff] }
 0x7e3   :  { %v7441_v22 = vadd.f32 %v1601_v0, %v1600_v1  ;;  %v5726_v0 = vpack.c.bf16 %v1993_v28, %v1989_v58  ;;  %v1999_v1 = vld [vmem:[#allocation3 + $0x260] sm:$0xff]  ;;  %v2028_v58 = vld [vmem:[#allocation3 + $0x348] sm:$0xff] }
 0x7e4   :  { %v2032_v28 = vld [vmem:[#allocation3 + $0x368] sm:$0xff] }
 0x7e5   :  { %6545 = vtanh.f32 %v7441_v22 }
 0x7ef   :  { %v6546_v60 = vpop.eup %6545 }
 0x7f0   :  { %v1604_v48 = vmul.f32 %v6546_v60, %v6544_v23  ;;  %v5696_v23 = vpack.c.bf16 %v2000_v33, %v1996_v61  ;;  %v5728_v60 = vpack.c.bf16 %v2002_v16, %v1998_v34  ;;  %v2030_v61 = vld [vmem:[#allocation3 + $0x358] sm:$0xff]  ;;  %v2027_v16 = vld [vmem:[#allocation3 + $0x340] sm:$0xff] }
 0x7f2   :  { %1605 = vst [vmem:[#allocation2 + $0x8] sm:$0xc] %v1604_v48  ;;  %v1607_v3 = vrot.slane %v1604_v48, 2  ;;  %v1997_v48 = vld [vmem:[#allocation3 + $0x250] sm:$0xff] }
 0x7f4   :  { %1674 = vmatmul.mubr.f32.vlgmr.msra.gmra.mrb[16].mxu1 %v1607_v3  ;;  %1745 = vmatmul.mubr.f32.vlgmr.msra.gmra.mrb[18].mxu0 %v1607_v3  ;;  %v2001_v3 = vld [vmem:[#allocation3 + $0x270] sm:$0xff] }
 0x7f5   :  { %5631 = vmatpush1.bf16.msra.mxu1 %v7053_v62  ;;  %5663 = vmatpush1.bf16.msra.mxu0 %v7055_v63  ;;  %v1988_v62 = vld [vmem:[#allocation3 + $0x208] sm:$0xff] }
 0x7f6   :  { %5633 = vmatprep.subr.bf16.mxu1 %v7061_v8  ;;  %5665 = vmatprep.subr.bf16.mxu0 %v7063_v9  ;;  %v1992_v63 = vld [vmem:[#allocation3 + $0x228] sm:$0xff]  ;;  %v1990_v8 = vld [vmem:[#allocation3 + $0x218] sm:$0xff] }
 0x7f7   :  { %1862 = vmatprep.mubr.f32.mxu1 %v8196_v6  ;;  %1933 = vmatprep.mubr.f32.mxu0 %v8196_v6  ;;  %v5692_v9 = vpack.c.bf16 %v1992_v63, %v1988_v62  ;;  %v2004_v62 = vld [vmem:[#allocation3 + $0x288] sm:$0xff] }
 0x7f8   :  { %v2008_v63 = vld [vmem:[#allocation3 + $0x2a8] sm:$0xff] }
 0x7f9   :  { %5635 = vmatpush1.bf16.msra.mxu1 %v7069_v13  ;;  %5667 = vmatpush1.bf16.msra.mxu0 %v7071_v14  ;;  %v1994_v13 = vld [vmem:[#allocation3 + $0x238] sm:$0xff] }
 0x7fa   :  { %5637 = vmatprep.subr.bf16.mxu1 %v7075_v17  ;;  %5669 = vmatprep.subr.bf16.mxu0 %v7077_v18  ;;  %v5724_v14 = vpack.c.bf16 %v1994_v13, %v1990_v8  ;;  %v2006_v8 = vld [vmem:[#allocation3 + $0x298] sm:$0xff]  ;;  %v5698_v13 = vpack.c.bf16 %v1999_v1, %v1995_v47  ;;  %v2029_v47 = vld [vmem:[#allocation3 + $0x350] sm:$0xff] }
 0x7fb   :  { %v2033_v1 = vld [vmem:[#allocation3 + $0x370] sm:$0xff] }
 0x7fd   :  { %5639 = vmatpush1.bf16.msra.mxu1 %v7085_v25  ;;  %5671 = vmatpush1.bf16.msra.mxu0 %v7087_v26 }
 0x7fe   :  { %5641 = vmatprep.subr.bf16.mxu1 %v7091_v29  ;;  %5673 = vmatprep.subr.bf16.mxu0 %v7093_v30 }
 0x801   :  { %5643 = vmatpush1.bf16.msra.mxu1 %v7099_v37  ;;  %5675 = vmatpush1.bf16.msra.mxu0 %v7101_v38 }
 0x802   :  { %5645 = vmatprep.subr.bf16.mxu1 %v7105_v41  ;;  %5677 = vmatprep.subr.bf16.mxu0 %v7107_v42 }
 0x805   :  { %5647 = vmatpush1.bf16.msra.mxu1 %v7111_v50  ;;  %5679 = vmatpush1.bf16.msra.mxu0 %v7113_v52 }
 0x806   :  { %5649 = vmatprep.subr.bf16.mxu1 %v7117_v55  ;;  %5681 = vmatprep.subr.bf16.mxu0 %v7119_v56 }
 0x809   :  { %5651 = vmatpush1.bf16.msra.mxu1 %v7123_v4  ;;  %5683 = vmatpush1.bf16.msra.mxu0 %v7125_v5 }
 0x80a   :  { %5653 = vmatprep.subr.bf16.mxu1 %v7129_v12  ;;  %5685 = vmatprep.subr.bf16.mxu0 %v7131_v15 }
 0x80d   :  { %5655 = vmatpush1.bf16.msra.mxu1 %v7135_v24  ;;  %5687 = vmatpush1.bf16.msra.mxu0 %v7137_v27 }
 0x80e   :  { %5657 = vmatprep.subr.bf16.mxu1 %v7141_v31  ;;  %5689 = vmatprep.subr.bf16.mxu0 %v7143_v32 }
 0x811   :  { %5659 = vmatpush1.bf16.msra.mxu1 %v7147_v36  ;;  %5691 = vmatpush1.bf16.msra.mxu0 %v7149_v39  ;;  %v1787_v36 = vrot.slane %v7441_v22, 6 }
 0x812   :  { %5693 = vmatprep.subr.bf16.mxu1 %v5692_v9  ;;  %5725 = vmatprep.subr.bf16.mxu0 %v5724_v14  ;;  %v2010_v9 = vld [vmem:[#allocation3 + $0x2b8] sm:$0xff]  ;;  %v5730_v14 = vpack.c.bf16 %v2001_v3, %v1997_v48 }
 0x813   :  { %v2042_v48 = vld [vmem:[#allocation3 + $0x3b8] sm:$0xff] }
 0x8c7   :  { %v1675_v17 = vpop.f32.mrb[16].mxu1  ;;  %v1746_v18 = vpop.f32.mrb[18].mxu0 }
 0x8c8   :  { %v1755_v25 = vrot.slane %v1675_v17, 4  ;;  %v1677_v26 = vpop.f32.mrb[17].mxu1  ;;  %v1748_v29 = vpop.f32.mrb[19].mxu0  ;;  %v1757_v55 = vrot.slane %v1746_v18, 4  ;;  %v2003_v17 = vld [vmem:[#allocation3 + $0x280] sm:$0xff] }
 0x8c9   :  { %v1756_v30 = vrot.slane %v1677_v26, 4  ;;  %v1758_v50 = vrot.slane %v1748_v29, 4  ;;  %v2007_v18 = vld [vmem:[#allocation3 + $0x2a0] sm:$0xff]  ;;  %v5732_v26 = vpack.c.bf16 %v2010_v9, %v2006_v8  ;;  %v2005_v29 = vld [vmem:[#allocation3 + $0x290] sm:$0xff] }
 0x8ca   :  { %v1763_v37 = vadd.f32 %v1755_v25, %v7211_v10  ;;  %v1765_v4 = vadd.f32 %v1757_v55, %v7213_v11  ;;  %v5700_v25 = vpack.c.bf16 %v2008_v63, %v2004_v62  ;;  %v2011_v55 = vld [vmem:[#allocation3 + $0x2c0] sm:$0xff]  ;;  %v5746_v62 = vpack.c.bf16 %v2033_v1, %v2029_v47  ;;  %v2246_v47 = vld [vmem:[#allocation6 + $0x288] sm:$0xff] }
 0x8cb   :  { %v1764_v38 = vadd.f32 %v1756_v30, %v7215_v20  ;;  %v1766_v52 = vadd.f32 %v1758_v50, %v7217_v21  ;;  %v2009_v30 = vld [vmem:[#allocation3 + $0x2b0] sm:$0xff]  ;;  %v5702_v50 = vpack.c.bf16 %v2007_v18, %v2003_v17  ;;  %v2035_v63 = vld [vmem:[#allocation3 + $0x380] sm:$0xff]  ;;  %v2044_v18 = vld [vmem:[#allocation3 + $0x3c8] sm:$0xff] }
 0x8cc   :  { %v4806_v41 = vmul.f32 -1.442695, %v1763_v37  ;;  %v2012_v37 = vld [vmem:[#allocation3 + $0x2c8] sm:$0xff]  ;;  %v2039_v8 = vld [vmem:[#allocation3 + $0x3a0] sm:$0xff]  ;;  %v2041_v17 = vld [vmem:[#allocation3 + $0x3b0] sm:$0xff] }
 0x8cd   :  { %v4807_v42 = vmul.f32 -1.442695, %v1764_v38  ;;  %v4808_v56 = vmul.f32 -1.442695, %v1766_v52  ;;  %v2016_v38 = vld [vmem:[#allocation3 + $0x2e8] sm:$0xff]  ;;  %v5734_v52 = vpack.c.bf16 %v2009_v30, %v2005_v29  ;;  %v2050_v29 = vld [vmem:[#allocation3 + $0x3f8] sm:$0xff]  ;;  %v5718_v30 = vpack.c.bf16 %v2039_v8, %v2035_v63 }
 0x8ce   :  { %6547 = vpow2.f32 %v4806_v41  ;;  %v2014_v41 = vld [vmem:[#allocation3 + $0x2d8] sm:$0xff]  ;;  %v2250_v1 = vld [vmem:[#allocation6 + $0x2a8] sm:$0xff]  ;;  %v2247_v8 = vld [vmem:[#allocation6 + $0x290] sm:$0xff] }
 0x8cf   :  { %6549 = vpow2.f32 %v4807_v42  ;;  %v2018_v42 = vld [vmem:[#allocation3 + $0x2f8] sm:$0xff] }
 0x8d0   :  { %6551 = vpow2.f32 %v4808_v56  ;;  %v2015_v56 = vld [vmem:[#allocation3 + $0x2e0] sm:$0xff] }
 0x8d1   :  { %6553 = vtanh.f32 %v1765_v4  ;;  %v5704_v4 = vpack.c.bf16 %v2016_v38, %v2012_v37  ;;  %v2043_v38 = vld [vmem:[#allocation3 + $0x3c0] sm:$0xff] }
 0x8d8   :  { %v6548_v5 = vpop.eup %6547 }
 0x8d9   :  { %v6550_v12 = vpop.eup %6549  ;;  %v1770_v15 = vadd.f32 1.0, %v6548_v5  ;;  %v5736_v5 = vpack.c.bf16 %v2018_v42, %v2014_v41 }
 0x8da   :  { %v1776_v24 = vadd.f32 1.0, %v6550_v12  ;;  %v6552_v27 = vpop.eup %6551  ;;  %v2013_v12 = vld [vmem:[#allocation3 + $0x2d0] sm:$0xff] }
 0x8db   :  { %6555 = vrcp.f32 %v1770_v15  ;;  %v6554_v31 = vpop.eup %6553  ;;  %v1783_v54 = vadd.f32 1.0, %v6552_v27  ;;  %v2017_v15 = vld [vmem:[#allocation3 + $0x2f0] sm:$0xff]  ;;  %v2024_v27 = vld [vmem:[#allocation3 + $0x328] sm:$0xff] }
 0x8dc   :  { %6557 = vrcp.f32 %v1776_v24  ;;  %v2020_v24 = vld [vmem:[#allocation3 + $0x308] sm:$0xff] }
 0x8dd   :  { %6559 = vrcp.f32 %v1783_v54  ;;  %v2023_v54 = vld [vmem:[#allocation3 + $0x320] sm:$0xff] }
 0x8e5   :  { %v6556_v32 = vpop.eup %6555 }
 0x8e6   :  { %v6558_v39 = vpop.eup %6557  ;;  %v1790_v57 = vmul.f32 %v6556_v32, %v6554_v31  ;;  %v2022_v31 = vld [vmem:[#allocation3 + $0x318] sm:$0xff] }
 0x8e7   :  { %v1789_v53 = vmul.f32 %v6558_v39, %v1787_v36  ;;  %v6560_v51 = vpop.eup %6559  ;;  %v2026_v32 = vld [vmem:[#allocation3 + $0x338] sm:$0xff]  ;;  %v5706_v36 = vpack.c.bf16 %v2015_v56, %v2011_v55  ;;  %v5738_v39 = vpack.c.bf16 %v2017_v15, %v2013_v12  ;;  %v2049_v55 = vld [vmem:[#allocation3 + $0x3f0] sm:$0xff]  ;;  %v2230_v12 = vld [vmem:[#allocation6 + $0x208] sm:$0xff] }
 0x8e8   :  { %v5740_v49 = vpack.c.bf16 %v2026_v32, %v2022_v31  ;;  %v2234_v15 = vld [vmem:[#allocation6 + $0x228] sm:$0xff]  ;;  %v2236_v31 = vld [vmem:[#allocation6 + $0x238] sm:$0xff]  ;;  %v2229_v32 = vld [vmem:[#allocation6 + $0x200] sm:$0xff] }
 0x8e9   :  { %v7481_v45 = vadd.f32 %v1790_v57, %v1789_v53  ;;  %v2019_v57 = vld [vmem:[#allocation3 + $0x300] sm:$0xff]  ;;  %v5708_v53 = vpack.c.bf16 %v2024_v27, %v2020_v24  ;;  %v2232_v24 = vld [vmem:[#allocation6 + $0x218] sm:$0xff]  ;;  %v7488_v27 = vpack.c.bf16 %v2234_v15, %v2230_v12 }
 0x8ea   :  { %v5710_v33 = vpack.c.bf16 %v2023_v54, %v2019_v57  ;;  %v2231_v54 = vld [vmem:[#allocation6 + $0x210] sm:$0xff]  ;;  %v2261_v12 = vld [vmem:[#allocation6 + $0x300] sm:$0xff] }
 0x8eb   :  { %6561 = vtanh.f32 %v7481_v45  ;;  %v2265_v15 = vld [vmem:[#allocation6 + $0x320] sm:$0xff] }
 0x8f5   :  { %v6562_v35 = vpop.eup %6561 }
 0x8f6   :  { %v1793_v44 = vmul.f32 %v6562_v35, %v6560_v51  ;;  %v2025_v51 = vld [vmem:[#allocation3 + $0x330] sm:$0xff]  ;;  %v2034_v35 = vld [vmem:[#allocation3 + $0x378] sm:$0xff] }
 0x8f7   :  { %v5742_v34 = vpack.c.bf16 %v2025_v51, %v2021_v46  ;;  %v2238_v46 = vld [vmem:[#allocation6 + $0x248] sm:$0xff] }
 0x8f8   :  { %1794 = vst [vmem:[#allocation2 + $0x8] sm:$0x30] %v1793_v44  ;;  %v1796_v22 = vrot.slane %v1793_v44, 4  ;;  %v2031_v44 = vld [vmem:[#allocation3 + $0x360] sm:$0xff]  ;;  %v2242_v51 = vld [vmem:[#allocation6 + $0x268] sm:$0xff] }
 0x8f9   :  { %v5714_v3 = vpack.c.bf16 %v2031_v44, %v2027_v16  ;;  %v2239_v44 = vld [vmem:[#allocation6 + $0x250] sm:$0xff] }
 0x8fa   :  { %1863 = vmatmul.mubr.f32.vlgmr.msra.gmra.mrb[18].mxu1 %v1796_v22  ;;  %1934 = vmatmul.mubr.f32.vlgmr.msra.gmra.mrb[20].mxu0 %v1796_v22  ;;  %v2036_v22 = vld [vmem:[#allocation3 + $0x388] sm:$0xff] }
 0x8fb   :  { %5695 = vmatpush1.bf16.msra.mxu1 %v5694_v19  ;;  %5727 = vmatpush1.bf16.msra.mxu0 %v5726_v0  ;;  %v5712_v19 = vpack.c.bf16 %v2032_v28, %v2028_v58  ;;  %v5744_v0 = vpack.c.bf16 %v2034_v35, %v2030_v61  ;;  %v2240_v58 = vld [vmem:[#allocation6 + $0x258] sm:$0xff]  ;;  %v7500_v28 = vpack.c.bf16 %v2242_v51, %v2238_v46  ;;  %v2237_v35 = vld [vmem:[#allocation6 + $0x240] sm:$0xff]  ;;  %v2274_v46 = vld [vmem:[#allocation6 + $0x368] sm:$0xff] }
 0x8fc   :  { %5697 = vmatprep.subr.bf16.mxu1 %v5696_v23  ;;  %5729 = vmatprep.subr.bf16.mxu0 %v5728_v60  ;;  %v2040_v23 = vld [vmem:[#allocation3 + $0x3a8] sm:$0xff]  ;;  %v2038_v60 = vld [vmem:[#allocation3 + $0x398] sm:$0xff] }
 0x8fd   :  { %2138 = vmatprep.mubr.f32.mxu1 %v8196_v6  ;;  %2215 = vmatprep.mubr.f32.mxu0 %v8196_v6  ;;  %v5716_v9 = vpack.c.bf16 %v2040_v23, %v2036_v22  ;;  %v2244_v61 = vld [vmem:[#allocation6 + $0x278] sm:$0xff]  ;;  %v7512_v23 = vpack.c.bf16 %v2250_v1, %v2246_v47  ;;  %v2271_v47 = vld [vmem:[#allocation6 + $0x350] sm:$0xff] }
 0x8fe   :  { %v2248_v22 = vld [vmem:[#allocation6 + $0x298] sm:$0xff]  ;;  %v2275_v1 = vld [vmem:[#allocation6 + $0x370] sm:$0xff] }
 0x8ff   :  { %5699 = vmatpush1.bf16.msra.mxu1 %v5698_v13  ;;  %5731 = vmatpush1.bf16.msra.mxu0 %v5730_v14  ;;  %v5748_v13 = vpack.c.bf16 %v2042_v48, %v2038_v60  ;;  %v2037_v14 = vld [vmem:[#allocation3 + $0x390] sm:$0xff]  ;;  %v2252_v60 = vld [vmem:[#allocation6 + $0x2b8] sm:$0xff]  ;;  %v2245_v48 = vld [vmem:[#allocation6 + $0x280] sm:$0xff] }
 0x900   :  { %5701 = vmatprep.subr.bf16.mxu1 %v5700_v25  ;;  %5733 = vmatprep.subr.bf16.mxu0 %v5732_v26  ;;  %v2048_v25 = vld [vmem:[#allocation3 + $0x3e8] sm:$0xff]  ;;  %v2046_v26 = vld [vmem:[#allocation3 + $0x3d8] sm:$0xff]  ;;  %v5750_v37 = vpack.c.bf16 %v2041_v17, %v2037_v14 }
 0x901   :  { %v5720_v41 = vpack.c.bf16 %v2048_v25, %v2044_v18  ;;  %v5752_v42 = vpack.c.bf16 %v2050_v29, %v2046_v26  ;;  %v2254_v14 = vld [vmem:[#allocation6 + $0x2c8] sm:$0xff]  ;;  %v2256_v18 = vld [vmem:[#allocation6 + $0x2d8] sm:$0xff]  ;;  %v2253_v29 = vld [vmem:[#allocation6 + $0x2c0] sm:$0xff] }
 0x902   :  { %v2258_v17 = vld [vmem:[#allocation6 + $0x2e8] sm:$0xff]  ;;  %v2260_v26 = vld [vmem:[#allocation6 + $0x2f8] sm:$0xff] }
 0x903   :  { %5703 = vmatpush1.bf16.msra.mxu1 %v5702_v50  ;;  %5735 = vmatpush1.bf16.msra.mxu0 %v5734_v52  ;;  %v2047_v50 = vld [vmem:[#allocation3 + $0x3e0] sm:$0xff]  ;;  %v2045_v52 = vld [vmem:[#allocation3 + $0x3d0] sm:$0xff]  ;;  %v7524_v25 = vpack.c.bf16 %v2258_v17, %v2254_v14  ;;  %v2272_v51 = vld [vmem:[#allocation6 + $0x358] sm:$0xff] }
 0x904   :  { %5705 = vmatprep.subr.bf16.mxu1 %v5704_v4  ;;  %5737 = vmatprep.subr.bf16.mxu0 %v5736_v5  ;;  %v5722_v56 = vpack.c.bf16 %v2047_v50, %v2043_v38  ;;  %v5754_v4 = vpack.c.bf16 %v2049_v55, %v2045_v52  ;;  %v1984_v5 = vld [vmem:[#allocation2] sm:$0xff]  ;;  %v2262_v52 = vld [vmem:[#allocation6 + $0x308] sm:$0xff]  ;;  %v2277_v17 = vld [vmem:[#allocation6 + $0x380] sm:$0xff] }
 0x905   :  { %v2266_v55 = vld [vmem:[#allocation6 + $0x328] sm:$0xff] }
 0x907   :  { %5707 = vmatpush1.bf16.msra.mxu1 %v5706_v36  ;;  %5739 = vmatpush1.bf16.msra.mxu0 %v5738_v39  ;;  %v2233_v36 = vld [vmem:[#allocation6 + $0x220] sm:$0xff]  ;;  %v7490_v39 = vpack.c.bf16 %v2236_v31, %v2232_v24  ;;  %v7540_v31 = vpack.c.bf16 %v2265_v15, %v2261_v12 }
 0x908   :  { %5709 = vmatprep.subr.bf16.mxu1 %v5708_v53  ;;  %5741 = vmatprep.subr.bf16.mxu0 %v5740_v49  ;;  %v7492_v57 = vpack.c.bf16 %v2233_v36, %v2229_v32  ;;  %v2235_v53 = vld [vmem:[#allocation6 + $0x230] sm:$0xff]  ;;  %v2285_v12 = vld [vmem:[#allocation6 + $0x3c0] sm:$0xff] }
 0x909   :  { %v7495_v49 = vpack.c.bf16 %v2235_v53, %v2231_v54  ;;  %v2263_v32 = vld [vmem:[#allocation6 + $0x310] sm:$0xff]  ;;  %v2270_v53 = vld [vmem:[#allocation6 + $0x348] sm:$0xff]  ;;  %v2289_v15 = vld [vmem:[#allocation6 + $0x3e0] sm:$0xff] }
 0x90a   :  { %v2267_v36 = vld [vmem:[#allocation6 + $0x330] sm:$0xff] }
 0x90b   :  { %5711 = vmatpush1.bf16.msra.mxu1 %v5710_v33  ;;  %5743 = vmatpush1.bf16.msra.mxu0 %v5742_v34  ;;  %v2241_v33 = vld [vmem:[#allocation6 + $0x260] sm:$0xff]  ;;  %v7502_v34 = vpack.c.bf16 %v2244_v61, %v2240_v58  ;;  %v7543_v54 = vpack.c.bf16 %v2267_v36, %v2263_v32  ;;  %v7548_v58 = vpack.c.bf16 %v2274_v46, %v2270_v53  ;;  %v2276_v61 = vld [vmem:[#allocation6 + $0x378] sm:$0xff]  ;;  %v2287_v53 = vld [vmem:[#allocation6 + $0x3d0] sm:$0xff] }
 0x90c   :  { %5713 = vmatprep.subr.bf16.mxu1 %v5712_v19  ;;  %5745 = vmatprep.subr.bf16.mxu0 %v5744_v0  ;;  %v7504_v16 = vpack.c.bf16 %v2241_v33, %v2237_v35  ;;  %v2243_v19 = vld [vmem:[#allocation6 + $0x270] sm:$0xff]  ;;  %v2269_v35 = vld [vmem:[#allocation6 + $0x340] sm:$0xff]  ;;  %v7576_v36 = vpack.c.bf16 %v2289_v15, %v2285_v12 }
 0x90d   :  { %v7507_v0 = vpack.c.bf16 %v2243_v19, %v2239_v44  ;;  %v2273_v33 = vld [vmem:[#allocation6 + $0x360] sm:$0xff]  ;;  %v7550_v44 = vpack.c.bf16 %v2276_v61, %v2272_v51  ;;  %v2291_v46 = vld [vmem:[#allocation6 + $0x3f0] sm:$0xff] }
 0x90e   :  { %v7552_v19 = vpack.c.bf16 %v2273_v33, %v2269_v35  ;;  %v7579_v51 = vpack.c.bf16 %v2291_v46, %v2287_v53  ;;  %v1976_v46 = vrot.slane %v7481_v45, 6  ;;  %v4812_v45 = vld [vmem:[%s8186_s4 + $0x4] sm:$0xf] }
 0x90f   :  { %5715 = vmatpush1.bf16.msra.mxu1 %v5714_v3  ;;  %5747 = vmatpush1.bf16.msra.mxu0 %v5746_v62  ;;  %v2249_v3 = vld [vmem:[#allocation6 + $0x2a0] sm:$0xff]  ;;  %v7514_v62 = vpack.c.bf16 %v2252_v60, %v2248_v22  ;;  %v2278_v22 = vld [vmem:[#allocation6 + $0x388] sm:$0xff]  ;;  %v7555_v60 = vpack.c.bf16 %v2275_v1, %v2271_v47 }
 0x910   :  { %5717 = vmatprep.subr.bf16.mxu1 %v5716_v9  ;;  %5749 = vmatprep.subr.bf16.mxu0 %v5748_v13  ;;  %v7516_v63 = vpack.c.bf16 %v2249_v3, %v2245_v48  ;;  %v2251_v9 = vld [vmem:[#allocation6 + $0x2b0] sm:$0xff]  ;;  %v2282_v48 = vld [vmem:[#allocation6 + $0x3a8] sm:$0xff]  ;;  %v2280_v3 = vld [vmem:[#allocation6 + $0x398] sm:$0xff] }
 0x911   :  { %v7519_v13 = vpack.c.bf16 %v2251_v9, %v2247_v8  ;;  %v2284_v8 = vld [vmem:[#allocation6 + $0x3b8] sm:$0xff]  ;;  %v7559_v9 = vpack.c.bf16 %v2282_v48, %v2278_v22 }
 0x912   :  { %v7561_v14 = vpack.c.bf16 %v2284_v8, %v2280_v3 }
 0x913   :  { %5719 = vmatpush1.bf16.msra.mxu1 %v5718_v30  ;;  %5751 = vmatpush1.bf16.msra.mxu0 %v5750_v37  ;;  %v2257_v30 = vld [vmem:[#allocation6 + $0x2e0] sm:$0xff]  ;;  %v7526_v37 = vpack.c.bf16 %v2260_v26, %v2256_v18  ;;  %v2279_v26 = vld [vmem:[#allocation6 + $0x390] sm:$0xff] }
 0x914   :  { %5721 = vmatprep.subr.bf16.mxu1 %v5720_v41  ;;  %5753 = vmatprep.subr.bf16.mxu0 %v5752_v42  ;;  %v7528_v38 = vpack.c.bf16 %v2257_v30, %v2253_v29  ;;  %v2255_v41 = vld [vmem:[#allocation6 + $0x2d0] sm:$0xff]  ;;  %v2281_v18 = vld [vmem:[#allocation6 + $0x3a0] sm:$0xff] }
 0x915   :  { %v2259_v42 = vld [vmem:[#allocation6 + $0x2f0] sm:$0xff]  ;;  %v7564_v29 = vpack.c.bf16 %v2281_v18, %v2277_v17 }
 0x916   :  { %v7531_v50 = vpack.c.bf16 %v2259_v42, %v2255_v41  ;;  %v2283_v30 = vld [vmem:[#allocation6 + $0x3b0] sm:$0xff]  ;;  %v2286_v42 = vld [vmem:[#allocation6 + $0x3c8] sm:$0xff] }
 0x917   :  { %5723 = vmatpush1.bf16.msra.mxu1 %v5722_v56  ;;  %5755 = vmatpush1.bf16.msra.mxu0 %v5754_v4  ;;  %v2264_v56 = vld [vmem:[#allocation6 + $0x318] sm:$0xff]  ;;  %v7536_v4 = vpack.c.bf16 %v2266_v55, %v2262_v52  ;;  %v7568_v41 = vpack.c.bf16 %v2283_v30, %v2279_v26  ;;  %v2290_v52 = vld [vmem:[#allocation6 + $0x3e8] sm:$0xff] }
 0x918   :  { %5757 = vmatprep.subr.bf16.mxu1 %v7488_v27  ;;  %5789 = vmatprep.subr.bf16.mxu0 %v7490_v39  ;;  %v2288_v55 = vld [vmem:[#allocation6 + $0x3d8] sm:$0xff] }
 0x91a   :  { %2139 = vmatmul.mubr.f32.vlgmr.msra.gmra.mrb[20].mxu1 %v1984_v5  ;;  %2216 = vmatmul.mubr.f32.vlgmr.msra.gmra.mrb[22].mxu0 %v1984_v5  ;;  %v2268_v5 = vld [vmem:[#allocation6 + $0x338] sm:$0xff] }
 0x91b   :  { %2144 = vmatprep.mubr.f32.mxu1 %v8196_v6  ;;  %2221 = vmatprep.mubr.f32.mxu0 %v8196_v6  ;;  %v7538_v24 = vpack.c.bf16 %v2268_v5, %v2264_v56  ;;  %v7572_v56 = vpack.c.bf16 %v2290_v52, %v2286_v42  ;;  %v2292_v5 = vld [vmem:[#allocation6 + $0x3f8] sm:$0xff] }
 0x91c   :  { %5759 = vmatpush1.bf16.msra.mxu1 %v7492_v57  ;;  %5791 = vmatpush1.bf16.msra.mxu0 %v7495_v49  ;;  %v7574_v32 = vpack.c.bf16 %v2292_v5, %v2288_v55 }
 0x91d   :  { %5761 = vmatprep.subr.bf16.mxu1 %v7500_v28  ;;  %5793 = vmatprep.subr.bf16.mxu0 %v7502_v34 }
 0x920   :  { %5763 = vmatpush1.bf16.msra.mxu1 %v7504_v16  ;;  %5795 = vmatpush1.bf16.msra.mxu0 %v7507_v0 }
 0x921   :  { %5765 = vmatprep.subr.bf16.mxu1 %v7512_v23  ;;  %5797 = vmatprep.subr.bf16.mxu0 %v7514_v62 }
 0x924   :  { %5767 = vmatpush1.bf16.msra.mxu1 %v7516_v63  ;;  %5799 = vmatpush1.bf16.msra.mxu0 %v7519_v13 }
 0x925   :  { %5769 = vmatprep.subr.bf16.mxu1 %v7524_v25  ;;  %5801 = vmatprep.subr.bf16.mxu0 %v7526_v37 }
 0x928   :  { %5771 = vmatpush1.bf16.msra.mxu1 %v7528_v38  ;;  %5803 = vmatpush1.bf16.msra.mxu0 %v7531_v50 }
 0x929   :  { %5773 = vmatprep.subr.bf16.mxu1 %v7536_v4  ;;  %5805 = vmatprep.subr.bf16.mxu0 %v7538_v24 }
 0x92c   :  { %5775 = vmatpush1.bf16.msra.mxu1 %v7540_v31  ;;  %5807 = vmatpush1.bf16.msra.mxu0 %v7543_v54 }
 0x92d   :  { %5777 = vmatprep.subr.bf16.mxu1 %v7548_v58  ;;  %5809 = vmatprep.subr.bf16.mxu0 %v7550_v44 }
 0x930   :  { %5779 = vmatpush1.bf16.msra.mxu1 %v7552_v19  ;;  %5811 = vmatpush1.bf16.msra.mxu0 %v7555_v60 }
 0x931   :  { %5781 = vmatprep.subr.bf16.mxu1 %v7559_v9  ;;  %5813 = vmatprep.subr.bf16.mxu0 %v7561_v14 }
 0x934   :  { %5783 = vmatpush1.bf16.msra.mxu1 %v7564_v29  ;;  %5815 = vmatpush1.bf16.msra.mxu0 %v7568_v41 }
 0x935   :  { %5785 = vmatprep.subr.bf16.mxu1 %v7572_v56  ;;  %5817 = vmatprep.subr.bf16.mxu0 %v7574_v32 }
 0x938   :  { %5787 = vmatpush1.bf16.msra.mxu1 %v7576_v36  ;;  %5819 = vmatpush1.bf16.msra.mxu0 %v7579_v51 }
 0x939   :  { %5821 = vmatprep.subr.bf16.mxu1 %v7488_v27  ;;  %5853 = vmatprep.subr.bf16.mxu0 %v7490_v39 }
 0x9cd   :  { %v1864_v61 = vpop.f32.mrb[18].mxu1  ;;  %v1935_v35 = vpop.f32.mrb[20].mxu0 }
 0x9ce   :  { %v1944_v33 = vrot.slane %v1864_v61, 2  ;;  %v1866_v47 = vpop.f32.mrb[19].mxu1  ;;  %v1937_v1 = vpop.f32.mrb[21].mxu0  ;;  %v1946_v30 = vrot.slane %v1935_v35, 2 }
 0x9cf   :  { %v1945_v22 = vrot.slane %v1866_v47, 2  ;;  %v1947_v18 = vrot.slane %v1937_v1, 2 }
 0x9d0   :  { %v1952_v48 = vadd.f32 %v1944_v33, %v7211_v10  ;;  %v1954_v52 = vadd.f32 %v1946_v30, %v7213_v11  ;;  %v8206_v30 = vsub.s32 1, %v7194_v40 }
 0x9d1   :  { %v1953_v3 = vadd.f32 %v1945_v22, %v7215_v20  ;;  %v1955_v26 = vadd.f32 %v1947_v18, %v7217_v21 }
 0x9d2   :  { %v4809_v8 = vmul.f32 -1.442695, %v1952_v48 }
 0x9d3   :  { %v4810_v17 = vmul.f32 -1.442695, %v1953_v3  ;;  %v4811_v42 = vmul.f32 -1.442695, %v1955_v26  ;;  %v7638_v26 = vrot.slane %v4812_v45, %v272_v43 }
 0x9d4   :  { %6563 = vpow2.f32 %v4809_v8 }
 0x9d5   :  { %6565 = vpow2.f32 %v4810_v17 }
 0x9d6   :  { %6567 = vpow2.f32 %v4811_v42  ;;  %v7642_v42 = vrot.slane %v4812_v45, %v8206_v30 }
 0x9d7   :  { %6569 = vtanh.f32 %v1954_v52 }
 0x9de   :  { %v6564_v55 = vpop.eup %6563 }
 0x9df   :  { %v6566_v5 = vpop.eup %6565  ;;  %v1959_v12 = vadd.f32 1.0, %v6564_v55 }
 0x9e0   :  { %v1965_v15 = vadd.f32 1.0, %v6566_v5  ;;  %v6568_v10 = vpop.eup %6567 }
 0x9e1   :  { %6571 = vrcp.f32 %v1959_v12  ;;  %v6570_v20 = vpop.eup %6569  ;;  %v1972_v21 = vadd.f32 1.0, %v6568_v10 }
 0x9e2   :  { %6573 = vrcp.f32 %v1965_v15 }
 0x9e3   :  { %6575 = vrcp.f32 %v1972_v21 }
 0x9eb   :  { %v6572_v53 = vpop.eup %6571 }
 0x9ec   :  { %v6574_v61 = vpop.eup %6573  ;;  %v1979_v33 = vmul.f32 %v6572_v53, %v6570_v20 }
 0x9ed   :  { %v1978_v35 = vmul.f32 %v6574_v61, %v1976_v46  ;;  %v2140_v47 = vpop.f32.mrb[20].mxu1  ;;  %v7591_v1 = vpop.f32.mrb[22].mxu0 }
 0x9ee   :  { %v2142_v11 = vpop.f32.mrb[21].mxu1  ;;  %v7593_v22 = vpop.f32.mrb[23].mxu0  ;;  %v7653_v15 = vadd.f32 %v2140_v47, %v7638_v26 }
 0x9ef   :  { %v1980_v48 = vadd.f32 %v1979_v33, %v1978_v35  ;;  %v6576_v3 = vpop.eup %6575  ;;  %v7656_v10 = vadd.f32 %v2142_v11, %v7642_v42  ;;  %v8207_v33 = vsub.s32 3, %v7194_v40  ;;  %v8208_v11 = vsub.s32 2, %v7194_v40 }
 0x9f1   :  { %6577 = vtanh.f32 %v1980_v48  ;;  %v7661_v21 = vrot.slane %v4812_v45, %v8207_v33 }
 0x9f3   :  { %v7666_v47 = vadd.f32 %v7593_v22, %v7661_v21 }
 0x9fb   :  { %v6578_v8 = vpop.eup %6577 }
 0x9fc   :  { %v1982_v17 = vmul.f32 %v6578_v8, %v6576_v3  ;;  %v7670_v8 = vrot.slane %v4812_v45, %v8208_v11 }
 0x9fe   :  { %1983 = vst [vmem:[#allocation2 + $0x8] sm:$0xc0] %v1982_v17 }
 0xa05   :  { %v1985_v18 = vld [vmem:[#allocation2 + $0x8] sm:$0xff] }
 0xa06   :  { %2145 = vmatmul.mubr.f32.gmra.mrb[22].mxu1 %v1985_v18  ;;  %2222 = vmatmul.mubr.f32.gmra.mrb[24].mxu0 %v1985_v18  ;;  %v7675_v18 = vadd.f32 %v7591_v1, %v7670_v8 }
 0xa07   :  { %2357 = vmatprep.mubr.f32.mxu1 %v8196_v6  ;;  %2428 = vmatprep.mubr.f32.mxu0 %v8196_v6 }
 0xa0a   :  { %2358 = vmatmul.mubr.f32.vlgmr.msra.gmra.mrb[24].mxu1 %v8196_v6  ;;  %2429 = vmatmul.mubr.f32.vlgmr.msra.gmra.mrb[26].mxu0 %v8196_v6 }
 0xa0b   :  { %5823 = vmatpush1.bf16.msra.mxu1 %v7492_v57  ;;  %5855 = vmatpush1.bf16.msra.mxu0 %v7495_v49 }
 0xa0c   :  { %5825 = vmatprep.subr.bf16.mxu1 %v7500_v28  ;;  %5857 = vmatprep.subr.bf16.mxu0 %v7502_v34 }
 0xa0d   :  { %2528 = vmatprep.mubr.f32.mxu1 %v8196_v6  ;;  %2599 = vmatprep.mubr.f32.mxu0 %v8196_v6 }
 0xa0f   :  { %5827 = vmatpush1.bf16.msra.mxu1 %v7504_v16  ;;  %5859 = vmatpush1.bf16.msra.mxu0 %v7507_v0 }
 0xa10   :  { %5829 = vmatprep.subr.bf16.mxu1 %v7512_v23  ;;  %5861 = vmatprep.subr.bf16.mxu0 %v7514_v62 }
 0xa13   :  { %5831 = vmatpush1.bf16.msra.mxu1 %v7516_v63  ;;  %5863 = vmatpush1.bf16.msra.mxu0 %v7519_v13 }
 0xa14   :  { %5833 = vmatprep.subr.bf16.mxu1 %v7524_v25  ;;  %5865 = vmatprep.subr.bf16.mxu0 %v7526_v37 }
 0xa17   :  { %5835 = vmatpush1.bf16.msra.mxu1 %v7528_v38  ;;  %5867 = vmatpush1.bf16.msra.mxu0 %v7531_v50 }
 0xa18   :  { %5837 = vmatprep.subr.bf16.mxu1 %v7536_v4  ;;  %5869 = vmatprep.subr.bf16.mxu0 %v7538_v24 }
 0xa1b   :  { %5839 = vmatpush1.bf16.msra.mxu1 %v7540_v31  ;;  %5871 = vmatpush1.bf16.msra.mxu0 %v7543_v54 }
 0xa1c   :  { %5841 = vmatprep.subr.bf16.mxu1 %v7548_v58  ;;  %5873 = vmatprep.subr.bf16.mxu0 %v7550_v44 }
 0xa1f   :  { %5843 = vmatpush1.bf16.msra.mxu1 %v7552_v19  ;;  %5875 = vmatpush1.bf16.msra.mxu0 %v7555_v60 }
 0xa20   :  { %5845 = vmatprep.subr.bf16.mxu1 %v7559_v9  ;;  %5877 = vmatprep.subr.bf16.mxu0 %v7561_v14 }
 0xa23   :  { %5847 = vmatpush1.bf16.msra.mxu1 %v7564_v29  ;;  %5879 = vmatpush1.bf16.msra.mxu0 %v7568_v41 }
 0xa24   :  { %5849 = vmatprep.subr.bf16.mxu1 %v7572_v56  ;;  %5881 = vmatprep.subr.bf16.mxu0 %v7574_v32 }
 0xa27   :  { %5851 = vmatpush1.bf16.msra.mxu1 %v7576_v36  ;;  %5883 = vmatpush1.bf16.msra.mxu0 %v7579_v51 }
 0xa28   :  { %5885 = vmatprep.subr.bf16.mxu1 %v7488_v27  ;;  %5917 = vmatprep.subr.bf16.mxu0 %v7490_v39 }
 0xad9   :  { %v7644_v52 = vpop.f32.mrb[22].mxu1  ;;  %v7646_v55 = vpop.f32.mrb[24].mxu0 }
 0xada   :  { %v7648_v5 = vpop.f32.mrb[23].mxu1  ;;  %v7650_v12 = vpop.f32.mrb[25].mxu0 }
 0xadd   :  { %v2359_v43 = vpop.f32.mrb[24].mxu1  ;;  %v2430_v20 = vpop.f32.mrb[26].mxu0 }
 0xade   :  { %v2435_v53 = vadd.f32 %v2359_v43, %v7653_v15  ;;  %v2361_v46 = vpop.f32.mrb[25].mxu1  ;;  %v2432_v61 = vpop.f32.mrb[27].mxu0  ;;  %v2437_v43 = vadd.f32 %v2430_v20, %v7675_v18 }
 0xadf   :  { %v2436_v35 = vadd.f32 %v2361_v46, %v7656_v10  ;;  %v2438_v17 = vadd.f32 %v2432_v61, %v7666_v47 }
 0xae0   :  { %v4813_v48 = vmul.f32 -1.442695, %v2435_v53 }
 0xae1   :  { %v4814_v3 = vmul.f32 -1.442695, %v2436_v35  ;;  %v4815_v30 = vmul.f32 -1.442695, %v2438_v17 }
 0xae2   :  { %6579 = vpow2.f32 %v4813_v48 }
 0xae3   :  { %6581 = vpow2.f32 %v4814_v3 }
 0xae4   :  { %6583 = vpow2.f32 %v4815_v30  ;;  %v8209_v30 = vmov 0.0  }
 0xae5   :  { %6585 = vtanh.f32 %v2437_v43 }
 0xaec   :  { %v6580_v53 = vpop.eup %6579 }
 0xaed   :  { %v6582_v46 = vpop.eup %6581  ;;  %v2442_v33 = vadd.f32 1.0, %v6580_v53 }
 0xaee   :  { %v2448_v22 = vadd.f32 1.0, %v6582_v46  ;;  %v6584_v35 = vpop.eup %6583 }
 0xaef   :  { %6587 = vrcp.f32 %v2442_v33  ;;  %v6586_v45 = vpop.eup %6585  ;;  %v2455_v11 = vadd.f32 1.0, %v6584_v35 }
 0xaf0   :  { %6589 = vrcp.f32 %v2448_v22 }
 0xaf1   :  { %6591 = vrcp.f32 %v2455_v11 }
 0xaf9   :  { %v6588_v48 = vpop.eup %6587 }
 0xafa   :  { %v6590_v3 = vpop.eup %6589  ;;  %v2459_v61 = vmul.f32 %v6588_v48, %v6586_v45 }
 0xafb   :  { %v2458_v6 = vmul.f32 0.0, %v6590_v3  ;;  %v6592_v20 = vpop.eup %6591 }
 0xafd   :  { %v7678_v1 = vadd.f32 %v2459_v61, %v2458_v6 }
 0xaff   :  { %6593 = vtanh.f32 %v7678_v1 }
 0xb09   :  { %v6594_v17 = vpop.eup %6593 }
 0xb0a   :  { %v2462_v53 = vmul.f32 %v6594_v17, %v6592_v20 }
 0xb0c   :  { %2463 = vst [vmem:[#allocation2] sm:$0x3] %v2462_v53  ;;  %2529 = vmatmul.mubr.f32.vlgmr.msra.gmra.mrb[26].mxu1 %v2462_v53  ;;  %2600 = vmatmul.mubr.f32.vlgmr.msra.gmra.mrb[28].mxu0 %v2462_v53 }
 0xb0d   :  { %5887 = vmatpush1.bf16.msra.mxu1 %v7492_v57  ;;  %5919 = vmatpush1.bf16.msra.mxu0 %v7495_v49 }
 0xb0e   :  { %5889 = vmatprep.subr.bf16.mxu1 %v7500_v28  ;;  %5921 = vmatprep.subr.bf16.mxu0 %v7502_v34 }
 0xb0f   :  { %2717 = vmatprep.mubr.f32.mxu1 %v8209_v30  ;;  %2788 = vmatprep.mubr.f32.mxu0 %v8209_v30 }
 0xb11   :  { %5891 = vmatpush1.bf16.msra.mxu1 %v7504_v16  ;;  %5923 = vmatpush1.bf16.msra.mxu0 %v7507_v0 }
 0xb12   :  { %5893 = vmatprep.subr.bf16.mxu1 %v7512_v23  ;;  %5925 = vmatprep.subr.bf16.mxu0 %v7514_v62 }
 0xb15   :  { %5895 = vmatpush1.bf16.msra.mxu1 %v7516_v63  ;;  %5927 = vmatpush1.bf16.msra.mxu0 %v7519_v13 }
 0xb16   :  { %5897 = vmatprep.subr.bf16.mxu1 %v7524_v25  ;;  %5929 = vmatprep.subr.bf16.mxu0 %v7526_v37 }
 0xb19   :  { %5899 = vmatpush1.bf16.msra.mxu1 %v7528_v38  ;;  %5931 = vmatpush1.bf16.msra.mxu0 %v7531_v50 }
 0xb1a   :  { %5901 = vmatprep.subr.bf16.mxu1 %v7536_v4  ;;  %5933 = vmatprep.subr.bf16.mxu0 %v7538_v24 }
 0xb1d   :  { %5903 = vmatpush1.bf16.msra.mxu1 %v7540_v31  ;;  %5935 = vmatpush1.bf16.msra.mxu0 %v7543_v54 }
 0xb1e   :  { %5905 = vmatprep.subr.bf16.mxu1 %v7548_v58  ;;  %5937 = vmatprep.subr.bf16.mxu0 %v7550_v44 }
 0xb21   :  { %5907 = vmatpush1.bf16.msra.mxu1 %v7552_v19  ;;  %5939 = vmatpush1.bf16.msra.mxu0 %v7555_v60 }
 0xb22   :  { %5909 = vmatprep.subr.bf16.mxu1 %v7559_v9  ;;  %5941 = vmatprep.subr.bf16.mxu0 %v7561_v14 }
 0xb25   :  { %5911 = vmatpush1.bf16.msra.mxu1 %v7564_v29  ;;  %5943 = vmatpush1.bf16.msra.mxu0 %v7568_v41 }
 0xb26   :  { %5913 = vmatprep.subr.bf16.mxu1 %v7572_v56  ;;  %5945 = vmatprep.subr.bf16.mxu0 %v7574_v32 }
 0xb29   :  { %5915 = vmatpush1.bf16.msra.mxu1 %v7576_v36  ;;  %5947 = vmatpush1.bf16.msra.mxu0 %v7579_v51 }
 0xb2a   :  { %5949 = vmatprep.subr.bf16.mxu1 %v7488_v27  ;;  %5981 = vmatprep.subr.bf16.mxu0 %v7490_v39 }
 0xbdf   :  { %v2530_v6 = vpop.f32.mrb[26].mxu1  ;;  %v2601_v43 = vpop.f32.mrb[28].mxu0 }
 0xbe0   :  { %v2610_v46 = vrot.slane %v2530_v6, 6  ;;  %v2532_v33 = vpop.f32.mrb[27].mxu1  ;;  %v2603_v22 = vpop.f32.mrb[29].mxu0  ;;  %v2612_v17 = vrot.slane %v2601_v43, 6 }
 0xbe1   :  { %v2611_v35 = vrot.slane %v2532_v33, 6  ;;  %v2613_v11 = vrot.slane %v2603_v22, 6  ;;  %v2642_v22 = vrot.slane %v7678_v1, 6 }
 0xbe2   :  { %v2618_v45 = vadd.f32 %v2610_v46, %v7653_v15  ;;  %v2620_v59 = vadd.f32 %v2612_v17, %v7675_v18 }
 0xbe3   :  { %v2619_v48 = vadd.f32 %v2611_v35, %v7656_v10  ;;  %v2621_v20 = vadd.f32 %v2613_v11, %v7666_v47 }
 0xbe4   :  { %v4816_v3 = vmul.f32 -1.442695, %v2618_v45 }
 0xbe5   :  { %v4817_v61 = vmul.f32 -1.442695, %v2619_v48  ;;  %v4818_v53 = vmul.f32 -1.442695, %v2621_v20 }
 0xbe6   :  { %6595 = vpow2.f32 %v4816_v3 }
 0xbe7   :  { %6597 = vpow2.f32 %v4817_v61 }
 0xbe8   :  { %6599 = vpow2.f32 %v4818_v53 }
 0xbe9   :  { %6601 = vtanh.f32 %v2620_v59 }
 0xbf0   :  { %v6596_v2 = vpop.eup %6595 }
 0xbf1   :  { %v6598_v6 = vpop.eup %6597  ;;  %v2625_v40 = vadd.f32 1.0, %v6596_v2 }
 0xbf2   :  { %v2631_v33 = vadd.f32 1.0, %v6598_v6  ;;  %v6600_v46 = vpop.eup %6599 }
 0xbf3   :  { %6603 = vrcp.f32 %v2625_v40  ;;  %v6602_v35 = vpop.eup %6601  ;;  %v2638_v61 = vadd.f32 1.0, %v6600_v46 }
 0xbf4   :  { %6605 = vrcp.f32 %v2631_v33 }
 0xbf5   :  { %6607 = vrcp.f32 %v2638_v61 }
 0xbfd   :  { %v6604_v45 = vpop.eup %6603 }
 0xbfe   :  { %v6606_v48 = vpop.eup %6605  ;;  %v2645_v3 = vmul.f32 %v6604_v45, %v6602_v35 }
 0xbff   :  { %v2644_v43 = vmul.f32 %v6606_v48, %v2642_v22  ;;  %v6608_v2 = vpop.eup %6607 }
 0xc01   :  { %v7720_v11 = vadd.f32 %v2645_v3, %v2644_v43 }
 0xc03   :  { %6609 = vtanh.f32 %v7720_v11 }
 0xc0d   :  { %v6610_v20 = vpop.eup %6609 }
 0xc0e   :  { %v2648_v59 = vmul.f32 %v6610_v20, %v6608_v2 }
 0xc10   :  { %2649 = vst [vmem:[#allocation2] sm:$0xc] %v2648_v59  ;;  %v2651_v40 = vrot.slane %v2648_v59, 2 }
 0xc12   :  { %2718 = vmatmul.mubr.f32.vlgmr.msra.gmra.mrb[28].mxu1 %v2651_v40  ;;  %2789 = vmatmul.mubr.f32.vlgmr.msra.gmra.mrb[30].mxu0 %v2651_v40 }
 0xc13   :  { %5951 = vmatpush1.bf16.msra.mxu1 %v7492_v57  ;;  %5983 = vmatpush1.bf16.msra.mxu0 %v7495_v49 }
 0xc14   :  { %5953 = vmatprep.subr.bf16.mxu1 %v7500_v28  ;;  %5985 = vmatprep.subr.bf16.mxu0 %v7502_v34 }
 0xc15   :  { %2906 = vmatprep.mubr.f32.mxu1 %v8209_v30  ;;  %2977 = vmatprep.mubr.f32.mxu0 %v8209_v30 }
 0xc17   :  { %5955 = vmatpush1.bf16.msra.mxu1 %v7504_v16  ;;  %5987 = vmatpush1.bf16.msra.mxu0 %v7507_v0 }
 0xc18   :  { %5957 = vmatprep.subr.bf16.mxu1 %v7512_v23  ;;  %5989 = vmatprep.subr.bf16.mxu0 %v7514_v62 }
 0xc1b   :  { %5959 = vmatpush1.bf16.msra.mxu1 %v7516_v63  ;;  %5991 = vmatpush1.bf16.msra.mxu0 %v7519_v13 }
 0xc1c   :  { %5961 = vmatprep.subr.bf16.mxu1 %v7524_v25  ;;  %5993 = vmatprep.subr.bf16.mxu0 %v7526_v37 }
 0xc1f   :  { %5963 = vmatpush1.bf16.msra.mxu1 %v7528_v38  ;;  %5995 = vmatpush1.bf16.msra.mxu0 %v7531_v50 }
 0xc20   :  { %5965 = vmatprep.subr.bf16.mxu1 %v7536_v4  ;;  %5997 = vmatprep.subr.bf16.mxu0 %v7538_v24 }
 0xc23   :  { %5967 = vmatpush1.bf16.msra.mxu1 %v7540_v31  ;;  %5999 = vmatpush1.bf16.msra.mxu0 %v7543_v54 }
 0xc24   :  { %5969 = vmatprep.subr.bf16.mxu1 %v7548_v58  ;;  %6001 = vmatprep.subr.bf16.mxu0 %v7550_v44 }
 0xc27   :  { %5971 = vmatpush1.bf16.msra.mxu1 %v7552_v19  ;;  %6003 = vmatpush1.bf16.msra.mxu0 %v7555_v60 }
 0xc28   :  { %5973 = vmatprep.subr.bf16.mxu1 %v7559_v9  ;;  %6005 = vmatprep.subr.bf16.mxu0 %v7561_v14 }
 0xc2b   :  { %5975 = vmatpush1.bf16.msra.mxu1 %v7564_v29  ;;  %6007 = vmatpush1.bf16.msra.mxu0 %v7568_v41 }
 0xc2c   :  { %5977 = vmatprep.subr.bf16.mxu1 %v7572_v56  ;;  %6009 = vmatprep.subr.bf16.mxu0 %v7574_v32 }
 0xc2f   :  { %5979 = vmatpush1.bf16.msra.mxu1 %v7576_v36  ;;  %6011 = vmatpush1.bf16.msra.mxu0 %v7579_v51 }
 0xc30   :  { %6013 = vmatprep.subr.bf16.mxu1 %v7488_v27  ;;  %6045 = vmatprep.subr.bf16.mxu0 %v7490_v39 }
 0xce5   :  { %v2719_v1 = vpop.f32.mrb[28].mxu1  ;;  %v2790_v17 = vpop.f32.mrb[30].mxu0 }
 0xce6   :  { %v2799_v53 = vrot.slane %v2719_v1, 4  ;;  %v2721_v6 = vpop.f32.mrb[29].mxu1  ;;  %v2792_v33 = vpop.f32.mrb[31].mxu0  ;;  %v2801_v43 = vrot.slane %v2790_v17, 4 }
 0xce7   :  { %v2800_v46 = vrot.slane %v2721_v6, 4  ;;  %v2802_v3 = vrot.slane %v2792_v33, 4  ;;  %v2831_v33 = vrot.slane %v7720_v11, 6 }
 0xce8   :  { %v2807_v35 = vadd.f32 %v2799_v53, %v7653_v15  ;;  %v2809_v20 = vadd.f32 %v2801_v43, %v7675_v18 }
 0xce9   :  { %v2808_v45 = vadd.f32 %v2800_v46, %v7656_v10  ;;  %v2810_v61 = vadd.f32 %v2802_v3, %v7666_v47 }
 0xcea   :  { %v4819_v22 = vmul.f32 -1.442695, %v2807_v35 }
 0xceb   :  { %v4820_v48 = vmul.f32 -1.442695, %v2808_v45  ;;  %v4821_v2 = vmul.f32 -1.442695, %v2810_v61 }
 0xcec   :  { %6611 = vpow2.f32 %v4819_v22 }
 0xced   :  { %6613 = vpow2.f32 %v4820_v48 }
 0xcee   :  { %6615 = vpow2.f32 %v4821_v2 }
 0xcef   :  { %6617 = vtanh.f32 %v2809_v20 }
 0xcf6   :  { %v6612_v59 = vpop.eup %6611 }
 0xcf7   :  { %v6614_v40 = vpop.eup %6613  ;;  %v2814_v1 = vadd.f32 1.0, %v6612_v59 }
 0xcf8   :  { %v2820_v6 = vadd.f32 1.0, %v6614_v40  ;;  %v6616_v53 = vpop.eup %6615 }
 0xcf9   :  { %6619 = vrcp.f32 %v2814_v1  ;;  %v6618_v46 = vpop.eup %6617  ;;  %v2827_v48 = vadd.f32 1.0, %v6616_v53 }
 0xcfa   :  { %6621 = vrcp.f32 %v2820_v6 }
 0xcfb   :  { %6623 = vrcp.f32 %v2827_v48 }
 0xd03   :  { %v6620_v35 = vpop.eup %6619 }
 0xd04   :  { %v6622_v45 = vpop.eup %6621  ;;  %v2834_v22 = vmul.f32 %v6620_v35, %v6618_v46 }
 0xd05   :  { %v2833_v17 = vmul.f32 %v6622_v45, %v2831_v33  ;;  %v6624_v61 = vpop.eup %6623 }
 0xd07   :  { %v7762_v3 = vadd.f32 %v2834_v22, %v2833_v17 }
 0xd09   :  { %6625 = vtanh.f32 %v7762_v3 }
 0xd13   :  { %v6626_v43 = vpop.eup %6625 }
 0xd14   :  { %v2837_v2 = vmul.f32 %v6626_v43, %v6624_v61 }
 0xd16   :  { %2838 = vst [vmem:[#allocation2] sm:$0x30] %v2837_v2  ;;  %v2840_v20 = vrot.slane %v2837_v2, 4 }
 0xd18   :  { %2907 = vmatmul.mubr.f32.vlgmr.msra.gmra.mrb[30].mxu1 %v2840_v20  ;;  %2978 = vmatmul.mubr.f32.vlgmr.msra.gmra.mrb[32].mxu0 %v2840_v20 }
 0xd19   :  { %6015 = vmatpush1.bf16.msra.mxu1 %v7492_v57  ;;  %6047 = vmatpush1.bf16.msra.mxu0 %v7495_v49 }
 0xd1a   :  { %6017 = vmatprep.subr.bf16.mxu1 %v7500_v28  ;;  %6049 = vmatprep.subr.bf16.mxu0 %v7502_v34 }
 0xd1b   :  { %3095 = vmatprep.mubr.f32.mxu1 %v8209_v30  ;;  %3166 = vmatprep.mubr.f32.mxu0 %v8209_v30 }
 0xd1d   :  { %6019 = vmatpush1.bf16.msra.mxu1 %v7504_v16  ;;  %6051 = vmatpush1.bf16.msra.mxu0 %v7507_v0 }
 0xd1e   :  { %6021 = vmatprep.subr.bf16.mxu1 %v7512_v23  ;;  %6053 = vmatprep.subr.bf16.mxu0 %v7514_v62 }
 0xd21   :  { %6023 = vmatpush1.bf16.msra.mxu1 %v7516_v63  ;;  %6055 = vmatpush1.bf16.msra.mxu0 %v7519_v13 }
 0xd22   :  { %6025 = vmatprep.subr.bf16.mxu1 %v7524_v25  ;;  %6057 = vmatprep.subr.bf16.mxu0 %v7526_v37 }
 0xd25   :  { %6027 = vmatpush1.bf16.msra.mxu1 %v7528_v38  ;;  %6059 = vmatpush1.bf16.msra.mxu0 %v7531_v50 }
 0xd26   :  { %6029 = vmatprep.subr.bf16.mxu1 %v7536_v4  ;;  %6061 = vmatprep.subr.bf16.mxu0 %v7538_v24 }
 0xd29   :  { %6031 = vmatpush1.bf16.msra.mxu1 %v7540_v31  ;;  %6063 = vmatpush1.bf16.msra.mxu0 %v7543_v54 }
 0xd2a   :  { %6033 = vmatprep.subr.bf16.mxu1 %v7548_v58  ;;  %6065 = vmatprep.subr.bf16.mxu0 %v7550_v44 }
 0xd2d   :  { %6035 = vmatpush1.bf16.msra.mxu1 %v7552_v19  ;;  %6067 = vmatpush1.bf16.msra.mxu0 %v7555_v60 }
 0xd2e   :  { %6037 = vmatprep.subr.bf16.mxu1 %v7559_v9  ;;  %6069 = vmatprep.subr.bf16.mxu0 %v7561_v14 }
 0xd31   :  { %6039 = vmatpush1.bf16.msra.mxu1 %v7564_v29  ;;  %6071 = vmatpush1.bf16.msra.mxu0 %v7568_v41 }
 0xd32   :  { %6041 = vmatprep.subr.bf16.mxu1 %v7572_v56  ;;  %6073 = vmatprep.subr.bf16.mxu0 %v7574_v32 }
 0xd35   :  { %6043 = vmatpush1.bf16.msra.mxu1 %v7576_v36  ;;  %6075 = vmatpush1.bf16.msra.mxu0 %v7579_v51 }
 0xd36   :  { %6077 = vmatprep.subr.bf16.mxu1 %v7488_v27  ;;  %6109 = vmatprep.subr.bf16.mxu0 %v7490_v39 }
 0xdeb   :  { %v2908_v11 = vpop.f32.mrb[30].mxu1  ;;  %v2979_v59 = vpop.f32.mrb[32].mxu0 }
 0xdec   :  { %v2988_v40 = vrot.slane %v2908_v11, 2  ;;  %v2910_v1 = vpop.f32.mrb[31].mxu1  ;;  %v2981_v6 = vpop.f32.mrb[33].mxu0  ;;  %v2990_v17 = vrot.slane %v2979_v59, 2 }
 0xded   :  { %v2989_v53 = vrot.slane %v2910_v1, 2  ;;  %v2991_v22 = vrot.slane %v2981_v6, 2  ;;  %v3020_v6 = vrot.slane %v7762_v3, 6  ;;  %v7843_v3 = vadd.f32 %v7644_v52, %v7638_v26 }
 0xdee   :  { %v2996_v46 = vadd.f32 %v2988_v40, %v7653_v15  ;;  %v2998_v43 = vadd.f32 %v2990_v17, %v7675_v18 }
 0xdef   :  { %v2997_v35 = vadd.f32 %v2989_v53, %v7656_v10  ;;  %v2999_v48 = vadd.f32 %v2991_v22, %v7666_v47 }
 0xdf0   :  { %v4822_v33 = vmul.f32 -1.442695, %v2996_v46 }
 0xdf1   :  { %v4823_v45 = vmul.f32 -1.442695, %v2997_v35  ;;  %v4824_v61 = vmul.f32 -1.442695, %v2999_v48  ;;  %v7847_v48 = vadd.f32 %v7648_v5, %v7642_v42  ;;  %v7858_v42 = vadd.f32 %v7646_v55, %v7670_v8 }
 0xdf2   :  { %6627 = vpow2.f32 %v4822_v33 }
 0xdf3   :  { %6629 = vpow2.f32 %v4823_v45 }
 0xdf4   :  { %6631 = vpow2.f32 %v4824_v61 }
 0xdf5   :  { %6633 = vtanh.f32 %v2998_v43 }
 0xdfc   :  { %v6628_v2 = vpop.eup %6627 }
 0xdfd   :  { %v6630_v20 = vpop.eup %6629  ;;  %v3003_v11 = vadd.f32 1.0, %v6628_v2 }
 0xdfe   :  { %v3009_v1 = vadd.f32 1.0, %v6630_v20  ;;  %v6632_v15 = vpop.eup %6631 }
 0xdff   :  { %6635 = vrcp.f32 %v3003_v11  ;;  %v6634_v10 = vpop.eup %6633  ;;  %v3016_v47 = vadd.f32 1.0, %v6632_v15 }
 0xe00   :  { %6637 = vrcp.f32 %v3009_v1 }
 0xe01   :  { %6639 = vrcp.f32 %v3016_v47 }
 0xe09   :  { %v6636_v40 = vpop.eup %6635 }
 0xe0a   :  { %v6638_v53 = vpop.eup %6637  ;;  %v3023_v46 = vmul.f32 %v6636_v40, %v6634_v10  ;;  %v7853_v10 = vadd.f32 %v7650_v12, %v7661_v21 }
 0xe0b   :  { %v3022_v59 = vmul.f32 %v6638_v53, %v3020_v6  ;;  %v6640_v18 = vpop.eup %6639 }
 0xe0d   :  { %v7804_v35 = vadd.f32 %v3023_v46, %v3022_v59 }
 0xe0f   :  { %6641 = vtanh.f32 %v7804_v35  ;;  %v3197_v59 = vrot.slane %v7804_v35, 6 }
 0xe19   :  { %v6642_v33 = vpop.eup %6641 }
 0xe1a   :  { %v3026_v45 = vmul.f32 %v6642_v33, %v6640_v18 }
 0xe1c   :  { %3027 = vst [vmem:[#allocation2] sm:$0xc0] %v3026_v45  ;;  %v3029_v22 = vrot.slane %v3026_v45, 6 }
 0xe1e   :  { %3096 = vmatmul.mubr.f32.vlgmr.msra.gmra.mrb[32].mxu1 %v3029_v22  ;;  %3167 = vmatmul.mubr.f32.vlgmr.msra.gmra.mrb[34].mxu0 %v3029_v22 }
 0xe1f   :  { %6079 = vmatpush1.bf16.msra.mxu1 %v7492_v57  ;;  %6111 = vmatpush1.bf16.msra.mxu0 %v7495_v49 }
 0xe20   :  { %6081 = vmatprep.subr.bf16.mxu1 %v7500_v28  ;;  %6113 = vmatprep.subr.bf16.mxu0 %v7502_v34 }
 0xe21   :  { %3269 = vmatprep.mubr.f32.mxu1 %v8209_v30  ;;  %3340 = vmatprep.mubr.f32.mxu0 %v8209_v30 }
 0xe23   :  { %6083 = vmatpush1.bf16.msra.mxu1 %v7504_v16  ;;  %6115 = vmatpush1.bf16.msra.mxu0 %v7507_v0 }
 0xe24   :  { %6085 = vmatprep.subr.bf16.mxu1 %v7512_v23  ;;  %6117 = vmatprep.subr.bf16.mxu0 %v7514_v62 }
 0xe27   :  { %6087 = vmatpush1.bf16.msra.mxu1 %v7516_v63  ;;  %6119 = vmatpush1.bf16.msra.mxu0 %v7519_v13 }
 0xe28   :  { %6089 = vmatprep.subr.bf16.mxu1 %v7524_v25  ;;  %6121 = vmatprep.subr.bf16.mxu0 %v7526_v37 }
 0xe2b   :  { %6091 = vmatpush1.bf16.msra.mxu1 %v7528_v38  ;;  %6123 = vmatpush1.bf16.msra.mxu0 %v7531_v50 }
 0xe2c   :  { %6093 = vmatprep.subr.bf16.mxu1 %v7536_v4  ;;  %6125 = vmatprep.subr.bf16.mxu0 %v7538_v24 }
 0xe2f   :  { %6095 = vmatpush1.bf16.msra.mxu1 %v7540_v31  ;;  %6127 = vmatpush1.bf16.msra.mxu0 %v7543_v54 }
 0xe30   :  { %6097 = vmatprep.subr.bf16.mxu1 %v7548_v58  ;;  %6129 = vmatprep.subr.bf16.mxu0 %v7550_v44 }
 0xe33   :  { %6099 = vmatpush1.bf16.msra.mxu1 %v7552_v19  ;;  %6131 = vmatpush1.bf16.msra.mxu0 %v7555_v60 }
 0xe34   :  { %6101 = vmatprep.subr.bf16.mxu1 %v7559_v9  ;;  %6133 = vmatprep.subr.bf16.mxu0 %v7561_v14 }
 0xe37   :  { %6103 = vmatpush1.bf16.msra.mxu1 %v7564_v29  ;;  %6135 = vmatpush1.bf16.msra.mxu0 %v7568_v41 }
 0xe38   :  { %6105 = vmatprep.subr.bf16.mxu1 %v7572_v56  ;;  %6137 = vmatprep.subr.bf16.mxu0 %v7574_v32 }
 0xe3b   :  { %6107 = vmatpush1.bf16.msra.mxu1 %v7576_v36  ;;  %6139 = vmatpush1.bf16.msra.mxu0 %v7579_v51 }
 0xe3c   :  { %6141 = vmatprep.subr.bf16.mxu1 %v7488_v27  ;;  %6173 = vmatprep.subr.bf16.mxu0 %v7490_v39 }
 0xef1   :  { %v3097_v17 = vpop.f32.mrb[32].mxu1  ;;  %v3168_v61 = vpop.f32.mrb[34].mxu0 }
 0xef2   :  { %v3173_v43 = vadd.f32 %v3097_v17, %v7843_v3  ;;  %v3099_v2 = vpop.f32.mrb[33].mxu1  ;;  %v3170_v20 = vpop.f32.mrb[35].mxu0  ;;  %v3175_v5 = vadd.f32 %v3168_v61, %v7858_v42 }
 0xef3   :  { %v3174_v11 = vadd.f32 %v3099_v2, %v7847_v48  ;;  %v3176_v26 = vadd.f32 %v3170_v20, %v7853_v10 }
 0xef4   :  { %v4825_v1 = vmul.f32 -1.442695, %v3173_v43 }
 0xef5   :  { %v4826_v15 = vmul.f32 -1.442695, %v3174_v11  ;;  %v4827_v52 = vmul.f32 -1.442695, %v3176_v26 }
 0xef6   :  { %6643 = vpow2.f32 %v4825_v1 }
 0xef7   :  { %6645 = vpow2.f32 %v4826_v15 }
 0xef8   :  { %6647 = vpow2.f32 %v4827_v52 }
 0xef9   :  { %6649 = vtanh.f32 %v3175_v5 }
 0xf00   :  { %v6644_v40 = vpop.eup %6643 }
 0xf01   :  { %v6646_v6 = vpop.eup %6645  ;;  %v3180_v53 = vadd.f32 1.0, %v6644_v40 }
 0xf02   :  { %v3186_v46 = vadd.f32 1.0, %v6646_v6  ;;  %v6648_v12 = vpop.eup %6647 }
 0xf03   :  { %6651 = vrcp.f32 %v3180_v53  ;;  %v6650_v21 = vpop.eup %6649  ;;  %v3193_v55 = vadd.f32 1.0, %v6648_v12 }
 0xf04   :  { %6653 = vrcp.f32 %v3186_v46 }
 0xf05   :  { %6655 = vrcp.f32 %v3193_v55 }
 0xf0d   :  { %v6652_v47 = vpop.eup %6651 }
 0xf0e   :  { %v6654_v18 = vpop.eup %6653  ;;  %v3200_v33 = vmul.f32 %v6652_v47, %v6650_v21 }
 0xf0f   :  { %v3199_v8 = vmul.f32 %v6654_v18, %v3197_v59  ;;  %v6656_v22 = vpop.eup %6655 }
 0xf11   :  { %v7862_v45 = vadd.f32 %v3200_v33, %v3199_v8 }
 0xf13   :  { %6657 = vtanh.f32 %v7862_v45  ;;  %v3383_v55 = vrot.slane %v7862_v45, 6 }
 0xf1d   :  { %v6658_v17 = vpop.eup %6657 }
 0xf1e   :  { %v3203_v61 = vmul.f32 %v6658_v17, %v6656_v22 }
 0xf20   :  { %3204 = vst [vmem:[#allocation2 + $0x8] sm:$0x3] %v3203_v61  ;;  %3270 = vmatmul.mubr.f32.vlgmr.msra.gmra.mrb[34].mxu1 %v3203_v61  ;;  %3341 = vmatmul.mubr.f32.vlgmr.msra.gmra.mrb[36].mxu0 %v3203_v61 }
 0xf21   :  { %6143 = vmatpush1.bf16.msra.mxu1 %v7492_v57  ;;  %6175 = vmatpush1.bf16.msra.mxu0 %v7495_v49 }
 0xf22   :  { %6145 = vmatprep.subr.bf16.mxu1 %v7500_v28  ;;  %6177 = vmatprep.subr.bf16.mxu0 %v7502_v34 }
 0xf23   :  { %3458 = vmatprep.mubr.f32.mxu1 %v8209_v30  ;;  %3529 = vmatprep.mubr.f32.mxu0 %v8209_v30 }
 0xf25   :  { %6147 = vmatpush1.bf16.msra.mxu1 %v7504_v16  ;;  %6179 = vmatpush1.bf16.msra.mxu0 %v7507_v0 }
 0xf26   :  { %6149 = vmatprep.subr.bf16.mxu1 %v7512_v23  ;;  %6181 = vmatprep.subr.bf16.mxu0 %v7514_v62 }
 0xf29   :  { %6151 = vmatpush1.bf16.msra.mxu1 %v7516_v63  ;;  %6183 = vmatpush1.bf16.msra.mxu0 %v7519_v13 }
 0xf2a   :  { %6153 = vmatprep.subr.bf16.mxu1 %v7524_v25  ;;  %6185 = vmatprep.subr.bf16.mxu0 %v7526_v37 }
 0xf2d   :  { %6155 = vmatpush1.bf16.msra.mxu1 %v7528_v38  ;;  %6187 = vmatpush1.bf16.msra.mxu0 %v7531_v50 }
 0xf2e   :  { %6157 = vmatprep.subr.bf16.mxu1 %v7536_v4  ;;  %6189 = vmatprep.subr.bf16.mxu0 %v7538_v24 }
 0xf31   :  { %6159 = vmatpush1.bf16.msra.mxu1 %v7540_v31  ;;  %6191 = vmatpush1.bf16.msra.mxu0 %v7543_v54 }
 0xf32   :  { %6161 = vmatprep.subr.bf16.mxu1 %v7548_v58  ;;  %6193 = vmatprep.subr.bf16.mxu0 %v7550_v44 }
 0xf35   :  { %6163 = vmatpush1.bf16.msra.mxu1 %v7552_v19  ;;  %6195 = vmatpush1.bf16.msra.mxu0 %v7555_v60 }
 0xf36   :  { %6165 = vmatprep.subr.bf16.mxu1 %v7559_v9  ;;  %6197 = vmatprep.subr.bf16.mxu0 %v7561_v14 }
 0xf39   :  { %6167 = vmatpush1.bf16.msra.mxu1 %v7564_v29  ;;  %6199 = vmatpush1.bf16.msra.mxu0 %v7568_v41 }
 0xf3a   :  { %6169 = vmatprep.subr.bf16.mxu1 %v7572_v56  ;;  %6201 = vmatprep.subr.bf16.mxu0 %v7574_v32 }
 0xf3d   :  { %6171 = vmatpush1.bf16.msra.mxu1 %v7576_v36  ;;  %6203 = vmatpush1.bf16.msra.mxu0 %v7579_v51 }
 0xf3e   :  { %6205 = vmatprep.subr.bf16.mxu1 %v7488_v27  ;;  %6237 = vmatprep.subr.bf16.mxu0 %v7490_v39 }
 0xff3   :  { %v3271_v35 = vpop.f32.mrb[34].mxu1  ;;  %v3342_v43 = vpop.f32.mrb[36].mxu0 }
 0xff4   :  { %v3351_v2 = vrot.slane %v3271_v35, 6  ;;  %v3273_v20 = vpop.f32.mrb[35].mxu1  ;;  %v3344_v11 = vpop.f32.mrb[37].mxu0  ;;  %v3353_v27 = vrot.slane %v3342_v43, 6 }
 0xff5   :  { %v3352_v1 = vrot.slane %v3273_v20, 6  ;;  %v3354_v40 = vrot.slane %v3344_v11, 6 }
 0xff6   :  { %v3359_v15 = vadd.f32 %v3351_v2, %v7843_v3  ;;  %v3361_v39 = vadd.f32 %v3353_v27, %v7858_v42  ;;  %v3782_v27 = vld [vmem:[#allocation8 + $0x28] sm:$0xff] }
 0xff7   :  { %v3360_v26 = vadd.f32 %v3352_v1, %v7847_v48  ;;  %v3362_v6 = vadd.f32 %v3354_v40, %v7853_v10 }
 0xff8   :  { %v4828_v52 = vmul.f32 -1.442695, %v3359_v15  ;;  %v6880_v15 = vmov 0.0|0.0  }
 0xff9   :  { %v4829_v5 = vmul.f32 -1.442695, %v3360_v26  ;;  %v4830_v53 = vmul.f32 -1.442695, %v3362_v6  ;;  %v3778_v26 = vld [vmem:[#allocation8 + $0x8] sm:$0xff]  ;;  %v3779_v6 = vld [vmem:[#allocation8 + $0x10] sm:$0xff] }
 0xffa   :  { %6659 = vpow2.f32 %v4828_v52  ;;  %v3780_v52 = vld [vmem:[#allocation8 + $0x18] sm:$0xff] }
 0xffb   :  { %6661 = vpow2.f32 %v4829_v5  ;;  %v3777_v5 = vld [vmem:[#allocation8] sm:$0xff]  ;;  %v7951_v40 = vpack.c.bf16 %v3780_v52, %v3778_v26 }
 0xffc   :  { %6663 = vpow2.f32 %v4830_v53  ;;  %v3784_v53 = vld [vmem:[#allocation8 + $0x38] sm:$0xff] }
 0xffd   :  { %6665 = vtanh.f32 %v3361_v39  ;;  %v7953_v39 = vpack.c.bf16 %v3779_v6, %v3777_v5 }
0x1004   :  { %v6660_v46 = vpop.eup %6659 }
0x1005   :  { %v6662_v12 = vpop.eup %6661  ;;  %v3366_v21 = vadd.f32 1.0, %v6660_v46  ;;  %v7955_v46 = vpack.c.bf16 %v3784_v53, %v3782_v27 }
0x1006   :  { %v3372_v47 = vadd.f32 1.0, %v6662_v12  ;;  %v6664_v59 = vpop.eup %6663  ;;  %v3781_v12 = vld [vmem:[#allocation8 + $0x20] sm:$0xff] }
0x1007   :  { %6667 = vrcp.f32 %v3366_v21  ;;  %v6666_v18 = vpop.eup %6665  ;;  %v3379_v17 = vadd.f32 1.0, %v6664_v59  ;;  %v3783_v21 = vld [vmem:[#allocation8 + $0x30] sm:$0xff]  ;;  %v3788_v59 = vld [vmem:[#allocation8 + $0x58] sm:$0xff] }
0x1008   :  { %6669 = vrcp.f32 %v3372_v47  ;;  %v3786_v47 = vld [vmem:[#allocation8 + $0x48] sm:$0xff] }
0x1009   :  { %6671 = vrcp.f32 %v3379_v17  ;;  %v3792_v17 = vld [vmem:[#allocation8 + $0x78] sm:$0xff] }
0x1011   :  { %v6668_v33 = vpop.eup %6667 }
0x1012   :  { %v6670_v8 = vpop.eup %6669  ;;  %v3386_v22 = vmul.f32 %v6668_v33, %v6666_v18  ;;  %v7959_v18 = vpack.c.bf16 %v3783_v21, %v3781_v12  ;;  %v7962_v33 = vpack.c.bf16 %v3788_v59, %v3786_v47 }
0x1013   :  { %v3385_v61 = vmul.f32 %v6670_v8, %v3383_v55  ;;  %v6672_v43 = vpop.eup %6671  ;;  %v3785_v55 = vld [vmem:[#allocation8 + $0x40] sm:$0xff]  ;;  %v3787_v8 = vld [vmem:[#allocation8 + $0x50] sm:$0xff] }
0x1015   :  { %v7904_v35 = vadd.f32 %v3386_v22, %v3385_v61  ;;  %v3790_v22 = vld [vmem:[#allocation8 + $0x68] sm:$0xff]  ;;  %v7965_v61 = vpack.c.bf16 %v3787_v8, %v3785_v55 }
0x1017   :  { %6673 = vtanh.f32 %v7904_v35 }
0x1021   :  { %v6674_v2 = vpop.eup %6673 }
0x1022   :  { %v3389_v20 = vmul.f32 %v6674_v2, %v6672_v43  ;;  %v3789_v43 = vld [vmem:[#allocation8 + $0x60] sm:$0xff]  ;;  %v3791_v2 = vld [vmem:[#allocation8 + $0x70] sm:$0xff] }
0x1024   :  { %3390 = vst [vmem:[#allocation2 + $0x8] sm:$0xc] %v3389_v20  ;;  %v3392_v11 = vrot.slane %v3389_v20, 2  ;;  %v3794_v20 = vld [vmem:[#allocation8 + $0x88] sm:$0xff] }
0x1026   :  { %3459 = vmatmul.mubr.f32.vlgmr.msra.gmra.mrb[36].mxu1 %v3392_v11  ;;  %3530 = vmatmul.mubr.f32.vlgmr.msra.gmra.mrb[38].mxu0 %v3392_v11  ;;  %v3796_v11 = vld [vmem:[#allocation8 + $0x98] sm:$0xff] }
0x1027   :  { %6207 = vmatpush1.bf16.msra.mxu1 %v7492_v57  ;;  %6239 = vmatpush1.bf16.msra.mxu0 %v7495_v49 }
0x1028   :  { %6209 = vmatprep.subr.bf16.mxu1 %v7500_v28  ;;  %6241 = vmatprep.subr.bf16.mxu0 %v7502_v34 }
0x1029   :  { %3647 = vmatprep.mubr.f32.mxu1 %v8209_v30  ;;  %3718 = vmatprep.mubr.f32.mxu0 %v8209_v30 }
0x102b   :  { %6211 = vmatpush1.bf16.msra.mxu1 %v7504_v16  ;;  %6243 = vmatpush1.bf16.msra.mxu0 %v7507_v0 }
0x102c   :  { %6213 = vmatprep.subr.bf16.mxu1 %v7512_v23  ;;  %6245 = vmatprep.subr.bf16.mxu0 %v7514_v62 }
0x102f   :  { %6215 = vmatpush1.bf16.msra.mxu1 %v7516_v63  ;;  %6247 = vmatpush1.bf16.msra.mxu0 %v7519_v13 }
0x1030   :  { %6217 = vmatprep.subr.bf16.mxu1 %v7524_v25  ;;  %6249 = vmatprep.subr.bf16.mxu0 %v7526_v37 }
0x1033   :  { %6219 = vmatpush1.bf16.msra.mxu1 %v7528_v38  ;;  %6251 = vmatpush1.bf16.msra.mxu0 %v7531_v50 }
0x1034   :  { %6221 = vmatprep.subr.bf16.mxu1 %v7536_v4  ;;  %6253 = vmatprep.subr.bf16.mxu0 %v7538_v24 }
0x1037   :  { %6223 = vmatpush1.bf16.msra.mxu1 %v7540_v31  ;;  %6255 = vmatpush1.bf16.msra.mxu0 %v7543_v54 }
0x1038   :  { %6225 = vmatprep.subr.bf16.mxu1 %v7548_v58  ;;  %6257 = vmatprep.subr.bf16.mxu0 %v7550_v44 }
0x103b   :  { %6227 = vmatpush1.bf16.msra.mxu1 %v7552_v19  ;;  %6259 = vmatpush1.bf16.msra.mxu0 %v7555_v60 }
0x103c   :  { %6229 = vmatprep.subr.bf16.mxu1 %v7559_v9  ;;  %6261 = vmatprep.subr.bf16.mxu0 %v7561_v14  ;;  %v3572_v9 = vrot.slane %v7904_v35, 6  ;;  %v7968_v35 = vpack.c.bf16 %v3792_v17, %v3790_v22 }
0x103f   :  { %6231 = vmatpush1.bf16.msra.mxu1 %v7564_v29  ;;  %6263 = vmatpush1.bf16.msra.mxu0 %v7568_v41 }
0x1040   :  { %6233 = vmatprep.subr.bf16.mxu1 %v7572_v56  ;;  %6265 = vmatprep.subr.bf16.mxu0 %v7574_v32 }
0x1043   :  { %6235 = vmatpush1.bf16.msra.mxu1 %v7576_v36  ;;  %6267 = vmatpush1.bf16.msra.mxu0 %v7579_v51 }
0x1044   :  { %6268 = vmatprep.subr.bf16.mxu1 %v6880_v15  ;;  %6272 = vmatprep.subr.bf16.mxu0 %v7951_v40 }
0x10f9   :  { %v3460_v57 = vpop.f32.mrb[36].mxu1  ;;  %v3531_v49 = vpop.f32.mrb[38].mxu0 }
0x10fa   :  { %v3540_v28 = vrot.slane %v3460_v57, 4  ;;  %v3462_v34 = vpop.f32.mrb[37].mxu1  ;;  %v3533_v16 = vpop.f32.mrb[39].mxu0  ;;  %v3542_v38 = vrot.slane %v3531_v49, 4  ;;  %v7971_v57 = vpack.c.bf16 %v3791_v2, %v3789_v43  ;;  %v7974_v49 = vpack.c.bf16 %v3796_v11, %v3794_v20 }
0x10fb   :  { %v3541_v0 = vrot.slane %v3462_v34, 4  ;;  %v3543_v25 = vrot.slane %v3533_v16, 4  ;;  %v3795_v34 = vld [vmem:[#allocation8 + $0x90] sm:$0xff]  ;;  %v3798_v16 = vld [vmem:[#allocation8 + $0xa8] sm:$0xff] }
0x10fc   :  { %v3548_v23 = vadd.f32 %v3540_v28, %v7843_v3  ;;  %v3550_v4 = vadd.f32 %v3542_v38, %v7858_v42  ;;  %v3793_v28 = vld [vmem:[#allocation8 + $0x80] sm:$0xff] }
0x10fd   :  { %v3549_v62 = vadd.f32 %v3541_v0, %v7847_v48  ;;  %v3551_v37 = vadd.f32 %v3543_v25, %v7853_v10  ;;  %v3800_v0 = vld [vmem:[#allocation8 + $0xb8] sm:$0xff]  ;;  %v3802_v25 = vld [vmem:[#allocation8 + $0xc8] sm:$0xff] }
0x10fe   :  { %v4831_v63 = vmul.f32 -1.442695, %v3548_v23  ;;  %v7977_v23 = vpack.c.bf16 %v3795_v34, %v3793_v28  ;;  %v3769_v34 = vld [vmem:[#allocation2] sm:$0xff] }
0x10ff   :  { %v4832_v13 = vmul.f32 -1.442695, %v3549_v62  ;;  %v4833_v50 = vmul.f32 -1.442695, %v3551_v37  ;;  %v7980_v62 = vpack.c.bf16 %v3800_v0, %v3798_v16  ;;  %v3804_v37 = vld [vmem:[#allocation8 + $0xd8] sm:$0xff]  ;;  %v3771_v16 = vadd.f32 %v3769_v34, %v7059_v7  ;;  %v3990_v7 = vld [vmem:[%s8187_s5] sm:$0xff] }
0x1100   :  { %6675 = vpow2.f32 %v4831_v63  ;;  %v3797_v63 = vld [vmem:[#allocation8 + $0xa0] sm:$0xff] }
0x1101   :  { %6677 = vpow2.f32 %v4832_v13  ;;  %v3799_v13 = vld [vmem:[#allocation8 + $0xb0] sm:$0xff]  ;;  %v3821_v34 = vld [vmem:[#allocation9 + $0x60] sm:$0xff] }
0x1102   :  { %6679 = vpow2.f32 %v4833_v50  ;;  %v7983_v38 = vpack.c.bf16 %v3799_v13, %v3797_v63  ;;  %v7986_v50 = vpack.c.bf16 %v3804_v37, %v3802_v25  ;;  %v8210_v63 = vld [vmem:[#allocation19_spill] sm:$0xff]  ;;  %v8211_v25 = vld [vmem:[#allocation18_spill] sm:$0xff] }
0x1103   :  { %6681 = vtanh.f32 %v3550_v4  ;;  %v3801_v4 = vld [vmem:[#allocation8 + $0xc0] sm:$0xff]  ;;  %v3842_v13 = vmul.u32 2, %v8210_v63 }
0x110a   :  { %v6676_v24 = vpop.eup %6675 }
0x110b   :  { %v6678_v31 = vpop.eup %6677  ;;  %v3555_v54 = vadd.f32 1.0, %v6676_v24  ;;  %v3803_v24 = vld [vmem:[#allocation8 + $0xd0] sm:$0xff] }
0x110c   :  { %v3561_v58 = vadd.f32 1.0, %v6678_v31  ;;  %v6680_v44 = vpop.eup %6679  ;;  %v3806_v31 = vld [vmem:[#allocation8 + $0xe8] sm:$0xff] }
0x110d   :  { %6683 = vrcp.f32 %v3555_v54  ;;  %v6682_v19 = vpop.eup %6681  ;;  %v3568_v41 = vadd.f32 1.0, %v6680_v44  ;;  %v3808_v54 = vld [vmem:[#allocation8 + $0xf8] sm:$0xff] }
0x110e   :  { %6685 = vrcp.f32 %v3561_v58  ;;  %v7989_v58 = vpack.c.bf16 %v3803_v24, %v3801_v4  ;;  %v7992_v44 = vpack.c.bf16 %v3808_v54, %v3806_v31  ;;  %v8212_v24 = vld [vmem:[#allocation17_spill] sm:$0xff] }
0x110f   :  { %6687 = vrcp.f32 %v3568_v41  ;;  %vm3843_vm4 = vcmp.eq.s32.totalorder %v8212_v24, %v3842_v13 }
0x1110   :  { %v4837_v54 = vsel %vm3843_vm4, 1.0, %v8209_v30 }
0x1117   :  { %v6684_v60 = vpop.eup %6683 }
0x1118   :  { %v6686_v14 = vpop.eup %6685  ;;  %v3575_v29 = vmul.f32 %v6684_v60, %v6682_v19  ;;  %v3805_v19 = vld [vmem:[#allocation8 + $0xe0] sm:$0xff]  ;;  %v3807_v60 = vld [vmem:[#allocation8 + $0xf0] sm:$0xff] }
0x1119   :  { %v3574_v56 = vmul.f32 %v6686_v14, %v3572_v9  ;;  %v6688_v36 = vpop.eup %6687  ;;  %v7995_v9 = vpack.c.bf16 %v3807_v60, %v3805_v19 }
0x111b   :  { %v7944_v32 = vadd.f32 %v3575_v29, %v3574_v56 }
0x111d   :  { %6689 = vtanh.f32 %v7944_v32  ;;  %v3761_v22 = vrot.slane %v7944_v32, 6  ;;  %v3773_v32 = vmul.f32 0.70710677, %v3771_v16  ;;  %v3822_v16 = vld [vmem:[#allocation9 + $0x68] sm:$0xff] }
0x1127   :  { %v6690_v51 = vpop.eup %6689 }
0x1128   :  { %v3578_v45 = vmul.f32 %v6690_v51, %v6688_v36 }
0x112a   :  { %3579 = vst [vmem:[#allocation2 + $0x8] sm:$0x30] %v3578_v45  ;;  %v3581_v1 = vrot.slane %v3578_v45, 4 }
0x112c   :  { %3648 = vmatmul.mubr.f32.vlgmr.msra.gmra.mrb[38].mxu1 %v3581_v1  ;;  %3719 = vmatmul.mubr.f32.vlgmr.msra.gmra.mrb[40].mxu0 %v3581_v1 }
0x112d   :  { %3983 = vmatprep.mubr.f32.mxu0 %v8209_v30  ;;  %4942 = vmatprep.mubr.msk.f32.mxu1 %vm6881_vm3, %v8209_v30 }
0x112e   :  { %6274 = vmatpush1.bf16.msra.mxu0 %v7953_v39 }
0x112f   :  { %6276 = vmatprep.subr.bf16.mxu0 %v7955_v46 }
0x1132   :  { %6278 = vmatpush1.bf16.msra.mxu0 %v7959_v18 }
0x1133   :  { %6280 = vmatprep.subr.bf16.mxu0 %v7962_v33 }
0x1136   :  { %6282 = vmatpush1.bf16.msra.mxu0 %v7965_v61 }
0x1137   :  { %6284 = vmatprep.subr.bf16.mxu0 %v7968_v35 }
0x113a   :  { %6286 = vmatpush1.bf16.msra.mxu0 %v7971_v57 }
0x113b   :  { %6288 = vmatprep.subr.bf16.mxu0 %v7974_v49 }
0x113e   :  { %6290 = vmatpush1.bf16.msra.mxu0 %v7977_v23 }
0x113f   :  { %6292 = vmatprep.subr.bf16.mxu0 %v7980_v62 }
0x1142   :  { %6294 = vmatpush1.bf16.msra.mxu0 %v7983_v38 }
0x1143   :  { %6296 = vmatprep.subr.bf16.mxu0 %v7986_v50 }
0x1146   :  { %6298 = vmatpush1.bf16.msra.mxu0 %v7989_v58 }
0x1147   :  { %6300 = vmatprep.subr.bf16.mxu0 %v7992_v44 }
0x114a   :  { %6302 = vmatpush1.bf16.msra.mxu0 %v7995_v9 }
0x114b   :  { %6327 = vmatprep.subr.bf16.mxu0 %v6880_v15 }
0x11ff   :  { %v3649_v14 = vpop.f32.mrb[38].mxu1  ;;  %v3720_v29 = vpop.f32.mrb[40].mxu0 }
0x1200   :  { %v3729_v41 = vrot.slane %v3649_v14, 2  ;;  %v3651_v56 = vpop.f32.mrb[39].mxu1  ;;  %v3722_v36 = vpop.f32.mrb[41].mxu0  ;;  %v3731_v27 = vrot.slane %v3720_v29, 2 }
0x1201   :  { %v3730_v51 = vrot.slane %v3651_v56, 2  ;;  %v3732_v5 = vrot.slane %v3722_v36, 2 }
0x1202   :  { %v3737_v45 = vadd.f32 %v3729_v41, %v7843_v3  ;;  %v3739_v12 = vadd.f32 %v3731_v27, %v7858_v42  ;;  %v3810_v27 = vld [vmem:[#allocation9 + $0x8] sm:$0xff] }
0x1203   :  { %v3738_v1 = vadd.f32 %v3730_v51, %v7847_v48  ;;  %v3740_v6 = vadd.f32 %v3732_v5, %v7853_v10 }
0x1204   :  { %v4834_v26 = vmul.f32 -1.442695, %v3737_v45 }
0x1205   :  { %v4835_v52 = vmul.f32 -1.442695, %v3738_v1  ;;  %v4836_v53 = vmul.f32 -1.442695, %v3740_v6  ;;  %v3809_v6 = vld [vmem:[#allocation9] sm:$0xff] }
0x1206   :  { %6691 = vpow2.f32 %v4834_v26 }
0x1207   :  { %6693 = vpow2.f32 %v4835_v52 }
0x1208   :  { %6695 = vpow2.f32 %v4836_v53 }
0x1209   :  { %6697 = vtanh.f32 %v3739_v12  ;;  %v8035_v12 = vpack.c.bf16 %v3810_v27, %v3809_v6 }
0x1210   :  { %v6692_v21 = vpop.eup %6691 }
0x1211   :  { %v6694_v47 = vpop.eup %6693  ;;  %v3744_v59 = vadd.f32 1.0, %v6692_v21 }
0x1212   :  { %v3750_v55 = vadd.f32 1.0, %v6694_v47  ;;  %v6696_v3 = vpop.eup %6695  ;;  %v3811_v47 = vld [vmem:[#allocation9 + $0x10] sm:$0xff] }
0x1213   :  { %6699 = vrcp.f32 %v3744_v59  ;;  %v6698_v48 = vpop.eup %6697  ;;  %v3757_v10 = vadd.f32 1.0, %v6696_v3  ;;  %v3812_v59 = vld [vmem:[#allocation9 + $0x18] sm:$0xff]  ;;  %v3813_v3 = vld [vmem:[#allocation9 + $0x20] sm:$0xff] }
0x1214   :  { %6701 = vrcp.f32 %v3750_v55  ;;  %v8039_v55 = vpack.c.bf16 %v3812_v59, %v3811_v47 }
0x1215   :  { %6703 = vrcp.f32 %v3757_v10  ;;  %v3817_v10 = vld [vmem:[#allocation9 + $0x40] sm:$0xff] }
0x121d   :  { %v6700_v8 = vpop.eup %6699 }
0x121e   :  { %v6702_v17 = vpop.eup %6701  ;;  %v3764_v43 = vmul.f32 %v6700_v8, %v6698_v48  ;;  %v3814_v48 = vld [vmem:[#allocation9 + $0x28] sm:$0xff] }
0x121f   :  { %v3763_v2 = vmul.f32 %v6702_v17, %v3761_v22  ;;  %v6704_v42 = vpop.eup %6703  ;;  %v8045_v8 = vpack.c.bf16 %v3814_v48, %v3813_v3  ;;  %v3815_v22 = vld [vmem:[#allocation9 + $0x30] sm:$0xff]  ;;  %v3816_v17 = vld [vmem:[#allocation9 + $0x38] sm:$0xff] }
0x1221   :  { %v3765_v20 = vadd.f32 %v3764_v43, %v3763_v2  ;;  %v8049_v43 = vpack.c.bf16 %v3816_v17, %v3815_v22  ;;  %v3818_v2 = vld [vmem:[#allocation9 + $0x48] sm:$0xff] }
0x1223   :  { %6705 = vtanh.f32 %v3765_v20  ;;  %v8053_v20 = vpack.c.bf16 %v3818_v2, %v3817_v10 }
0x122d   :  { %v6706_v11 = vpop.eup %6705 }
0x122e   :  { %v3767_v28 = vmul.f32 %v6706_v11, %v6704_v42  ;;  %v3819_v42 = vld [vmem:[#allocation9 + $0x50] sm:$0xff]  ;;  %v3820_v11 = vld [vmem:[#allocation9 + $0x58] sm:$0xff] }
0x1230   :  { %3768 = vst [vmem:[#allocation2 + $0x8] sm:$0xc0] %v3767_v28  ;;  %v8057_v28 = vpack.c.bf16 %v3820_v11, %v3819_v42  ;;  %v4840_v42 = vld [vmem:[%s8191_s9] ss:$0 sm:$0xff]  ;;  %s6882_s9 = smov [#allocation12]  }
0x1231   :  { %s4770_s12 = sshll.u32 %s6882_s9, 4  ;;  %s4771_s12 = int_to_ptr.vmem [resolvable:$true] %s4770_s12 }
0x1232   :  { %s6837_s13 = scalar_lea.vmem %s4771_s12, 256  ;;  %p6842_p13 = scmp.lt.s32.totalorder %s4771_s12, %s4771_s12 }
0x1233   :  { %p6838_p12 = scmp.ne.s32.totalorder %s4771_s12, %s6837_s13  ;;  %p6843_p0 = scmp.lt.s32.totalorder %s6837_s13, %s6837_s13 }
0x1235   :  { %p6844_p1 = por %p6843_p0, %p6842_p13 }
0x1237   :  { %v3770_v0 = vld [vmem:[#allocation2 + $0x8] sm:$0xff]  ;;  %p6845_p2 = pnand %p6844_p1, %p6838_p12 }
0x1238   :  { %v3772_v37 = vadd.f32 %v8211_v25, %v3770_v0  ;;  %v8061_v0 = vpack.c.bf16 %v3822_v16, %v3821_v34  ;;  %v3823_v25 = vld [vmem:[#allocation9 + $0x70] sm:$0xff] }
0x123a   :  { %v3774_v4 = vmul.f32 0.70710677, %v3772_v37  ;;  %v3824_v37 = vld [vmem:[#allocation9 + $0x78] sm:$0xff] }
0x123c   :  { %v8011_v31 = vpack.c.bf16 %v3774_v4, %v3773_v32  ;;  %v8065_v32 = vpack.c.bf16 %v3824_v37, %v3823_v25  ;;  %v3825_v4 = vld [vmem:[#allocation11] sm:$0xff] }
0x123e   :  { %6270 = vmatpush3.bf16.msra.mxu1 %v8011_v31 }
0x123f   :  { %4945 = vmatprep.subr.mxu1 %v8209_v30 }
0x1241   :  { %4943 = vmatmul.mubr.msk.f32.vlgmr.msra.gmra.mrb[40].mxu1 %vm122_vm0, %v4837_v54  ;;  %v3826_v54 = vld [vmem:[#allocation11 + $0x8] sm:$0xff] }
0x1242   :  { %4947 = vmatprep.mubr.msk.f32.mxu1 %vm6881_vm3, %v8209_v30 }
0x1247   :  { %4946 = vmatpush3.xpose.msra.mxu1 %v3990_v7 }
0x1248   :  { %4950 = vmatprep.subr.mxu1 %v8209_v30 }
0x1314   :  { %v8023_v19 = vpop.f32.mrb[40].mxu1 }
0x1315   :  { %v4944_v60 = vpop.f32.mrb[41].mxu1  ;;  %3984 = vmatmul.mubr.f32.vlgmr.msra.gmra.mrb[42].mxu0 %v8023_v19 }
0x1316   :  { %5022 = vmatprep.mubr.msk.f32.mxu0 %vm6881_vm3, %v8209_v30  ;;  %v3827_v60 = vld [vmem:[#allocation11 + $0x10] sm:$0xff] }
0x13e8   :  { %v3985_v14 = vpop.f32.mrb[42].mxu0 }
0x13e9   :  { %v8028_v29 = vpop.f32.mrb[43].mxu0  ;;  %4948 = vmatmul.mubr.f32.vlgmr.msra.gmra.mrb[42].mxu1 %v3985_v14  ;;  %v3828_v14 = vld [vmem:[#allocation11 + $0x18] sm:$0xff] }
0x13ea   :  { %4951 = vmatpush3.msra.mxu1 %v3990_v7  ;;  %4952 = vmatprep.mubr.msk.f32.mxu1 %vm6881_vm3, %v8209_v30  ;;  %v8070_v7 = vpack.c.bf16 %v3826_v54, %v3825_v4 }
0x13eb   :  { %6303 = vmatprep.subr.bf16.mxu1 %v6880_v15 }
0x13ec   :  { %6329 = vmatpush3.bf16.msra.mxu0 %v8070_v7 }
0x13ed   :  { %6330 = vmatprep.subr.bf16.mxu0 %v6880_v15 }
0x14bc   :  { %v4057_v41 = vpop.f32.mrb[42].mxu1 }
0x14bd   :  { %v4949_v56 = vpop.f32.mrb[43].mxu1  ;;  %v4062_v36 = vsel %vm4061_vm5, %v4057_v41, -inf }
0x14be   :  { %4063 = vmax.xlane.f32.xlu1 %v4062_v36  ;;  %v3829_v56 = vld [vmem:[#allocation11 + $0x20] sm:$0xff]  ;;  %v3830_v36 = vld [vmem:[#allocation11 + $0x28] sm:$0xff] }
0x154b   :  { %v4064_v51 = vpop.xlane.xlu1 %4063 }
0x154c   :  { %v4065_v45 = vsub.f32 %v4057_v41, %v4064_v51  ;;  %v8074_v41 = vpack.c.bf16 %v3828_v14, %v3827_v60  ;;  %v8078_v51 = vpack.c.bf16 %v3830_v36, %v3829_v56 }
0x154e   :  { %v4066_v1 = vmul.f32 1.442695, %v4065_v45  ;;  %6332 = vmatpush3.bf16.msra.mxu0 %v8074_v41  ;;  %v3831_v45 = vld [vmem:[#allocation11 + $0x30] sm:$0xff] }
0x154f   :  { %6333 = vmatprep.subr.bf16.mxu0 %v6880_v15 }
0x1550   :  { %6707 = vpow2.f32 %v4066_v1  ;;  %v3832_v1 = vld [vmem:[#allocation11 + $0x38] sm:$0xff] }
0x1552   :  { %6335 = vmatpush3.bf16.msra.mxu0 %v8078_v51 }
0x1553   :  { %6336 = vmatprep.subr.bf16.mxu0 %v6880_v15 }
0x155a   :  { %v6708_v26 = vpop.eup %6707 }
0x155b   :  { %v4068_v52 = vsel %vm4061_vm5, %v6708_v26, 0.0 }
0x155c   :  { %4069 = vadd.xlane.f32.xlu1 %v4068_v52  ;;  %v4306_v52 = vadd.s32 1, %v3842_v13 }
0x155e   :  { %vm4307_vm6 = vcmp.eq.s32.totalorder %v8212_v24, %v4306_v52 }
0x155f   :  { %v4841_v27 = vsel %vm4307_vm6, 1.0, %v8209_v30 }
0x15e9   :  { %v4070_v5 = vpop.xlane.xlu1 %4069 }
0x15ea   :  { %6709 = vrcp.f32 %v4070_v5 }
0x15f4   :  { %v6710_v53 = vpop.eup %6709 }
0x15f5   :  { %v4072_v21 = vmul.f32 %v6710_v53, %v6708_v26  ;;  %v8082_v26 = vpack.c.bf16 %v3832_v1, %v3831_v45 }
0x15f7   :  { %4953 = vmatmul.mubr.msk.f32.vlgmr.msra.gmra.mrb[44].mxu1 %vm4061_vm5, %v4072_v21  ;;  %6338 = vmatpush3.bf16.msra.mxu0 %v8082_v26 }
0x15f8   :  { %6305 = vmatpush3.bf16.msra.mxu1 %v8035_v12  ;;  %4987 = vmatprep.mubr.msk.f32.mxu1 %vm6881_vm3, %v8209_v30 }
0x15f9   :  { %6306 = vmatprep.subr.bf16.mxu1 %v6880_v15  ;;  %6339 = vmatprep.subr.bf16.mxu0 %v6880_v15 }
0x15fc   :  { %6308 = vmatpush3.bf16.msra.mxu1 %v8039_v55 }
0x15fd   :  { %6309 = vmatprep.subr.bf16.mxu1 %v6880_v15 }
0x1600   :  { %6311 = vmatpush3.bf16.msra.mxu1 %v8045_v8 }
0x1601   :  { %6312 = vmatprep.subr.bf16.mxu1 %v6880_v15 }
0x1604   :  { %6314 = vmatpush3.bf16.msra.mxu1 %v8049_v43 }
0x1605   :  { %6315 = vmatprep.subr.bf16.mxu1 %v6880_v15 }
0x1608   :  { %6317 = vmatpush3.bf16.msra.mxu1 %v8053_v20 }
0x1609   :  { %6318 = vmatprep.subr.bf16.mxu1 %v6880_v15 }
0x160c   :  { %6320 = vmatpush3.bf16.msra.mxu1 %v8057_v28 }
0x160d   :  { %6321 = vmatprep.subr.bf16.mxu1 %v6880_v15 }
0x1610   :  { %6323 = vmatpush3.bf16.msra.mxu1 %v8061_v0 }
0x1611   :  { %6324 = vmatprep.subr.bf16.mxu1 %v6880_v15 }
0x1614   :  { %6326 = vmatpush3.bf16.msra.mxu1 %v8065_v32 }
0x1615   :  { %6351 = vmatprep.subr.bf16.mxu1 %v6880_v15 }
0x16ca   :  { %v4142_v5 = vpop.f32.mrb[44].mxu1 }
0x16cb   :  { %v4954_v6 = vpop.f32.mrb[45].mxu1  ;;  %4988 = vmatmul.mubr.f32.vlgmr.msra.gmra.mrb[46].mxu1 %v4142_v5 }
0x16cc   :  { %6353 = vmatpush3.bf16.msra.mxu1 %v8011_v31  ;;  %5029 = vmatprep.mubr.msk.f32.mxu1 %vm6881_vm3, %v8209_v30 }
0x16cd   :  { %6355 = vmatprep.subr.bf16.mxu1 %v7951_v40  ;;  %v3833_v40 = vld [vmem:[#allocation11 + $0x40] sm:$0xff] }
0x16cf   :  { %5030 = vmatmul.mubr.msk.f32.vlgmr.msra.gmra.mrb[48].mxu1 %vm122_vm0, %v4841_v27 }
0x16d0   :  { %6357 = vmatpush1.bf16.msra.mxu1 %v7953_v39  ;;  %4447 = vmatprep.mubr.f32.mxu1 %v8209_v30  ;;  %v3834_v39 = vld [vmem:[#allocation11 + $0x48] sm:$0xff] }
0x16d1   :  { %6359 = vmatprep.subr.bf16.mxu1 %v7955_v46  ;;  %v6340_v46 = vpack.c.bf16 %v3834_v39, %v3833_v40 }
0x16d3   :  { %6341 = vmatpush3.bf16.msra.mxu0 %v6340_v46 }
0x16d4   :  { %6361 = vmatpush1.bf16.msra.mxu1 %v7959_v18  ;;  %6342 = vmatprep.subr.bf16.mxu0 %v6880_v15  ;;  %v3835_v18 = vld [vmem:[#allocation11 + $0x50] sm:$0xff] }
0x16d5   :  { %6363 = vmatprep.subr.bf16.mxu1 %v7962_v33  ;;  %v3836_v33 = vld [vmem:[#allocation11 + $0x58] sm:$0xff] }
0x16d8   :  { %6365 = vmatpush1.bf16.msra.mxu1 %v7965_v61  ;;  %v3837_v61 = vld [vmem:[#allocation11 + $0x60] sm:$0xff] }
0x16d9   :  { %6367 = vmatprep.subr.bf16.mxu1 %v7968_v35  ;;  %v6343_v35 = vpack.c.bf16 %v3836_v33, %v3835_v18 }
0x16db   :  { %6344 = vmatpush3.bf16.msra.mxu0 %v6343_v35 }
0x16dc   :  { %6369 = vmatpush1.bf16.msra.mxu1 %v7971_v57  ;;  %v3838_v57 = vld [vmem:[#allocation11 + $0x68] sm:$0xff]  ;;  %6345 = vmatprep.subr.bf16.mxu0 %v6880_v15 }
0x16dd   :  { %6371 = vmatprep.subr.bf16.mxu1 %v7974_v49  ;;  %v6346_v49 = vpack.c.bf16 %v3838_v57, %v3837_v61 }
0x16df   :  { %6347 = vmatpush3.bf16.msra.mxu0 %v6346_v49 }
0x16e0   :  { %6373 = vmatpush1.bf16.msra.mxu1 %v7977_v23  ;;  %v3839_v23 = vld [vmem:[#allocation11 + $0x70] sm:$0xff]  ;;  %6348 = vmatprep.subr.bf16.mxu0 %v6880_v15 }
0x16e1   :  { %6375 = vmatprep.subr.bf16.mxu1 %v7980_v62  ;;  %v3840_v62 = vld [vmem:[#allocation11 + $0x78] sm:$0xff] }
0x16e4   :  { %6377 = vmatpush1.bf16.msra.mxu1 %v7983_v38  ;;  %v6349_v38 = vpack.c.bf16 %v3840_v62, %v3839_v23 }
0x16e5   :  { %6379 = vmatprep.subr.bf16.mxu1 %v7986_v50 }
0x16e6   :  { %6350 = vmatpush3.bf16.msra.mxu0 %v6349_v38 }
0x16e7   :  { %5032 = vmatprep.subr.mxu0 %v8209_v30 }
0x16e8   :  { %6381 = vmatpush1.bf16.msra.mxu1 %v7989_v58 }
0x16e9   :  { %6383 = vmatprep.subr.bf16.mxu1 %v7992_v44 }
0x16ec   :  { %6385 = vmatpush1.bf16.msra.mxu1 %v7995_v9 }
0x16ed   :  { %6410 = vmatprep.subr.bf16.mxu1 %v6880_v15 }
0x179e   :  { %v4212_v50 = vpop.f32.mrb[46].mxu1 }
0x179f   :  { %v4213_v58 = vadd.f32 %v4212_v50, %v8028_v29  ;;  %v4989_v44 = vpop.f32.mrb[47].mxu1  ;;  %v4843_v29 = vld [vmem:[%s8187_s5 + $0x8] sm:$0xff] }
0x17a1   :  { %6711 = vtanh.f32 %v4213_v58 }
0x17a2   :  { %v8117_v9 = vpop.f32.mrb[48].mxu1 }
0x17a3   :  { %v5031_v63 = vpop.f32.mrb[49].mxu1  ;;  %4448 = vmatmul.mubr.f32.vlgmr.msra.gmra.mrb[50].mxu1 %v8117_v9 }
0x17a4   :  { %6412 = vmatpush3.bf16.msra.mxu1 %v8070_v7  ;;  %5109 = vmatprep.mubr.msk.f32.mxu1 %vm6881_vm3, %v8209_v30 }
0x17a5   :  { %6413 = vmatprep.subr.bf16.mxu1 %v6880_v15 }
0x17a8   :  { %6415 = vmatpush3.bf16.msra.mxu1 %v8074_v41 }
0x17a9   :  { %6416 = vmatprep.subr.bf16.mxu1 %v6880_v15 }
0x17ab   :  { %v6712_v13 = vpop.eup %6711 }
0x17ac   :  { %v4217_v24 = vadd.f32 %v6712_v13, %v8023_v19  ;;  %6418 = vmatpush3.bf16.msra.mxu1 %v8078_v51 }
0x17ad   :  { %6419 = vmatprep.subr.bf16.mxu1 %v6880_v15 }
0x17ae   :  { %v4218_v31 = vmul.f32 0.70710677, %v4217_v24 }
0x17b0   :  { %5023 = vmatmul.mubr.f32.vlgmr.msra.gmra.mrb[44].mxu0 %v4218_v31  ;;  %6421 = vmatpush3.bf16.msra.mxu1 %v8082_v26 }
0x17b1   :  { %5033 = vmatpush3.xpose.msra.mxu0 %v4843_v29  ;;  %5034 = vmatprep.mubr.msk.f32.mxu0 %vm6881_vm3, %v8209_v30 }
0x17b2   :  { %5037 = vmatprep.subr.mxu0 %v8209_v30  ;;  %6422 = vmatprep.subr.bf16.mxu1 %v6880_v15 }
0x17b4   :  { %6424 = vmatpush3.bf16.msra.mxu1 %v6340_v46 }
0x17b5   :  { %6425 = vmatprep.subr.bf16.mxu1 %v6880_v15 }
0x17b8   :  { %6427 = vmatpush3.bf16.msra.mxu1 %v6343_v35 }
0x17b9   :  { %6428 = vmatprep.subr.bf16.mxu1 %v6880_v15 }
0x17bc   :  { %6430 = vmatpush3.bf16.msra.mxu1 %v6346_v49 }
0x17bd   :  { %6431 = vmatprep.subr.bf16.mxu1 %v6880_v15 }
0x17c0   :  { %6433 = vmatpush3.bf16.msra.mxu1 %v6349_v38 }
0x1876   :  { %v4449_v19 = vpop.f32.mrb[50].mxu1 }
0x1877   :  { %v4451_v53 = vpop.f32.mrb[51].mxu1  ;;  %5035 = vmatmul.mubr.f32.vlgmr.msra.gmra.mrb[46].mxu0 %v4449_v19 }
0x1878   :  { %5038 = vmatpush3.msra.mxu0 %v4843_v29  ;;  %5039 = vmatprep.mubr.msk.f32.mxu0 %vm6881_vm3, %v8209_v30 }
0x1879   :  { %6386 = vmatprep.subr.bf16.mxu0 %v6880_v15 }
0x1883   :  { %v4291_v21 = vpop.f32.mrb[44].mxu0 }
0x1884   :  { %v5024_v47 = vpop.f32.mrb[45].mxu0  ;;  %v4292_v34 = vadd.f32 %v4840_v42, %v4291_v21 }
0x194a   :  { %v4522_v59 = vpop.f32.mrb[46].mxu0 }
0x194b   :  { %v5036_v3 = vpop.f32.mrb[47].mxu0  ;;  %v4526_v48 = vsel %vm4061_vm5, %v4522_v59, -inf }
0x194c   :  { %4527 = vmax.xlane.f32.xlu0 %v4526_v48 }
0x19d9   :  { %v4528_v22 = vpop.xlane.xlu0 %4527 }
0x19da   :  { %v4529_v17 = vsub.f32 %v4522_v59, %v4528_v22 }
0x19dc   :  { %v4530_v10 = vmul.f32 1.442695, %v4529_v17 }
0x19de   :  { %6713 = vpow2.f32 %v4530_v10 }
0x19e8   :  { %v6714_v2 = vpop.eup %6713 }
0x19e9   :  { %v4532_v11 = vsel %vm4061_vm5, %v6714_v2, 0.0 }
0x19ea   :  { %4533 = vadd.xlane.f32.xlu1 %v4532_v11 }
0x19ee   :  { %4295 = vmax.xlane.f32.xlu1 %v4292_v34 }
0x1a77   :  { %v4534_v16 = vpop.xlane.xlu1 %4533 }
0x1a78   :  { %6715 = vrcp.f32 %v4534_v16 }
0x1a82   :  { %v6716_v25 = vpop.eup %6715 }
0x1a83   :  { %v4536_v37 = vmul.f32 %v6716_v25, %v6714_v2 }
0x1a85   :  { %5040 = vmatmul.mubr.msk.f32.vlgmr.msra.gmra.mrb[48].mxu0 %vm4061_vm5, %v4536_v37 }
0x1a86   :  { %6388 = vmatpush3.bf16.msra.mxu0 %v8035_v12  ;;  %5074 = vmatprep.mubr.msk.f32.mxu0 %vm6881_vm3, %v8209_v30 }
0x1a87   :  { %6389 = vmatprep.subr.bf16.mxu0 %v6880_v15 }
0x1a8a   :  { %6391 = vmatpush3.bf16.msra.mxu0 %v8039_v55 }
0x1a8b   :  { %6392 = vmatprep.subr.bf16.mxu0 %v6880_v15 }
0x1a8e   :  { %6394 = vmatpush3.bf16.msra.mxu0 %v8045_v8 }
0x1a8f   :  { %6395 = vmatprep.subr.bf16.mxu0 %v6880_v15 }
0x1a92   :  { %6397 = vmatpush3.bf16.msra.mxu0 %v8049_v43 }
0x1a93   :  { %6398 = vmatprep.subr.bf16.mxu0 %v6880_v15 }
0x1a96   :  { %6400 = vmatpush3.bf16.msra.mxu0 %v8053_v20 }
0x1a97   :  { %6401 = vmatprep.subr.bf16.mxu0 %v6880_v15 }
0x1a9a   :  { %6403 = vmatpush3.bf16.msra.mxu0 %v8057_v28  ;;  %v4296_v28 = vpop.xlane.xlu1 %4295 }
0x1a9b   :  { %6404 = vmatprep.subr.bf16.mxu0 %v6880_v15  ;;  %v4297_v7 = vsub.f32 %v4292_v34, %v4296_v28 }
0x1a9d   :  { %v4298_v60 = vmul.f32 1.442695, %v4297_v7 }
0x1a9e   :  { %6406 = vmatpush3.bf16.msra.mxu0 %v8061_v0 }
0x1a9f   :  { %6407 = vmatprep.subr.bf16.mxu0 %v6880_v15 }
0x1aa2   :  { %6409 = vmatpush3.bf16.msra.mxu0 %v8065_v32 }
0x1b58   :  { %v4606_v30 = vpop.f32.mrb[48].mxu0 }
0x1b59   :  { %v5041_v12 = vpop.f32.mrb[49].mxu0  ;;  %5075 = vmatmul.mubr.f32.vlgmr.msra.gmra.mrb[50].mxu0 %v4606_v30 }
0x1c2c   :  { %v4676_v55 = vpop.f32.mrb[50].mxu0 }
0x1c2d   :  { %v4677_v8 = vadd.f32 %v4676_v55, %v4451_v53  ;;  %v5076_v43 = vpop.f32.mrb[51].mxu0 }
0x1c2f   :  { %6717 = vtanh.f32 %v4677_v8 }
0x1c30   :  { %6719 = vpow2.f32 %v4298_v60 }
0x1c39   :  { %v6718_v20 = vpop.eup %6717 }
0x1c3a   :  { %v4681_v4 = vadd.f32 %v6718_v20, %v8117_v9  ;;  %v6720_v32 = vpop.eup %6719 }
0x1c3c   :  { %v4682_v54 = vmul.f32 0.70710677, %v4681_v4 }
0x1c3e   :  { %5110 = vmatmul.mubr.f32.vlgmr.msra.gmra.mrb[52].mxu1 %v4682_v54 }
0x1d11   :  { %v4749_v0 = vpop.f32.mrb[52].mxu1 }
0x1d12   :  { %v4750_v15 = vadd.f32 %v4840_v42, %v4749_v0  ;;  %v5111_v14 = vpop.f32.mrb[53].mxu1 }
0x1d14   :  { %4753 = vmax.xlane.f32.xlu1 %v4750_v15 }
0x1d18   :  { %4300 = vadd.xlane.f32.xlu1 %v6720_v32 }
0x1da1   :  { %v4754_v41 = vpop.xlane.xlu1 %4753 }
0x1da2   :  { %v4755_v56 = vsub.f32 %v4750_v15, %v4754_v41 }
0x1da4   :  { %v4756_v36 = vmul.f32 1.442695, %v4755_v56 }
0x1da5   :  { %v4301_v51 = vpop.xlane.xlu1 %4300 }
0x1da6   :  { %6721 = vpow2.f32 %v4756_v36 }
0x1da7   :  { %6723 = vlog2.f32 %v4301_v51 }
0x1db0   :  { %v6722_v45 = vpop.eup %6721 }
0x1db1   :  { %v6724_v1 = vpop.eup %6723  ;;  %4758 = vadd.xlane.f32.xlu1 %v6722_v45 }
0x1db2   :  { %v4303_v26 = vmul.f32 0.6931472, %v6724_v1 }
0x1db4   :  { %v4304_v52 = vsub.f32 %v4297_v7, %v4303_v26 }
0x1db6   :  { %4305 = vst [vmem:[#allocation12] sm:$0xff] %v4304_v52 }
0x1e3e   :  { %v4759_v5 = vpop.xlane.xlu1 %4758 }
0x1e3f   :  { %6725 = vlog2.f32 %v4759_v5 }
0x1e49   :  { %v6726_v6 = vpop.eup %6725 }
0x1e4a   :  { %v4761_v27 = vmul.f32 0.6931472, %v6726_v6 }
0x1e4c   :  { %v4762_v40 = vsub.f32 %v4755_v56, %v4761_v27 }
0x1e4e   :  { %4764 = vst [vmem:[#allocation12 + $0x8] sm:$0xff] %v4762_v40 }
0x1e4f   :  { %6848 = shalt.err (!%p6845_p2)
}
0x1e50   :  { %s6849_s15 = scalar_lea.hbm %s8192_s10, 256 }
0x1e51   :  { %p6850_p3 = scmp.ne.s32.totalorder %s8192_s10, %s6849_s15  ;;  %p6853_p4 = scmp.lt.u32.totalorder %s6849_s15, %s8192_s10 }
0x1e53   :  { %p6855_p5 = pnand %p6853_p4, %p6850_p3 }
0x1e55   :  { %6858 = shalt.err (!%p6855_p5)
}
0x1e56   :  { %4776 = dma.vmem_to_hbm [thread:$0]  %s4771_s12, 256, %s8192_s10, [#allocation5], %s6871_s3, %s6871_s3, %s6872_s14  }
0x1e57   :  { %6865 = dma.done.wait [#allocation5], 256  }
0x1e58   :  { %6866 = vsyncadd [#allocation5], 4294967040 }
0x1e59   :  { %4780 = vsyncpa [#allocation4], 1 }
0x1e5a   :  { %4781 = vsyncpa [#allocation7], 1 }
0x1e5b   :  { %4782 = vsyncpa [#allocation10], 1 }
0x1e5c   :  { %4783 = vsyncpa [#allocation5], 1 }

</bundles_post_ra>
